<compile_context>
chip_gen: v6e
topology: v6e:2x2x1
jax: 0.10.0
libtpu: 0.0.40
codegen_flags: <defaults>
</compile_context>

<pallas_src>
import math

import jax
import jax.numpy as jnp
from jax import lax
from jax.experimental import pallas as pl
from jax.experimental.pallas import tpu as pltpu

_SUB = 16                       # batch padding / block unit (bf16 sublane tile)
_MAX_BB = 128                   # cap on the batch block (MXU rows)
_LANE = 128
_VMEM_BUDGET = 48 * 1024 * 1024  # keep per-step VMEM well under v7x's 64 MiB


def _round_up(x, m):
    return ((x + m - 1) // m) * m


def _nbytes(shape, dtype):
    return math.prod(shape) * jnp.dtype(dtype).itemsize


def _vmem_needed(T, BB, E, Hp, Op):
    """Approximate per-grid-step VMEM footprint (double-buffered in/out)."""
    emb_blk = 2 * _nbytes((T, BB, E), jnp.bfloat16)
    out_blk = 2 * _nbytes((T, BB, Op), jnp.float32)
    weights = 2 * (2 * _nbytes((E, 4 * Hp), jnp.bfloat16)
                   + 2 * _nbytes((Hp, 4 * Hp), jnp.bfloat16)
                   + 2 * _nbytes((1, 4 * Hp), jnp.float32)
                   + 2 * _nbytes((Hp, Op), jnp.bfloat16)
                   + _nbytes((1, Op), jnp.float32))
    scratch = (2 * _nbytes((T * BB, 4 * Hp), jnp.float32)
               + 2 * _nbytes((T * BB, Hp), jnp.bfloat16))
    return emb_blk + out_blk + weights + scratch


def bilstm_linear_softmax_kernel(
    emb_ref,      # (T, BB, E)   bf16 embedded tokens, time-major (one batch block)
    wih_f_ref,    # (E, 4Hp)     bf16 forward  W_ih^T   (gate order i,f,g,o)
    whh_f_ref,    # (Hp, 4Hp)    bf16 forward  W_hh^T
    b_f_ref,      # (1, 4Hp)     f32  forward  b_ih + b_hh
    wih_b_ref,    # (E, 4Hp)     bf16 reverse  W_ih^T
    whh_b_ref,    # (Hp, 4Hp)    bf16 reverse  W_hh^T
    b_b_ref,      # (1, 4Hp)     f32  reverse  b_ih + b_hh
    wlin_f_ref,   # (Hp, Op)     bf16 linear weight, forward-half, transposed
    wlin_b_ref,   # (Hp, Op)     bf16 linear weight, backward-half, transposed
    blin_ref,     # (1, Op)      f32  linear bias (-1e30 on padded labels)
    out_ref,      # (T, BB, Op)  f32  softmax probabilities, time-major
    pre_f_ref,    # scratch (T*BB, 4Hp) f32
    pre_b_ref,    # scratch (T*BB, 4Hp) f32
    hf_ref,       # scratch (T*BB, Hp)  bf16
    hb_ref,       # scratch (T*BB, Hp)  bf16
):
    T, BB, E = emb_ref.shape
    Hp = whh_f_ref.shape[0]
    Op = blin_ref.shape[1]

    # Row-chunking for prologue/epilogue: largest divisor of T with
    # <= ~512 rows per chunk (bounds live vregs, avoids VMEM spills).
    max_tc = max(1, 512 // BB)
    tc = 1
    for d in range(min(T, max_tc), 0, -1):
        if T % d == 0:
            tc = d
            break
    n_chunks = T // tc
    rows_c = tc * BB

    # ---- prologue: input projections for all timesteps (one MXU matmul per
    #      direction per chunk), written straight into scratch. ----
    @pl.loop(0, n_chunks)
    def _(chunk):
        t0 = chunk * tc
        r0 = pl.multiple_of(chunk * rows_c, BB)
        xe = emb_ref[pl.ds(t0, tc), :, :].reshape(rows_c, E)
        pre_f_ref[pl.ds(r0, rows_c), :] = (
            jnp.dot(xe, wih_f_ref[...], preferred_element_type=jnp.float32)
            + b_f_ref[...])
        pre_b_ref[pl.ds(r0, rows_c), :] = (
            jnp.dot(xe, wih_b_ref[...], preferred_element_type=jnp.float32)
            + b_b_ref[...])

    def sig(z):
        # sigmoid via tanh -> EUP slot (keeps the VPU free on the serial path)
        return 0.5 * jnp.tanh(0.5 * z) + 0.5

    def lstm_gates(gates, c):
        i = sig(gates[:, 0 * Hp:1 * Hp])
        f = sig(gates[:, 1 * Hp:2 * Hp])
        g = jnp.tanh(gates[:, 2 * Hp:3 * Hp])
        o = sig(gates[:, 3 * Hp:4 * Hp])
        c_new = f * c + i * g
        h_new = o * jnp.tanh(c_new)
        return h_new, c_new

    # ---- fused forward + backward recurrence (independent directions). ----
    def step(s, carry):
        h_f, c_f, h_b, c_b = carry
        of = pl.multiple_of(s * BB, BB)                # forward  t = s
        ob = pl.multiple_of((T - 1 - s) * BB, BB)      # backward t = T-1-s

        gates_f = pre_f_ref[pl.ds(of, BB), :] + jnp.dot(
            h_f, whh_f_ref[...], preferred_element_type=jnp.float32)
        gates_b = pre_b_ref[pl.ds(ob, BB), :] + jnp.dot(
            h_b, whh_b_ref[...], preferred_element_type=jnp.float32)

        h_f_new, c_f_new = lstm_gates(gates_f, c_f)    # f32 gate math
        h_b_new, c_b_new = lstm_gates(gates_b, c_b)

        # h is only ever consumed as a bf16 MXU operand (next-step matmul and
        # output projection), so the single cast here loses nothing extra.
        h_f_bf = h_f_new.astype(jnp.bfloat16)
        h_b_bf = h_b_new.astype(jnp.bfloat16)
        hf_ref[pl.ds(of, BB), :] = h_f_bf
        hb_ref[pl.ds(ob, BB), :] = h_b_bf
        return (h_f_bf, c_f_new, h_b_bf, c_b_new)      # c stays f32

    h0 = jnp.zeros((BB, Hp), jnp.bfloat16)
    c0 = jnp.zeros((BB, Hp), jnp.float32)
    if T * BB <= 256:
        unroll = True
    else:
        unroll = max(2, min(8, 512 // BB))  # avoid carry-vreg spills at big BB
    lax.fori_loop(0, T, step, (h0, c0, h0, c0), unroll=unroll)

    # ---- epilogue: linear + bias + exact softmax, chunked over rows. ----
    @pl.loop(0, n_chunks)
    def _(chunk):
        t0 = chunk * tc
        r0 = pl.multiple_of(chunk * rows_c, BB)
        logits = (
            jnp.dot(hf_ref[pl.ds(r0, rows_c), :], wlin_f_ref[...],
                    preferred_element_type=jnp.float32)
            + jnp.dot(hb_ref[pl.ds(r0, rows_c), :], wlin_b_ref[...],
                      preferred_element_type=jnp.float32)
            + blin_ref[...])
        m = jnp.max(logits, axis=-1, keepdims=True)
        e = jnp.exp(logits - m)                        # padded lanes -> exp(-1e30)=0
        probs = e / jnp.sum(e, axis=-1, keepdims=True)  # exact divide (PyTorch parity)
        out_ref[pl.ds(t0, tc), :, :] = probs.reshape(tc, BB, Op)


def init_params(key, num_embeddings, output_size, embedding_dim, hidden_size):
    """Deterministic synthetic parameters matching nn.Module shapes."""
    E, H, O = embedding_dim, hidden_size, output_size
    keys = jax.random.split(key, 11)
    k_lstm = 1.0 / jnp.sqrt(jnp.float32(H))
    k_lin = 1.0 / jnp.sqrt(jnp.float32(2 * H))

    def u(k, shape, scale):
        return jax.random.uniform(k, shape, jnp.float32, -scale, scale)

    return {
        "embedding": jax.random.normal(keys[0], (num_embeddings, E), jnp.float32),
        # forward direction (weight_ih_l0, weight_hh_l0, bias_ih_l0, bias_hh_l0)
        "w_ih_f": u(keys[1], (4 * H, E), k_lstm),
        "w_hh_f": u(keys[2], (4 * H, H), k_lstm),
        "b_ih_f": u(keys[3], (4 * H,), k_lstm),
        "b_hh_f": u(keys[4], (4 * H,), k_lstm),
        # reverse direction (weight_ih_l0_reverse, ...)
        "w_ih_b": u(keys[5], (4 * H, E), k_lstm),
        "w_hh_b": u(keys[6], (4 * H, H), k_lstm),
        "b_ih_b": u(keys[7], (4 * H,), k_lstm),
        "b_hh_b": u(keys[8], (4 * H,), k_lstm),
        # linear (O, 2H), (O,)
        "w_lin": u(keys[9], (O, 2 * H), k_lin),
        "b_lin": u(keys[10], (O,), k_lin),
    }


def lstm_crf_forward(x, params):
    """x: (B, T) int32 token ids. Returns (probs (B,T,O) float32, None)."""
    B, T = x.shape
    table = params["embedding"]
    E = table.shape[1]
    H = params["w_hh_f"].shape[1]
    O = params["w_lin"].shape[0]

    Hp = _round_up(H, _LANE)
    Op = _round_up(O, _LANE)

    # Batch block: as large as the VMEM budget allows (amortizes the serial
    # per-step MXU latency and reduces the number of sequential grid steps).
    BB = min(_round_up(max(B, 1), _SUB), _MAX_BB)
    while BB > _SUB and _vmem_needed(T, BB, E, Hp, Op) > _VMEM_BUDGET:
        BB = max(_SUB, _round_up(BB // 2, _SUB))
    Bp = _round_up(B, BB)

    needed = _vmem_needed(T, BB, E, Hp, Op)
    vmem_limit = int(max(32 << 20, min(needed + (8 << 20), 100 << 20)))

    # Embedding gather directly in time-major order (transpose the small int
    # index array, not the float tensor); emb only feeds the MXU -> bf16.
    emb = jnp.take(table, x.T, axis=0).astype(jnp.bfloat16)   # (T, B, E)
    if Bp != B:
        emb = jnp.pad(emb, ((0, 0), (0, Bp - B), (0, 0)))      # (T, Bp, E)

    # ---- parameter packing (per-gate zero-padding of the hidden axis). ----
    def pack_w_ih(w):    # (4H, E) -> (E, 4Hp) bf16
        w4 = jnp.pad(w.reshape(4, H, E), ((0, 0), (0, Hp - H), (0, 0)))
        return jnp.transpose(w4.reshape(4 * Hp, E)).astype(jnp.bfloat16)

    def pack_w_hh(w):    # (4H, H) -> (Hp, 4Hp) bf16
        w4 = jnp.pad(w.reshape(4, H, H), ((0, 0), (0, Hp - H), (0, Hp - H)))
        return jnp.transpose(w4.reshape(4 * Hp, Hp)).astype(jnp.bfloat16)

    def pack_b(b_ih, b_hh):   # -> (1, 4Hp) f32
        b = jnp.pad((b_ih + b_hh).reshape(4, H), ((0, 0), (0, Hp - H)))
        return b.reshape(1, 4 * Hp).astype(jnp.float32)

    wih_f = pack_w_ih(params["w_ih_f"])
    whh_f = pack_w_hh(params["w_hh_f"])
    b_f = pack_b(params["b_ih_f"], params["b_hh_f"])
    wih_b = pack_w_ih(params["w_ih_b"])
    whh_b = pack_w_hh(params["w_hh_b"])
    b_b = pack_b(params["b_ih_b"], params["b_hh_b"])

    wlin = params["w_lin"]                                    # (O, 2H)
    wlin_f = jnp.transpose(
        jnp.pad(wlin[:, :H], ((0, Op - O), (0, Hp - H)))).astype(jnp.bfloat16)
    wlin_b = jnp.transpose(
        jnp.pad(wlin[:, H:], ((0, Op - O), (0, Hp - H)))).astype(jnp.bfloat16)
    # padded label lanes get -1e30 bias so their softmax prob is exactly 0
    blin = jnp.pad(params["b_lin"].astype(jnp.float32), (0, Op - O),
                   constant_values=-1e30).reshape(1, Op)

    grid = (Bp // BB,)
    out_tbo = pl.pallas_call(
        bilstm_linear_softmax_kernel,
        out_shape=jax.ShapeDtypeStruct((T, Bp, Op), jnp.float32),
        grid_spec=pltpu.PrefetchScalarGridSpec(
            num_scalar_prefetch=0,
            grid=grid,
            in_specs=[
                pl.BlockSpec((T, BB, E), lambda b: (0, b, 0)),     # emb
                pl.BlockSpec((E, 4 * Hp), lambda b: (0, 0)),       # wih_f
                pl.BlockSpec((Hp, 4 * Hp), lambda b: (0, 0)),      # whh_f
                pl.BlockSpec((1, 4 * Hp), lambda b: (0, 0)),       # b_f
                pl.BlockSpec((E, 4 * Hp), lambda b: (0, 0)),       # wih_b
                pl.BlockSpec((Hp, 4 * Hp), lambda b: (0, 0)),      # whh_b
                pl.BlockSpec((1, 4 * Hp), lambda b: (0, 0)),       # b_b
                pl.BlockSpec((Hp, Op), lambda b: (0, 0)),          # wlin_f
                pl.BlockSpec((Hp, Op), lambda b: (0, 0)),          # wlin_b
                pl.BlockSpec((1, Op), lambda b: (0, 0)),           # blin
            ],
            out_specs=pl.BlockSpec((T, BB, Op), lambda b: (0, b, 0)),
            scratch_shapes=[
                pltpu.VMEM((T * BB, 4 * Hp), jnp.float32),
                pltpu.VMEM((T * BB, 4 * Hp), jnp.float32),
                pltpu.VMEM((T * BB, Hp), jnp.bfloat16),
                pltpu.VMEM((T * BB, Hp), jnp.bfloat16),
            ],
        ),
        compiler_params=pltpu.CompilerParams(
            dimension_semantics=("parallel",),
            vmem_limit_bytes=vmem_limit,
        ),
    )(emb, wih_f, whh_f, b_f, wih_b, whh_b, b_b, wlin_f, wlin_b, blin)

    # strip padding; return batch-first like PyTorch (output is tiny)
    probs = jnp.transpose(out_tbo[:, :B, :O], (1, 0, 2))      # (B, T, O)
    return probs, None


def reference_forward(x, params):
    """Pure-JAX f32 reference of the PyTorch forward (y=None path)."""
    emb = jnp.take(params["embedding"], x, axis=0)            # (B, T, E)
    B, T, E = emb.shape
    H = params["w_hh_f"].shape[1]
    xs = jnp.transpose(emb, (1, 0, 2))                        # (T, B, E)

    def run(w_ih, w_hh, b, seq):
        def cell(carry, x_t):
            h, c = carry
            gates = x_t @ w_ih.T + h @ w_hh.T + b
            i, f, g, o = jnp.split(gates, 4, axis=-1)
            c = jax.nn.sigmoid(f) * c + jax.nn.sigmoid(i) * jnp.tanh(g)
            h = jax.nn.sigmoid(o) * jnp.tanh(c)
            return (h, c), h
        h0 = jnp.zeros((B, H), jnp.float32)
        c0 = jnp.zeros((B, H), jnp.float32)
        _, hs = lax.scan(cell, (h0, c0), seq)
        return hs

    hf = run(params["w_ih_f"], params["w_hh_f"],
             params["b_ih_f"] + params["b_hh_f"], xs)
    hb = run(params["w_ih_b"], params["w_hh_b"],
             params["b_ih_b"] + params["b_hh_b"], xs[::-1])[::-1]
    out = jnp.concatenate([hf, hb], axis=-1)                  # (T, B, 2H)
    logits = out @ params["w_lin"].T + params["b_lin"]
    probs = jax.nn.softmax(logits, axis=-1)
    return jnp.transpose(probs, (1, 0, 2))                    # (B, T, O)


if __name__ == "__main__":
    B, T = 2, 8
    num_embeddings, output_size = 50, 8
    embedding_dim, hidden_size = 32, 32

    key = jax.random.PRNGKey(0)
    pkey, xkey = jax.random.split(key)
    params = init_params(pkey, num_embeddings, output_size,
                         embedding_dim, hidden_size)
    x = jax.random.randint(xkey, (B, T), 0, num_embeddings, dtype=jnp.int32)

    fwd = jax.jit(lstm_crf_forward)
    probs, loss = fwd(x, params)
    probs = jax.block_until_ready(probs)

    assert probs.shape == (B, T, output_size)
    assert loss is None
    # softmax rows must sum to ~1 (exact divide in the epilogue)
    assert jnp.allclose(jnp.sum(probs, axis=-1), 1.0, atol=1e-3)
    # compare against the pure-JAX f32 reference (bf16 MXU operands in-kernel)
    ref = reference_forward(x, params)
    assert jnp.max(jnp.abs(probs - ref)) < 4e-2
    print("KERNEL_OK")
</pallas_src>

<mosaic_0001>
module attributes {stable_mosaic.version = 11 : i64} {
  func.func @bilstm_linear_softmax_kernel(%arg0: i32, %arg1: memref<8x16x32xbf16, #tpu.memory_space<vmem>>, %arg2: memref<32x512xbf16, #tpu.memory_space<vmem>>, %arg3: memref<128x512xbf16, #tpu.memory_space<vmem>>, %arg4: memref<1x512xf32, #tpu.memory_space<vmem>>, %arg5: memref<32x512xbf16, #tpu.memory_space<vmem>>, %arg6: memref<128x512xbf16, #tpu.memory_space<vmem>>, %arg7: memref<1x512xf32, #tpu.memory_space<vmem>>, %arg8: memref<128x128xbf16, #tpu.memory_space<vmem>>, %arg9: memref<128x128xbf16, #tpu.memory_space<vmem>>, %arg10: memref<1x128xf32, #tpu.memory_space<vmem>>, %arg11: memref<8x16x128xf32, #tpu.memory_space<vmem>>, %arg12: memref<128x512xf32, #tpu.memory_space<vmem>>, %arg13: memref<128x512xf32, #tpu.memory_space<vmem>>, %arg14: memref<128x128xbf16, #tpu.memory_space<vmem>>, %arg15: memref<128x128xbf16, #tpu.memory_space<vmem>>) attributes {dimension_semantics = [#tpu.dimension_semantics<parallel>], iteration_bounds = array<i64: 1>, scalar_prefetch = 0 : i64, scratch_operands = 4 : i64, tpu.core_type = #tpu.core_type<tc>, window_params = [{transform_indices = @transform_0, window_bounds = array<i64: 8, 16, 32>}, {pipeline_mode = #tpu.pipeline_mode<synchronous>, transform_indices = @transform_1, window_bounds = array<i64: 32, 512>}, {pipeline_mode = #tpu.pipeline_mode<synchronous>, transform_indices = @transform_2, window_bounds = array<i64: 128, 512>}, {pipeline_mode = #tpu.pipeline_mode<synchronous>, transform_indices = @transform_3, window_bounds = array<i64: 1, 512>}, {pipeline_mode = #tpu.pipeline_mode<synchronous>, transform_indices = @transform_4, window_bounds = array<i64: 32, 512>}, {pipeline_mode = #tpu.pipeline_mode<synchronous>, transform_indices = @transform_5, window_bounds = array<i64: 128, 512>}, {pipeline_mode = #tpu.pipeline_mode<synchronous>, transform_indices = @transform_6, window_bounds = array<i64: 1, 512>}, {pipeline_mode = #tpu.pipeline_mode<synchronous>, transform_indices = @transform_7, window_bounds = array<i64: 128, 128>}, {pipeline_mode = #tpu.pipeline_mode<synchronous>, transform_indices = @transform_8, window_bounds = array<i64: 128, 128>}, {pipeline_mode = #tpu.pipeline_mode<synchronous>, transform_indices = @transform_9, window_bounds = array<i64: 1, 128>}, {transform_indices = @transform_10, window_bounds = array<i64: 8, 16, 128>}]} {
    %c0_i32 = arith.constant 0 : i32
    %c1_i32 = arith.constant 1 : i32
    %0 = arith.muli %c0_i32, %c1_i32 : i32
    %c0_i32_0 = arith.constant 0 : i32
    %1 = arith.addi %c0_i32_0, %0 : i32
    %c8_i32 = arith.constant 8 : i32
    %2 = arith.muli %1, %c8_i32 : i32
    %c128_i32 = arith.constant 128 : i32
    %3 = arith.muli %1, %c128_i32 : i32
    %4 = tpu.assume_multiple %3, 16 : i32
    %5 = arith.index_cast %2 : i32 to index
    %c0 = arith.constant 0 : index
    %c0_1 = arith.constant 0 : index
    %6 = vector.load %arg1[%5, %c0, %c0_1] : memref<8x16x32xbf16, #tpu.memory_space<vmem>>, vector<8x16x32xbf16>
    %7 = vector.shape_cast %6 : vector<8x16x32xbf16> to vector<128x32xbf16>
    %c0_2 = arith.constant 0 : index
    %c0_3 = arith.constant 0 : index
    %8 = vector.load %arg2[%c0_2, %c0_3] : memref<32x512xbf16, #tpu.memory_space<vmem>>, vector<32x512xbf16>
    %cst = arith.constant dense<0.000000e+00> : vector<128x512xf32>
    %9 = tpu.matmul %7, %8, %cst {dimension_numbers = #tpu.dot_dimension_numbers<[1], [0], [0], [1], [0, 0, 1, 1], [], []>} : vector<128x32xbf16>, vector<32x512xbf16>, vector<128x512xf32> -> vector<128x512xf32>
    %c0_4 = arith.constant 0 : index
    %c0_5 = arith.constant 0 : index
    %10 = vector.load %arg4[%c0_4, %c0_5] : memref<1x512xf32, #tpu.memory_space<vmem>>, vector<1x512xf32>
    %11 = vector.broadcast %10 : vector<1x512xf32> to vector<128x512xf32>
    %12 = arith.addf %9, %11 : vector<128x512xf32>
    %13 = arith.index_cast %4 : i32 to index
    %c0_6 = arith.constant 0 : index
    %14 = vector.load %arg12[%13, %c0_6] : memref<128x512xf32, #tpu.memory_space<vmem>>, vector<128x512xf32>
    tpu.vector_store %arg12[%13, %c0_6], %12 {strides = array<i32>} : memref<128x512xf32, #tpu.memory_space<vmem>>, vector<128x512xf32>,
    %c0_7 = arith.constant 0 : index
    %c0_8 = arith.constant 0 : index
    %15 = vector.load %arg5[%c0_7, %c0_8] : memref<32x512xbf16, #tpu.memory_space<vmem>>, vector<32x512xbf16>
    %cst_9 = arith.constant dense<0.000000e+00> : vector<128x512xf32>
    %16 = tpu.matmul %7, %15, %cst_9 {dimension_numbers = #tpu.dot_dimension_numbers<[1], [0], [0], [1], [0, 0, 1, 1], [], []>} : vector<128x32xbf16>, vector<32x512xbf16>, vector<128x512xf32> -> vector<128x512xf32>
    %c0_10 = arith.constant 0 : index
    %c0_11 = arith.constant 0 : index
    %17 = vector.load %arg7[%c0_10, %c0_11] : memref<1x512xf32, #tpu.memory_space<vmem>>, vector<1x512xf32>
    %18 = vector.broadcast %17 : vector<1x512xf32> to vector<128x512xf32>
    %19 = arith.addf %16, %18 : vector<128x512xf32>
    %20 = arith.index_cast %4 : i32 to index
    %c0_12 = arith.constant 0 : index
    %21 = vector.load %arg13[%20, %c0_12] : memref<128x512xf32, #tpu.memory_space<vmem>>, vector<128x512xf32>
    tpu.vector_store %arg13[%20, %c0_12], %19 {strides = array<i32>} : memref<128x512xf32, #tpu.memory_space<vmem>>, vector<128x512xf32>,
    %c1_i32_13 = arith.constant 1 : i32
    %cst_14 = arith.constant 0.000000e+00 : bf16
    %22 = vector.broadcast %cst_14 : bf16 to vector<16x128xbf16>
    %cst_15 = arith.constant 0.000000e+00 : f32
    %23 = vector.broadcast %cst_15 : f32 to vector<16x128xf32>
    %c0_i32_16 = arith.constant 0 : i32
    %c16_i32 = arith.constant 16 : i32
    %24 = arith.muli %c0_i32_16, %c16_i32 : i32
    %25 = tpu.assume_multiple %24, 16 : i32
    %c7_i32 = arith.constant 7 : i32
    %26 = arith.subi %c7_i32, %c0_i32_16 : i32
    %c16_i32_17 = arith.constant 16 : i32
    %27 = arith.muli %26, %c16_i32_17 : i32
    %28 = tpu.assume_multiple %27, 16 : i32
    %29 = arith.index_cast %25 : i32 to index
    %c0_18 = arith.constant 0 : index
    %30 = vector.load %arg12[%29, %c0_18] : memref<128x512xf32, #tpu.memory_space<vmem>>, vector<16x512xf32>
    %c0_19 = arith.constant 0 : index
    %c0_20 = arith.constant 0 : index
    %31 = vector.load %arg3[%c0_19, %c0_20] : memref<128x512xbf16, #tpu.memory_space<vmem>>, vector<128x512xbf16>
    %cst_21 = arith.constant dense<0.000000e+00> : vector<16x512xf32>
    %32 = tpu.matmul %22, %31, %cst_21 {dimension_numbers = #tpu.dot_dimension_numbers<[1], [0], [0], [1], [0, 0, 1, 1], [], []>} : vector<16x128xbf16>, vector<128x512xbf16>, vector<16x512xf32> -> vector<16x512xf32>
    %33 = arith.addf %30, %32 : vector<16x512xf32>
    %34 = arith.index_cast %28 : i32 to index
    %c0_22 = arith.constant 0 : index
    %35 = vector.load %arg13[%34, %c0_22] : memref<128x512xf32, #tpu.memory_space<vmem>>, vector<16x512xf32>
    %c0_23 = arith.constant 0 : index
    %c0_24 = arith.constant 0 : index
    %36 = vector.load %arg6[%c0_23, %c0_24] : memref<128x512xbf16, #tpu.memory_space<vmem>>, vector<128x512xbf16>
    %cst_25 = arith.constant dense<0.000000e+00> : vector<16x512xf32>
    %37 = tpu.matmul %22, %36, %cst_25 {dimension_numbers = #tpu.dot_dimension_numbers<[1], [0], [0], [1], [0, 0, 1, 1], [], []>} : vector<16x128xbf16>, vector<128x512xbf16>, vector<16x512xf32> -> vector<16x512xf32>
    %38 = arith.addf %35, %37 : vector<16x512xf32>
    %39 = vector.extract_strided_slice %33 {offsets = [0, 0], sizes = [16, 128], strides = [1, 1]} : vector<16x512xf32> to vector<16x128xf32>
    %cst_26 = arith.constant 5.000000e-01 : f32
    %40 = vector.broadcast %cst_26 : f32 to vector<16x128xf32>
    %41 = arith.mulf %40, %39 : vector<16x128xf32>
    %42 = math.tanh %41 : vector<16x128xf32>
    %cst_27 = arith.constant 5.000000e-01 : f32
    %43 = vector.broadcast %cst_27 : f32 to vector<16x128xf32>
    %44 = arith.mulf %43, %42 : vector<16x128xf32>
    %cst_28 = arith.constant 5.000000e-01 : f32
    %45 = vector.broadcast %cst_28 : f32 to vector<16x128xf32>
    %46 = arith.addf %44, %45 : vector<16x128xf32>
    %47 = vector.extract_strided_slice %33 {offsets = [0, 128], sizes = [16, 128], strides = [1, 1]} : vector<16x512xf32> to vector<16x128xf32>
    %cst_29 = arith.constant 5.000000e-01 : f32
    %48 = vector.broadcast %cst_29 : f32 to vector<16x128xf32>
    %49 = arith.mulf %48, %47 : vector<16x128xf32>
    %50 = math.tanh %49 : vector<16x128xf32>
    %cst_30 = arith.constant 5.000000e-01 : f32
    %51 = vector.broadcast %cst_30 : f32 to vector<16x128xf32>
    %52 = arith.mulf %51, %50 : vector<16x128xf32>
    %cst_31 = arith.constant 5.000000e-01 : f32
    %53 = vector.broadcast %cst_31 : f32 to vector<16x128xf32>
    %54 = arith.addf %52, %53 : vector<16x128xf32>
    %55 = vector.extract_strided_slice %33 {offsets = [0, 256], sizes = [16, 128], strides = [1, 1]} : vector<16x512xf32> to vector<16x128xf32>
    %56 = math.tanh %55 : vector<16x128xf32>
    %57 = vector.extract_strided_slice %33 {offsets = [0, 384], sizes = [16, 128], strides = [1, 1]} : vector<16x512xf32> to vector<16x128xf32>
    %cst_32 = arith.constant 5.000000e-01 : f32
    %58 = vector.broadcast %cst_32 : f32 to vector<16x128xf32>
    %59 = arith.mulf %58, %57 : vector<16x128xf32>
    %60 = math.tanh %59 : vector<16x128xf32>
    %cst_33 = arith.constant 5.000000e-01 : f32
    %61 = vector.broadcast %cst_33 : f32 to vector<16x128xf32>
    %62 = arith.mulf %61, %60 : vector<16x128xf32>
    %cst_34 = arith.constant 5.000000e-01 : f32
    %63 = vector.broadcast %cst_34 : f32 to vector<16x128xf32>
    %64 = arith.addf %62, %63 : vector<16x128xf32>
    %65 = arith.mulf %54, %23 : vector<16x128xf32>
    %66 = arith.mulf %46, %56 : vector<16x128xf32>
    %67 = arith.addf %65, %66 : vector<16x128xf32>
    %68 = math.tanh %67 : vector<16x128xf32>
    %69 = arith.mulf %64, %68 : vector<16x128xf32>
    %70 = vector.extract_strided_slice %38 {offsets = [0, 0], sizes = [16, 128], strides = [1, 1]} : vector<16x512xf32> to vector<16x128xf32>
    %cst_35 = arith.constant 5.000000e-01 : f32
    %71 = vector.broadcast %cst_35 : f32 to vector<16x128xf32>
    %72 = arith.mulf %71, %70 : vector<16x128xf32>
    %73 = math.tanh %72 : vector<16x128xf32>
    %cst_36 = arith.constant 5.000000e-01 : f32
    %74 = vector.broadcast %cst_36 : f32 to vector<16x128xf32>
    %75 = arith.mulf %74, %73 : vector<16x128xf32>
    %cst_37 = arith.constant 5.000000e-01 : f32
    %76 = vector.broadcast %cst_37 : f32 to vector<16x128xf32>
    %77 = arith.addf %75, %76 : vector<16x128xf32>
    %78 = vector.extract_strided_slice %38 {offsets = [0, 128], sizes = [16, 128], strides = [1, 1]} : vector<16x512xf32> to vector<16x128xf32>
    %cst_38 = arith.constant 5.000000e-01 : f32
    %79 = vector.broadcast %cst_38 : f32 to vector<16x128xf32>
    %80 = arith.mulf %79, %78 : vector<16x128xf32>
    %81 = math.tanh %80 : vector<16x128xf32>
    %cst_39 = arith.constant 5.000000e-01 : f32
    %82 = vector.broadcast %cst_39 : f32 to vector<16x128xf32>
    %83 = arith.mulf %82, %81 : vector<16x128xf32>
    %cst_40 = arith.constant 5.000000e-01 : f32
    %84 = vector.broadcast %cst_40 : f32 to vector<16x128xf32>
    %85 = arith.addf %83, %84 : vector<16x128xf32>
    %86 = vector.extract_strided_slice %38 {offsets = [0, 256], sizes = [16, 128], strides = [1, 1]} : vector<16x512xf32> to vector<16x128xf32>
    %87 = math.tanh %86 : vector<16x128xf32>
    %88 = vector.extract_strided_slice %38 {offsets = [0, 384], sizes = [16, 128], strides = [1, 1]} : vector<16x512xf32> to vector<16x128xf32>
    %cst_41 = arith.constant 5.000000e-01 : f32
    %89 = vector.broadcast %cst_41 : f32 to vector<16x128xf32>
    %90 = arith.mulf %89, %88 : vector<16x128xf32>
    %91 = math.tanh %90 : vector<16x128xf32>
    %cst_42 = arith.constant 5.000000e-01 : f32
    %92 = vector.broadcast %cst_42 : f32 to vector<16x128xf32>
    %93 = arith.mulf %92, %91 : vector<16x128xf32>
    %cst_43 = arith.constant 5.000000e-01 : f32
    %94 = vector.broadcast %cst_43 : f32 to vector<16x128xf32>
    %95 = arith.addf %93, %94 : vector<16x128xf32>
    %96 = arith.mulf %85, %23 : vector<16x128xf32>
    %97 = arith.mulf %77, %87 : vector<16x128xf32>
    %98 = arith.addf %96, %97 : vector<16x128xf32>
    %99 = math.tanh %98 : vector<16x128xf32>
    %100 = arith.mulf %95, %99 : vector<16x128xf32>
    %101 = arith.truncf %69 : vector<16x128xf32> to vector<16x128xbf16>
    %102 = arith.truncf %100 : vector<16x128xf32> to vector<16x128xbf16>
    %103 = arith.index_cast %25 : i32 to index
    %c0_44 = arith.constant 0 : index
    %104 = vector.load %arg14[%103, %c0_44] : memref<128x128xbf16, #tpu.memory_space<vmem>>, vector<16x128xbf16>
    tpu.vector_store %arg14[%103, %c0_44], %101 {strides = array<i32>} : memref<128x128xbf16, #tpu.memory_space<vmem>>, vector<16x128xbf16>,
    %105 = arith.index_cast %28 : i32 to index
    %c0_45 = arith.constant 0 : index
    %106 = vector.load %arg15[%105, %c0_45] : memref<128x128xbf16, #tpu.memory_space<vmem>>, vector<16x128xbf16>
    tpu.vector_store %arg15[%105, %c0_45], %102 {strides = array<i32>} : memref<128x128xbf16, #tpu.memory_space<vmem>>, vector<16x128xbf16>,
    %c1_i32_46 = arith.constant 1 : i32
    %c16_i32_47 = arith.constant 16 : i32
    %107 = arith.muli %c1_i32_46, %c16_i32_47 : i32
    %108 = tpu.assume_multiple %107, 16 : i32
    %c7_i32_48 = arith.constant 7 : i32
    %109 = arith.subi %c7_i32_48, %c1_i32_46 : i32
    %c16_i32_49 = arith.constant 16 : i32
    %110 = arith.muli %109, %c16_i32_49 : i32
    %111 = tpu.assume_multiple %110, 16 : i32
    %112 = arith.index_cast %108 : i32 to index
    %c0_50 = arith.constant 0 : index
    %113 = vector.load %arg12[%112, %c0_50] : memref<128x512xf32, #tpu.memory_space<vmem>>, vector<16x512xf32>
    %c0_51 = arith.constant 0 : index
    %c0_52 = arith.constant 0 : index
    %114 = vector.load %arg3[%c0_51, %c0_52] : memref<128x512xbf16, #tpu.memory_space<vmem>>, vector<128x512xbf16>
    %cst_53 = arith.constant dense<0.000000e+00> : vector<16x512xf32>
    %115 = tpu.matmul %101, %114, %cst_53 {dimension_numbers = #tpu.dot_dimension_numbers<[1], [0], [0], [1], [0, 0, 1, 1], [], []>} : vector<16x128xbf16>, vector<128x512xbf16>, vector<16x512xf32> -> vector<16x512xf32>
    %116 = arith.addf %113, %115 : vector<16x512xf32>
    %117 = arith.index_cast %111 : i32 to index
    %c0_54 = arith.constant 0 : index
    %118 = vector.load %arg13[%117, %c0_54] : memref<128x512xf32, #tpu.memory_space<vmem>>, vector<16x512xf32>
    %c0_55 = arith.constant 0 : index
    %c0_56 = arith.constant 0 : index
    %119 = vector.load %arg6[%c0_55, %c0_56] : memref<128x512xbf16, #tpu.memory_space<vmem>>, vector<128x512xbf16>
    %cst_57 = arith.constant dense<0.000000e+00> : vector<16x512xf32>
    %120 = tpu.matmul %102, %119, %cst_57 {dimension_numbers = #tpu.dot_dimension_numbers<[1], [0], [0], [1], [0, 0, 1, 1], [], []>} : vector<16x128xbf16>, vector<128x512xbf16>, vector<16x512xf32> -> vector<16x512xf32>
    %121 = arith.addf %118, %120 : vector<16x512xf32>
    %122 = vector.extract_strided_slice %116 {offsets = [0, 0], sizes = [16, 128], strides = [1, 1]} : vector<16x512xf32> to vector<16x128xf32>
    %cst_58 = arith.constant 5.000000e-01 : f32
    %123 = vector.broadcast %cst_58 : f32 to vector<16x128xf32>
    %124 = arith.mulf %123, %122 : vector<16x128xf32>
    %125 = math.tanh %124 : vector<16x128xf32>
    %cst_59 = arith.constant 5.000000e-01 : f32
    %126 = vector.broadcast %cst_59 : f32 to vector<16x128xf32>
    %127 = arith.mulf %126, %125 : vector<16x128xf32>
    %cst_60 = arith.constant 5.000000e-01 : f32
    %128 = vector.broadcast %cst_60 : f32 to vector<16x128xf32>
    %129 = arith.addf %127, %128 : vector<16x128xf32>
    %130 = vector.extract_strided_slice %116 {offsets = [0, 128], sizes = [16, 128], strides = [1, 1]} : vector<16x512xf32> to vector<16x128xf32>
    %cst_61 = arith.constant 5.000000e-01 : f32
    %131 = vector.broadcast %cst_61 : f32 to vector<16x128xf32>
    %132 = arith.mulf %131, %130 : vector<16x128xf32>
    %133 = math.tanh %132 : vector<16x128xf32>
    %cst_62 = arith.constant 5.000000e-01 : f32
    %134 = vector.broadcast %cst_62 : f32 to vector<16x128xf32>
    %135 = arith.mulf %134, %133 : vector<16x128xf32>
    %cst_63 = arith.constant 5.000000e-01 : f32
    %136 = vector.broadcast %cst_63 : f32 to vector<16x128xf32>
    %137 = arith.addf %135, %136 : vector<16x128xf32>
    %138 = vector.extract_strided_slice %116 {offsets = [0, 256], sizes = [16, 128], strides = [1, 1]} : vector<16x512xf32> to vector<16x128xf32>
    %139 = math.tanh %138 : vector<16x128xf32>
    %140 = vector.extract_strided_slice %116 {offsets = [0, 384], sizes = [16, 128], strides = [1, 1]} : vector<16x512xf32> to vector<16x128xf32>
    %cst_64 = arith.constant 5.000000e-01 : f32
    %141 = vector.broadcast %cst_64 : f32 to vector<16x128xf32>
    %142 = arith.mulf %141, %140 : vector<16x128xf32>
    %143 = math.tanh %142 : vector<16x128xf32>
    %cst_65 = arith.constant 5.000000e-01 : f32
    %144 = vector.broadcast %cst_65 : f32 to vector<16x128xf32>
    %145 = arith.mulf %144, %143 : vector<16x128xf32>
    %cst_66 = arith.constant 5.000000e-01 : f32
    %146 = vector.broadcast %cst_66 : f32 to vector<16x128xf32>
    %147 = arith.addf %145, %146 : vector<16x128xf32>
    %148 = arith.mulf %137, %67 : vector<16x128xf32>
    %149 = arith.mulf %129, %139 : vector<16x128xf32>
    %150 = arith.addf %148, %149 : vector<16x128xf32>
    %151 = math.tanh %150 : vector<16x128xf32>
    %152 = arith.mulf %147, %151 : vector<16x128xf32>
    %153 = vector.extract_strided_slice %121 {offsets = [0, 0], sizes = [16, 128], strides = [1, 1]} : vector<16x512xf32> to vector<16x128xf32>
    %cst_67 = arith.constant 5.000000e-01 : f32
    %154 = vector.broadcast %cst_67 : f32 to vector<16x128xf32>
    %155 = arith.mulf %154, %153 : vector<16x128xf32>
    %156 = math.tanh %155 : vector<16x128xf32>
    %cst_68 = arith.constant 5.000000e-01 : f32
    %157 = vector.broadcast %cst_68 : f32 to vector<16x128xf32>
    %158 = arith.mulf %157, %156 : vector<16x128xf32>
    %cst_69 = arith.constant 5.000000e-01 : f32
    %159 = vector.broadcast %cst_69 : f32 to vector<16x128xf32>
    %160 = arith.addf %158, %159 : vector<16x128xf32>
    %161 = vector.extract_strided_slice %121 {offsets = [0, 128], sizes = [16, 128], strides = [1, 1]} : vector<16x512xf32> to vector<16x128xf32>
    %cst_70 = arith.constant 5.000000e-01 : f32
    %162 = vector.broadcast %cst_70 : f32 to vector<16x128xf32>
    %163 = arith.mulf %162, %161 : vector<16x128xf32>
    %164 = math.tanh %163 : vector<16x128xf32>
    %cst_71 = arith.constant 5.000000e-01 : f32
    %165 = vector.broadcast %cst_71 : f32 to vector<16x128xf32>
    %166 = arith.mulf %165, %164 : vector<16x128xf32>
    %cst_72 = arith.constant 5.000000e-01 : f32
    %167 = vector.broadcast %cst_72 : f32 to vector<16x128xf32>
    %168 = arith.addf %166, %167 : vector<16x128xf32>
    %169 = vector.extract_strided_slice %121 {offsets = [0, 256], sizes = [16, 128], strides = [1, 1]} : vector<16x512xf32> to vector<16x128xf32>
    %170 = math.tanh %169 : vector<16x128xf32>
    %171 = vector.extract_strided_slice %121 {offsets = [0, 384], sizes = [16, 128], strides = [1, 1]} : vector<16x512xf32> to vector<16x128xf32>
    %cst_73 = arith.constant 5.000000e-01 : f32
    %172 = vector.broadcast %cst_73 : f32 to vector<16x128xf32>
    %173 = arith.mulf %172, %171 : vector<16x128xf32>
    %174 = math.tanh %173 : vector<16x128xf32>
    %cst_74 = arith.constant 5.000000e-01 : f32
    %175 = vector.broadcast %cst_74 : f32 to vector<16x128xf32>
    %176 = arith.mulf %175, %174 : vector<16x128xf32>
    %cst_75 = arith.constant 5.000000e-01 : f32
    %177 = vector.broadcast %cst_75 : f32 to vector<16x128xf32>
    %178 = arith.addf %176, %177 : vector<16x128xf32>
    %179 = arith.mulf %168, %98 : vector<16x128xf32>
    %180 = arith.mulf %160, %170 : vector<16x128xf32>
    %181 = arith.addf %179, %180 : vector<16x128xf32>
    %182 = math.tanh %181 : vector<16x128xf32>
    %183 = arith.mulf %178, %182 : vector<16x128xf32>
    %184 = arith.truncf %152 : vector<16x128xf32> to vector<16x128xbf16>
    %185 = arith.truncf %183 : vector<16x128xf32> to vector<16x128xbf16>
    %186 = arith.index_cast %108 : i32 to index
    %c0_76 = arith.constant 0 : index
    %187 = vector.load %arg14[%186, %c0_76] : memref<128x128xbf16, #tpu.memory_space<vmem>>, vector<16x128xbf16>
    tpu.vector_store %arg14[%186, %c0_76], %184 {strides = array<i32>} : memref<128x128xbf16, #tpu.memory_space<vmem>>, vector<16x128xbf16>,
    %188 = arith.index_cast %111 : i32 to index
    %c0_77 = arith.constant 0 : index
    %189 = vector.load %arg15[%188, %c0_77] : memref<128x128xbf16, #tpu.memory_space<vmem>>, vector<16x128xbf16>
    tpu.vector_store %arg15[%188, %c0_77], %185 {strides = array<i32>} : memref<128x128xbf16, #tpu.memory_space<vmem>>, vector<16x128xbf16>,
    %c2_i32 = arith.constant 2 : i32
    %c16_i32_78 = arith.constant 16 : i32
    %190 = arith.muli %c2_i32, %c16_i32_78 : i32
    %191 = tpu.assume_multiple %190, 16 : i32
    %c7_i32_79 = arith.constant 7 : i32
    %192 = arith.subi %c7_i32_79, %c2_i32 : i32
    %c16_i32_80 = arith.constant 16 : i32
    %193 = arith.muli %192, %c16_i32_80 : i32
    %194 = tpu.assume_multiple %193, 16 : i32
    %195 = arith.index_cast %191 : i32 to index
    %c0_81 = arith.constant 0 : index
    %196 = vector.load %arg12[%195, %c0_81] : memref<128x512xf32, #tpu.memory_space<vmem>>, vector<16x512xf32>
    %c0_82 = arith.constant 0 : index
    %c0_83 = arith.constant 0 : index
    %197 = vector.load %arg3[%c0_82, %c0_83] : memref<128x512xbf16, #tpu.memory_space<vmem>>, vector<128x512xbf16>
    %cst_84 = arith.constant dense<0.000000e+00> : vector<16x512xf32>
    %198 = tpu.matmul %184, %197, %cst_84 {dimension_numbers = #tpu.dot_dimension_numbers<[1], [0], [0], [1], [0, 0, 1, 1], [], []>} : vector<16x128xbf16>, vector<128x512xbf16>, vector<16x512xf32> -> vector<16x512xf32>
    %199 = arith.addf %196, %198 : vector<16x512xf32>
    %200 = arith.index_cast %194 : i32 to index
    %c0_85 = arith.constant 0 : index
    %201 = vector.load %arg13[%200, %c0_85] : memref<128x512xf32, #tpu.memory_space<vmem>>, vector<16x512xf32>
    %c0_86 = arith.constant 0 : index
    %c0_87 = arith.constant 0 : index
    %202 = vector.load %arg6[%c0_86, %c0_87] : memref<128x512xbf16, #tpu.memory_space<vmem>>, vector<128x512xbf16>
    %cst_88 = arith.constant dense<0.000000e+00> : vector<16x512xf32>
    %203 = tpu.matmul %185, %202, %cst_88 {dimension_numbers = #tpu.dot_dimension_numbers<[1], [0], [0], [1], [0, 0, 1, 1], [], []>} : vector<16x128xbf16>, vector<128x512xbf16>, vector<16x512xf32> -> vector<16x512xf32>
    %204 = arith.addf %201, %203 : vector<16x512xf32>
    %205 = vector.extract_strided_slice %199 {offsets = [0, 0], sizes = [16, 128], strides = [1, 1]} : vector<16x512xf32> to vector<16x128xf32>
    %cst_89 = arith.constant 5.000000e-01 : f32
    %206 = vector.broadcast %cst_89 : f32 to vector<16x128xf32>
    %207 = arith.mulf %206, %205 : vector<16x128xf32>
    %208 = math.tanh %207 : vector<16x128xf32>
    %cst_90 = arith.constant 5.000000e-01 : f32
    %209 = vector.broadcast %cst_90 : f32 to vector<16x128xf32>
    %210 = arith.mulf %209, %208 : vector<16x128xf32>
    %cst_91 = arith.constant 5.000000e-01 : f32
    %211 = vector.broadcast %cst_91 : f32 to vector<16x128xf32>
    %212 = arith.addf %210, %211 : vector<16x128xf32>
    %213 = vector.extract_strided_slice %199 {offsets = [0, 128], sizes = [16, 128], strides = [1, 1]} : vector<16x512xf32> to vector<16x128xf32>
    %cst_92 = arith.constant 5.000000e-01 : f32
    %214 = vector.broadcast %cst_92 : f32 to vector<16x128xf32>
    %215 = arith.mulf %214, %213 : vector<16x128xf32>
    %216 = math.tanh %215 : vector<16x128xf32>
    %cst_93 = arith.constant 5.000000e-01 : f32
    %217 = vector.broadcast %cst_93 : f32 to vector<16x128xf32>
    %218 = arith.mulf %217, %216 : vector<16x128xf32>
    %cst_94 = arith.constant 5.000000e-01 : f32
    %219 = vector.broadcast %cst_94 : f32 to vector<16x128xf32>
    %220 = arith.addf %218, %219 : vector<16x128xf32>
    %221 = vector.extract_strided_slice %199 {offsets = [0, 256], sizes = [16, 128], strides = [1, 1]} : vector<16x512xf32> to vector<16x128xf32>
    %222 = math.tanh %221 : vector<16x128xf32>
    %223 = vector.extract_strided_slice %199 {offsets = [0, 384], sizes = [16, 128], strides = [1, 1]} : vector<16x512xf32> to vector<16x128xf32>
    %cst_95 = arith.constant 5.000000e-01 : f32
    %224 = vector.broadcast %cst_95 : f32 to vector<16x128xf32>
    %225 = arith.mulf %224, %223 : vector<16x128xf32>
    %226 = math.tanh %225 : vector<16x128xf32>
    %cst_96 = arith.constant 5.000000e-01 : f32
    %227 = vector.broadcast %cst_96 : f32 to vector<16x128xf32>
    %228 = arith.mulf %227, %226 : vector<16x128xf32>
    %cst_97 = arith.constant 5.000000e-01 : f32
    %229 = vector.broadcast %cst_97 : f32 to vector<16x128xf32>
    %230 = arith.addf %228, %229 : vector<16x128xf32>
    %231 = arith.mulf %220, %150 : vector<16x128xf32>
    %232 = arith.mulf %212, %222 : vector<16x128xf32>
    %233 = arith.addf %231, %232 : vector<16x128xf32>
    %234 = math.tanh %233 : vector<16x128xf32>
    %235 = arith.mulf %230, %234 : vector<16x128xf32>
    %236 = vector.extract_strided_slice %204 {offsets = [0, 0], sizes = [16, 128], strides = [1, 1]} : vector<16x512xf32> to vector<16x128xf32>
    %cst_98 = arith.constant 5.000000e-01 : f32
    %237 = vector.broadcast %cst_98 : f32 to vector<16x128xf32>
    %238 = arith.mulf %237, %236 : vector<16x128xf32>
    %239 = math.tanh %238 : vector<16x128xf32>
    %cst_99 = arith.constant 5.000000e-01 : f32
    %240 = vector.broadcast %cst_99 : f32 to vector<16x128xf32>
    %241 = arith.mulf %240, %239 : vector<16x128xf32>
    %cst_100 = arith.constant 5.000000e-01 : f32
    %242 = vector.broadcast %cst_100 : f32 to vector<16x128xf32>
    %243 = arith.addf %241, %242 : vector<16x128xf32>
    %244 = vector.extract_strided_slice %204 {offsets = [0, 128], sizes = [16, 128], strides = [1, 1]} : vector<16x512xf32> to vector<16x128xf32>
    %cst_101 = arith.constant 5.000000e-01 : f32
    %245 = vector.broadcast %cst_101 : f32 to vector<16x128xf32>
    %246 = arith.mulf %245, %244 : vector<16x128xf32>
    %247 = math.tanh %246 : vector<16x128xf32>
    %cst_102 = arith.constant 5.000000e-01 : f32
    %248 = vector.broadcast %cst_102 : f32 to vector<16x128xf32>
    %249 = arith.mulf %248, %247 : vector<16x128xf32>
    %cst_103 = arith.constant 5.000000e-01 : f32
    %250 = vector.broadcast %cst_103 : f32 to vector<16x128xf32>
    %251 = arith.addf %249, %250 : vector<16x128xf32>
    %252 = vector.extract_strided_slice %204 {offsets = [0, 256], sizes = [16, 128], strides = [1, 1]} : vector<16x512xf32> to vector<16x128xf32>
    %253 = math.tanh %252 : vector<16x128xf32>
    %254 = vector.extract_strided_slice %204 {offsets = [0, 384], sizes = [16, 128], strides = [1, 1]} : vector<16x512xf32> to vector<16x128xf32>
    %cst_104 = arith.constant 5.000000e-01 : f32
    %255 = vector.broadcast %cst_104 : f32 to vector<16x128xf32>
    %256 = arith.mulf %255, %254 : vector<16x128xf32>
    %257 = math.tanh %256 : vector<16x128xf32>
    %cst_105 = arith.constant 5.000000e-01 : f32
    %258 = vector.broadcast %cst_105 : f32 to vector<16x128xf32>
    %259 = arith.mulf %258, %257 : vector<16x128xf32>
    %cst_106 = arith.constant 5.000000e-01 : f32
    %260 = vector.broadcast %cst_106 : f32 to vector<16x128xf32>
    %261 = arith.addf %259, %260 : vector<16x128xf32>
    %262 = arith.mulf %251, %181 : vector<16x128xf32>
    %263 = arith.mulf %243, %253 : vector<16x128xf32>
    %264 = arith.addf %262, %263 : vector<16x128xf32>
    %265 = math.tanh %264 : vector<16x128xf32>
    %266 = arith.mulf %261, %265 : vector<16x128xf32>
    %267 = arith.truncf %235 : vector<16x128xf32> to vector<16x128xbf16>
    %268 = arith.truncf %266 : vector<16x128xf32> to vector<16x128xbf16>
    %269 = arith.index_cast %191 : i32 to index
    %c0_107 = arith.constant 0 : index
    %270 = vector.load %arg14[%269, %c0_107] : memref<128x128xbf16, #tpu.memory_space<vmem>>, vector<16x128xbf16>
    tpu.vector_store %arg14[%269, %c0_107], %267 {strides = array<i32>} : memref<128x128xbf16, #tpu.memory_space<vmem>>, vector<16x128xbf16>,
    %271 = arith.index_cast %194 : i32 to index
    %c0_108 = arith.constant 0 : index
    %272 = vector.load %arg15[%271, %c0_108] : memref<128x128xbf16, #tpu.memory_space<vmem>>, vector<16x128xbf16>
    tpu.vector_store %arg15[%271, %c0_108], %268 {strides = array<i32>} : memref<128x128xbf16, #tpu.memory_space<vmem>>, vector<16x128xbf16>,
    %c3_i32 = arith.constant 3 : i32
    %c16_i32_109 = arith.constant 16 : i32
    %273 = arith.muli %c3_i32, %c16_i32_109 : i32
    %274 = tpu.assume_multiple %273, 16 : i32
    %c7_i32_110 = arith.constant 7 : i32
    %275 = arith.subi %c7_i32_110, %c3_i32 : i32
    %c16_i32_111 = arith.constant 16 : i32
    %276 = arith.muli %275, %c16_i32_111 : i32
    %277 = tpu.assume_multiple %276, 16 : i32
    %278 = arith.index_cast %274 : i32 to index
    %c0_112 = arith.constant 0 : index
    %279 = vector.load %arg12[%278, %c0_112] : memref<128x512xf32, #tpu.memory_space<vmem>>, vector<16x512xf32>
    %c0_113 = arith.constant 0 : index
    %c0_114 = arith.constant 0 : index
    %280 = vector.load %arg3[%c0_113, %c0_114] : memref<128x512xbf16, #tpu.memory_space<vmem>>, vector<128x512xbf16>
    %cst_115 = arith.constant dense<0.000000e+00> : vector<16x512xf32>
    %281 = tpu.matmul %267, %280, %cst_115 {dimension_numbers = #tpu.dot_dimension_numbers<[1], [0], [0], [1], [0, 0, 1, 1], [], []>} : vector<16x128xbf16>, vector<128x512xbf16>, vector<16x512xf32> -> vector<16x512xf32>
    %282 = arith.addf %279, %281 : vector<16x512xf32>
    %283 = arith.index_cast %277 : i32 to index
    %c0_116 = arith.constant 0 : index
    %284 = vector.load %arg13[%283, %c0_116] : memref<128x512xf32, #tpu.memory_space<vmem>>, vector<16x512xf32>
    %c0_117 = arith.constant 0 : index
    %c0_118 = arith.constant 0 : index
    %285 = vector.load %arg6[%c0_117, %c0_118] : memref<128x512xbf16, #tpu.memory_space<vmem>>, vector<128x512xbf16>
    %cst_119 = arith.constant dense<0.000000e+00> : vector<16x512xf32>
    %286 = tpu.matmul %268, %285, %cst_119 {dimension_numbers = #tpu.dot_dimension_numbers<[1], [0], [0], [1], [0, 0, 1, 1], [], []>} : vector<16x128xbf16>, vector<128x512xbf16>, vector<16x512xf32> -> vector<16x512xf32>
    %287 = arith.addf %284, %286 : vector<16x512xf32>
    %288 = vector.extract_strided_slice %282 {offsets = [0, 0], sizes = [16, 128], strides = [1, 1]} : vector<16x512xf32> to vector<16x128xf32>
    %cst_120 = arith.constant 5.000000e-01 : f32
    %289 = vector.broadcast %cst_120 : f32 to vector<16x128xf32>
    %290 = arith.mulf %289, %288 : vector<16x128xf32>
    %291 = math.tanh %290 : vector<16x128xf32>
    %cst_121 = arith.constant 5.000000e-01 : f32
    %292 = vector.broadcast %cst_121 : f32 to vector<16x128xf32>
    %293 = arith.mulf %292, %291 : vector<16x128xf32>
    %cst_122 = arith.constant 5.000000e-01 : f32
    %294 = vector.broadcast %cst_122 : f32 to vector<16x128xf32>
    %295 = arith.addf %293, %294 : vector<16x128xf32>
    %296 = vector.extract_strided_slice %282 {offsets = [0, 128], sizes = [16, 128], strides = [1, 1]} : vector<16x512xf32> to vector<16x128xf32>
    %cst_123 = arith.constant 5.000000e-01 : f32
    %297 = vector.broadcast %cst_123 : f32 to vector<16x128xf32>
    %298 = arith.mulf %297, %296 : vector<16x128xf32>
    %299 = math.tanh %298 : vector<16x128xf32>
    %cst_124 = arith.constant 5.000000e-01 : f32
    %300 = vector.broadcast %cst_124 : f32 to vector<16x128xf32>
    %301 = arith.mulf %300, %299 : vector<16x128xf32>
    %cst_125 = arith.constant 5.000000e-01 : f32
    %302 = vector.broadcast %cst_125 : f32 to vector<16x128xf32>
    %303 = arith.addf %301, %302 : vector<16x128xf32>
    %304 = vector.extract_strided_slice %282 {offsets = [0, 256], sizes = [16, 128], strides = [1, 1]} : vector<16x512xf32> to vector<16x128xf32>
    %305 = math.tanh %304 : vector<16x128xf32>
    %306 = vector.extract_strided_slice %282 {offsets = [0, 384], sizes = [16, 128], strides = [1, 1]} : vector<16x512xf32> to vector<16x128xf32>
    %cst_126 = arith.constant 5.000000e-01 : f32
    %307 = vector.broadcast %cst_126 : f32 to vector<16x128xf32>
    %308 = arith.mulf %307, %306 : vector<16x128xf32>
    %309 = math.tanh %308 : vector<16x128xf32>
    %cst_127 = arith.constant 5.000000e-01 : f32
    %310 = vector.broadcast %cst_127 : f32 to vector<16x128xf32>
    %311 = arith.mulf %310, %309 : vector<16x128xf32>
    %cst_128 = arith.constant 5.000000e-01 : f32
    %312 = vector.broadcast %cst_128 : f32 to vector<16x128xf32>
    %313 = arith.addf %311, %312 : vector<16x128xf32>
    %314 = arith.mulf %303, %233 : vector<16x128xf32>
    %315 = arith.mulf %295, %305 : vector<16x128xf32>
    %316 = arith.addf %314, %315 : vector<16x128xf32>
    %317 = math.tanh %316 : vector<16x128xf32>
    %318 = arith.mulf %313, %317 : vector<16x128xf32>
    %319 = vector.extract_strided_slice %287 {offsets = [0, 0], sizes = [16, 128], strides = [1, 1]} : vector<16x512xf32> to vector<16x128xf32>
    %cst_129 = arith.constant 5.000000e-01 : f32
    %320 = vector.broadcast %cst_129 : f32 to vector<16x128xf32>
    %321 = arith.mulf %320, %319 : vector<16x128xf32>
    %322 = math.tanh %321 : vector<16x128xf32>
    %cst_130 = arith.constant 5.000000e-01 : f32
    %323 = vector.broadcast %cst_130 : f32 to vector<16x128xf32>
    %324 = arith.mulf %323, %322 : vector<16x128xf32>
    %cst_131 = arith.constant 5.000000e-01 : f32
    %325 = vector.broadcast %cst_131 : f32 to vector<16x128xf32>
    %326 = arith.addf %324, %325 : vector<16x128xf32>
    %327 = vector.extract_strided_slice %287 {offsets = [0, 128], sizes = [16, 128], strides = [1, 1]} : vector<16x512xf32> to vector<16x128xf32>
    %cst_132 = arith.constant 5.000000e-01 : f32
    %328 = vector.broadcast %cst_132 : f32 to vector<16x128xf32>
    %329 = arith.mulf %328, %327 : vector<16x128xf32>
    %330 = math.tanh %329 : vector<16x128xf32>
    %cst_133 = arith.constant 5.000000e-01 : f32
    %331 = vector.broadcast %cst_133 : f32 to vector<16x128xf32>
    %332 = arith.mulf %331, %330 : vector<16x128xf32>
    %cst_134 = arith.constant 5.000000e-01 : f32
    %333 = vector.broadcast %cst_134 : f32 to vector<16x128xf32>
    %334 = arith.addf %332, %333 : vector<16x128xf32>
    %335 = vector.extract_strided_slice %287 {offsets = [0, 256], sizes = [16, 128], strides = [1, 1]} : vector<16x512xf32> to vector<16x128xf32>
    %336 = math.tanh %335 : vector<16x128xf32>
    %337 = vector.extract_strided_slice %287 {offsets = [0, 384], sizes = [16, 128], strides = [1, 1]} : vector<16x512xf32> to vector<16x128xf32>
    %cst_135 = arith.constant 5.000000e-01 : f32
    %338 = vector.broadcast %cst_135 : f32 to vector<16x128xf32>
    %339 = arith.mulf %338, %337 : vector<16x128xf32>
    %340 = math.tanh %339 : vector<16x128xf32>
    %cst_136 = arith.constant 5.000000e-01 : f32
    %341 = vector.broadcast %cst_136 : f32 to vector<16x128xf32>
    %342 = arith.mulf %341, %340 : vector<16x128xf32>
    %cst_137 = arith.constant 5.000000e-01 : f32
    %343 = vector.broadcast %cst_137 : f32 to vector<16x128xf32>
    %344 = arith.addf %342, %343 : vector<16x128xf32>
    %345 = arith.mulf %334, %264 : vector<16x128xf32>
    %346 = arith.mulf %326, %336 : vector<16x128xf32>
    %347 = arith.addf %345, %346 : vector<16x128xf32>
    %348 = math.tanh %347 : vector<16x128xf32>
    %349 = arith.mulf %344, %348 : vector<16x128xf32>
    %350 = arith.truncf %318 : vector<16x128xf32> to vector<16x128xbf16>
    %351 = arith.truncf %349 : vector<16x128xf32> to vector<16x128xbf16>
    %352 = arith.index_cast %274 : i32 to index
    %c0_138 = arith.constant 0 : index
    %353 = vector.load %arg14[%352, %c0_138] : memref<128x128xbf16, #tpu.memory_space<vmem>>, vector<16x128xbf16>
    tpu.vector_store %arg14[%352, %c0_138], %350 {strides = array<i32>} : memref<128x128xbf16, #tpu.memory_space<vmem>>, vector<16x128xbf16>,
    %354 = arith.index_cast %277 : i32 to index
    %c0_139 = arith.constant 0 : index
    %355 = vector.load %arg15[%354, %c0_139] : memref<128x128xbf16, #tpu.memory_space<vmem>>, vector<16x128xbf16>
    tpu.vector_store %arg15[%354, %c0_139], %351 {strides = array<i32>} : memref<128x128xbf16, #tpu.memory_space<vmem>>, vector<16x128xbf16>,
    %c4_i32 = arith.constant 4 : i32
    %c16_i32_140 = arith.constant 16 : i32
    %356 = arith.muli %c4_i32, %c16_i32_140 : i32
    %357 = tpu.assume_multiple %356, 16 : i32
    %c7_i32_141 = arith.constant 7 : i32
    %358 = arith.subi %c7_i32_141, %c4_i32 : i32
    %c16_i32_142 = arith.constant 16 : i32
    %359 = arith.muli %358, %c16_i32_142 : i32
    %360 = tpu.assume_multiple %359, 16 : i32
    %361 = arith.index_cast %357 : i32 to index
    %c0_143 = arith.constant 0 : index
    %362 = vector.load %arg12[%361, %c0_143] : memref<128x512xf32, #tpu.memory_space<vmem>>, vector<16x512xf32>
    %c0_144 = arith.constant 0 : index
    %c0_145 = arith.constant 0 : index
    %363 = vector.load %arg3[%c0_144, %c0_145] : memref<128x512xbf16, #tpu.memory_space<vmem>>, vector<128x512xbf16>
    %cst_146 = arith.constant dense<0.000000e+00> : vector<16x512xf32>
    %364 = tpu.matmul %350, %363, %cst_146 {dimension_numbers = #tpu.dot_dimension_numbers<[1], [0], [0], [1], [0, 0, 1, 1], [], []>} : vector<16x128xbf16>, vector<128x512xbf16>, vector<16x512xf32> -> vector<16x512xf32>
    %365 = arith.addf %362, %364 : vector<16x512xf32>
    %366 = arith.index_cast %360 : i32 to index
    %c0_147 = arith.constant 0 : index
    %367 = vector.load %arg13[%366, %c0_147] : memref<128x512xf32, #tpu.memory_space<vmem>>, vector<16x512xf32>
    %c0_148 = arith.constant 0 : index
    %c0_149 = arith.constant 0 : index
    %368 = vector.load %arg6[%c0_148, %c0_149] : memref<128x512xbf16, #tpu.memory_space<vmem>>, vector<128x512xbf16>
    %cst_150 = arith.constant dense<0.000000e+00> : vector<16x512xf32>
    %369 = tpu.matmul %351, %368, %cst_150 {dimension_numbers = #tpu.dot_dimension_numbers<[1], [0], [0], [1], [0, 0, 1, 1], [], []>} : vector<16x128xbf16>, vector<128x512xbf16>, vector<16x512xf32> -> vector<16x512xf32>
    %370 = arith.addf %367, %369 : vector<16x512xf32>
    %371 = vector.extract_strided_slice %365 {offsets = [0, 0], sizes = [16, 128], strides = [1, 1]} : vector<16x512xf32> to vector<16x128xf32>
    %cst_151 = arith.constant 5.000000e-01 : f32
    %372 = vector.broadcast %cst_151 : f32 to vector<16x128xf32>
    %373 = arith.mulf %372, %371 : vector<16x128xf32>
    %374 = math.tanh %373 : vector<16x128xf32>
    %cst_152 = arith.constant 5.000000e-01 : f32
    %375 = vector.broadcast %cst_152 : f32 to vector<16x128xf32>
    %376 = arith.mulf %375, %374 : vector<16x128xf32>
    %cst_153 = arith.constant 5.000000e-01 : f32
    %377 = vector.broadcast %cst_153 : f32 to vector<16x128xf32>
    %378 = arith.addf %376, %377 : vector<16x128xf32>
    %379 = vector.extract_strided_slice %365 {offsets = [0, 128], sizes = [16, 128], strides = [1, 1]} : vector<16x512xf32> to vector<16x128xf32>
    %cst_154 = arith.constant 5.000000e-01 : f32
    %380 = vector.broadcast %cst_154 : f32 to vector<16x128xf32>
    %381 = arith.mulf %380, %379 : vector<16x128xf32>
    %382 = math.tanh %381 : vector<16x128xf32>
    %cst_155 = arith.constant 5.000000e-01 : f32
    %383 = vector.broadcast %cst_155 : f32 to vector<16x128xf32>
    %384 = arith.mulf %383, %382 : vector<16x128xf32>
    %cst_156 = arith.constant 5.000000e-01 : f32
    %385 = vector.broadcast %cst_156 : f32 to vector<16x128xf32>
    %386 = arith.addf %384, %385 : vector<16x128xf32>
    %387 = vector.extract_strided_slice %365 {offsets = [0, 256], sizes = [16, 128], strides = [1, 1]} : vector<16x512xf32> to vector<16x128xf32>
    %388 = math.tanh %387 : vector<16x128xf32>
    %389 = vector.extract_strided_slice %365 {offsets = [0, 384], sizes = [16, 128], strides = [1, 1]} : vector<16x512xf32> to vector<16x128xf32>
    %cst_157 = arith.constant 5.000000e-01 : f32
    %390 = vector.broadcast %cst_157 : f32 to vector<16x128xf32>
    %391 = arith.mulf %390, %389 : vector<16x128xf32>
    %392 = math.tanh %391 : vector<16x128xf32>
    %cst_158 = arith.constant 5.000000e-01 : f32
    %393 = vector.broadcast %cst_158 : f32 to vector<16x128xf32>
    %394 = arith.mulf %393, %392 : vector<16x128xf32>
    %cst_159 = arith.constant 5.000000e-01 : f32
    %395 = vector.broadcast %cst_159 : f32 to vector<16x128xf32>
    %396 = arith.addf %394, %395 : vector<16x128xf32>
    %397 = arith.mulf %386, %316 : vector<16x128xf32>
    %398 = arith.mulf %378, %388 : vector<16x128xf32>
    %399 = arith.addf %397, %398 : vector<16x128xf32>
    %400 = math.tanh %399 : vector<16x128xf32>
    %401 = arith.mulf %396, %400 : vector<16x128xf32>
    %402 = vector.extract_strided_slice %370 {offsets = [0, 0], sizes = [16, 128], strides = [1, 1]} : vector<16x512xf32> to vector<16x128xf32>
    %cst_160 = arith.constant 5.000000e-01 : f32
    %403 = vector.broadcast %cst_160 : f32 to vector<16x128xf32>
    %404 = arith.mulf %403, %402 : vector<16x128xf32>
    %405 = math.tanh %404 : vector<16x128xf32>
    %cst_161 = arith.constant 5.000000e-01 : f32
    %406 = vector.broadcast %cst_161 : f32 to vector<16x128xf32>
    %407 = arith.mulf %406, %405 : vector<16x128xf32>
    %cst_162 = arith.constant 5.000000e-01 : f32
    %408 = vector.broadcast %cst_162 : f32 to vector<16x128xf32>
    %409 = arith.addf %407, %408 : vector<16x128xf32>
    %410 = vector.extract_strided_slice %370 {offsets = [0, 128], sizes = [16, 128], strides = [1, 1]} : vector<16x512xf32> to vector<16x128xf32>
    %cst_163 = arith.constant 5.000000e-01 : f32
    %411 = vector.broadcast %cst_163 : f32 to vector<16x128xf32>
    %412 = arith.mulf %411, %410 : vector<16x128xf32>
    %413 = math.tanh %412 : vector<16x128xf32>
    %cst_164 = arith.constant 5.000000e-01 : f32
    %414 = vector.broadcast %cst_164 : f32 to vector<16x128xf32>
    %415 = arith.mulf %414, %413 : vector<16x128xf32>
    %cst_165 = arith.constant 5.000000e-01 : f32
    %416 = vector.broadcast %cst_165 : f32 to vector<16x128xf32>
    %417 = arith.addf %415, %416 : vector<16x128xf32>
    %418 = vector.extract_strided_slice %370 {offsets = [0, 256], sizes = [16, 128], strides = [1, 1]} : vector<16x512xf32> to vector<16x128xf32>
    %419 = math.tanh %418 : vector<16x128xf32>
    %420 = vector.extract_strided_slice %370 {offsets = [0, 384], sizes = [16, 128], strides = [1, 1]} : vector<16x512xf32> to vector<16x128xf32>
    %cst_166 = arith.constant 5.000000e-01 : f32
    %421 = vector.broadcast %cst_166 : f32 to vector<16x128xf32>
    %422 = arith.mulf %421, %420 : vector<16x128xf32>
    %423 = math.tanh %422 : vector<16x128xf32>
    %cst_167 = arith.constant 5.000000e-01 : f32
    %424 = vector.broadcast %cst_167 : f32 to vector<16x128xf32>
    %425 = arith.mulf %424, %423 : vector<16x128xf32>
    %cst_168 = arith.constant 5.000000e-01 : f32
    %426 = vector.broadcast %cst_168 : f32 to vector<16x128xf32>
    %427 = arith.addf %425, %426 : vector<16x128xf32>
    %428 = arith.mulf %417, %347 : vector<16x128xf32>
    %429 = arith.mulf %409, %419 : vector<16x128xf32>
    %430 = arith.addf %428, %429 : vector<16x128xf32>
    %431 = math.tanh %430 : vector<16x128xf32>
    %432 = arith.mulf %427, %431 : vector<16x128xf32>
    %433 = arith.truncf %401 : vector<16x128xf32> to vector<16x128xbf16>
    %434 = arith.truncf %432 : vector<16x128xf32> to vector<16x128xbf16>
    %435 = arith.index_cast %357 : i32 to index
    %c0_169 = arith.constant 0 : index
    %436 = vector.load %arg14[%435, %c0_169] : memref<128x128xbf16, #tpu.memory_space<vmem>>, vector<16x128xbf16>
    tpu.vector_store %arg14[%435, %c0_169], %433 {strides = array<i32>} : memref<128x128xbf16, #tpu.memory_space<vmem>>, vector<16x128xbf16>,
    %437 = arith.index_cast %360 : i32 to index
    %c0_170 = arith.constant 0 : index
    %438 = vector.load %arg15[%437, %c0_170] : memref<128x128xbf16, #tpu.memory_space<vmem>>, vector<16x128xbf16>
    tpu.vector_store %arg15[%437, %c0_170], %434 {strides = array<i32>} : memref<128x128xbf16, #tpu.memory_space<vmem>>, vector<16x128xbf16>,
    %c5_i32 = arith.constant 5 : i32
    %c16_i32_171 = arith.constant 16 : i32
    %439 = arith.muli %c5_i32, %c16_i32_171 : i32
    %440 = tpu.assume_multiple %439, 16 : i32
    %c7_i32_172 = arith.constant 7 : i32
    %441 = arith.subi %c7_i32_172, %c5_i32 : i32
    %c16_i32_173 = arith.constant 16 : i32
    %442 = arith.muli %441, %c16_i32_173 : i32
    %443 = tpu.assume_multiple %442, 16 : i32
    %444 = arith.index_cast %440 : i32 to index
    %c0_174 = arith.constant 0 : index
    %445 = vector.load %arg12[%444, %c0_174] : memref<128x512xf32, #tpu.memory_space<vmem>>, vector<16x512xf32>
    %c0_175 = arith.constant 0 : index
    %c0_176 = arith.constant 0 : index
    %446 = vector.load %arg3[%c0_175, %c0_176] : memref<128x512xbf16, #tpu.memory_space<vmem>>, vector<128x512xbf16>
    %cst_177 = arith.constant dense<0.000000e+00> : vector<16x512xf32>
    %447 = tpu.matmul %433, %446, %cst_177 {dimension_numbers = #tpu.dot_dimension_numbers<[1], [0], [0], [1], [0, 0, 1, 1], [], []>} : vector<16x128xbf16>, vector<128x512xbf16>, vector<16x512xf32> -> vector<16x512xf32>
    %448 = arith.addf %445, %447 : vector<16x512xf32>
    %449 = arith.index_cast %443 : i32 to index
    %c0_178 = arith.constant 0 : index
    %450 = vector.load %arg13[%449, %c0_178] : memref<128x512xf32, #tpu.memory_space<vmem>>, vector<16x512xf32>
    %c0_179 = arith.constant 0 : index
    %c0_180 = arith.constant 0 : index
    %451 = vector.load %arg6[%c0_179, %c0_180] : memref<128x512xbf16, #tpu.memory_space<vmem>>, vector<128x512xbf16>
    %cst_181 = arith.constant dense<0.000000e+00> : vector<16x512xf32>
    %452 = tpu.matmul %434, %451, %cst_181 {dimension_numbers = #tpu.dot_dimension_numbers<[1], [0], [0], [1], [0, 0, 1, 1], [], []>} : vector<16x128xbf16>, vector<128x512xbf16>, vector<16x512xf32> -> vector<16x512xf32>
    %453 = arith.addf %450, %452 : vector<16x512xf32>
    %454 = vector.extract_strided_slice %448 {offsets = [0, 0], sizes = [16, 128], strides = [1, 1]} : vector<16x512xf32> to vector<16x128xf32>
    %cst_182 = arith.constant 5.000000e-01 : f32
    %455 = vector.broadcast %cst_182 : f32 to vector<16x128xf32>
    %456 = arith.mulf %455, %454 : vector<16x128xf32>
    %457 = math.tanh %456 : vector<16x128xf32>
    %cst_183 = arith.constant 5.000000e-01 : f32
    %458 = vector.broadcast %cst_183 : f32 to vector<16x128xf32>
    %459 = arith.mulf %458, %457 : vector<16x128xf32>
    %cst_184 = arith.constant 5.000000e-01 : f32
    %460 = vector.broadcast %cst_184 : f32 to vector<16x128xf32>
    %461 = arith.addf %459, %460 : vector<16x128xf32>
    %462 = vector.extract_strided_slice %448 {offsets = [0, 128], sizes = [16, 128], strides = [1, 1]} : vector<16x512xf32> to vector<16x128xf32>
    %cst_185 = arith.constant 5.000000e-01 : f32
    %463 = vector.broadcast %cst_185 : f32 to vector<16x128xf32>
    %464 = arith.mulf %463, %462 : vector<16x128xf32>
    %465 = math.tanh %464 : vector<16x128xf32>
    %cst_186 = arith.constant 5.000000e-01 : f32
    %466 = vector.broadcast %cst_186 : f32 to vector<16x128xf32>
    %467 = arith.mulf %466, %465 : vector<16x128xf32>
    %cst_187 = arith.constant 5.000000e-01 : f32
    %468 = vector.broadcast %cst_187 : f32 to vector<16x128xf32>
    %469 = arith.addf %467, %468 : vector<16x128xf32>
    %470 = vector.extract_strided_slice %448 {offsets = [0, 256], sizes = [16, 128], strides = [1, 1]} : vector<16x512xf32> to vector<16x128xf32>
    %471 = math.tanh %470 : vector<16x128xf32>
    %472 = vector.extract_strided_slice %448 {offsets = [0, 384], sizes = [16, 128], strides = [1, 1]} : vector<16x512xf32> to vector<16x128xf32>
    %cst_188 = arith.constant 5.000000e-01 : f32
    %473 = vector.broadcast %cst_188 : f32 to vector<16x128xf32>
    %474 = arith.mulf %473, %472 : vector<16x128xf32>
    %475 = math.tanh %474 : vector<16x128xf32>
    %cst_189 = arith.constant 5.000000e-01 : f32
    %476 = vector.broadcast %cst_189 : f32 to vector<16x128xf32>
    %477 = arith.mulf %476, %475 : vector<16x128xf32>
    %cst_190 = arith.constant 5.000000e-01 : f32
    %478 = vector.broadcast %cst_190 : f32 to vector<16x128xf32>
    %479 = arith.addf %477, %478 : vector<16x128xf32>
    %480 = arith.mulf %469, %399 : vector<16x128xf32>
    %481 = arith.mulf %461, %471 : vector<16x128xf32>
    %482 = arith.addf %480, %481 : vector<16x128xf32>
    %483 = math.tanh %482 : vector<16x128xf32>
    %484 = arith.mulf %479, %483 : vector<16x128xf32>
    %485 = vector.extract_strided_slice %453 {offsets = [0, 0], sizes = [16, 128], strides = [1, 1]} : vector<16x512xf32> to vector<16x128xf32>
    %cst_191 = arith.constant 5.000000e-01 : f32
    %486 = vector.broadcast %cst_191 : f32 to vector<16x128xf32>
    %487 = arith.mulf %486, %485 : vector<16x128xf32>
    %488 = math.tanh %487 : vector<16x128xf32>
    %cst_192 = arith.constant 5.000000e-01 : f32
    %489 = vector.broadcast %cst_192 : f32 to vector<16x128xf32>
    %490 = arith.mulf %489, %488 : vector<16x128xf32>
    %cst_193 = arith.constant 5.000000e-01 : f32
    %491 = vector.broadcast %cst_193 : f32 to vector<16x128xf32>
    %492 = arith.addf %490, %491 : vector<16x128xf32>
    %493 = vector.extract_strided_slice %453 {offsets = [0, 128], sizes = [16, 128], strides = [1, 1]} : vector<16x512xf32> to vector<16x128xf32>
    %cst_194 = arith.constant 5.000000e-01 : f32
    %494 = vector.broadcast %cst_194 : f32 to vector<16x128xf32>
    %495 = arith.mulf %494, %493 : vector<16x128xf32>
    %496 = math.tanh %495 : vector<16x128xf32>
    %cst_195 = arith.constant 5.000000e-01 : f32
    %497 = vector.broadcast %cst_195 : f32 to vector<16x128xf32>
    %498 = arith.mulf %497, %496 : vector<16x128xf32>
    %cst_196 = arith.constant 5.000000e-01 : f32
    %499 = vector.broadcast %cst_196 : f32 to vector<16x128xf32>
    %500 = arith.addf %498, %499 : vector<16x128xf32>
    %501 = vector.extract_strided_slice %453 {offsets = [0, 256], sizes = [16, 128], strides = [1, 1]} : vector<16x512xf32> to vector<16x128xf32>
    %502 = math.tanh %501 : vector<16x128xf32>
    %503 = vector.extract_strided_slice %453 {offsets = [0, 384], sizes = [16, 128], strides = [1, 1]} : vector<16x512xf32> to vector<16x128xf32>
    %cst_197 = arith.constant 5.000000e-01 : f32
    %504 = vector.broadcast %cst_197 : f32 to vector<16x128xf32>
    %505 = arith.mulf %504, %503 : vector<16x128xf32>
    %506 = math.tanh %505 : vector<16x128xf32>
    %cst_198 = arith.constant 5.000000e-01 : f32
    %507 = vector.broadcast %cst_198 : f32 to vector<16x128xf32>
    %508 = arith.mulf %507, %506 : vector<16x128xf32>
    %cst_199 = arith.constant 5.000000e-01 : f32
    %509 = vector.broadcast %cst_199 : f32 to vector<16x128xf32>
    %510 = arith.addf %508, %509 : vector<16x128xf32>
    %511 = arith.mulf %500, %430 : vector<16x128xf32>
    %512 = arith.mulf %492, %502 : vector<16x128xf32>
    %513 = arith.addf %511, %512 : vector<16x128xf32>
    %514 = math.tanh %513 : vector<16x128xf32>
    %515 = arith.mulf %510, %514 : vector<16x128xf32>
    %516 = arith.truncf %484 : vector<16x128xf32> to vector<16x128xbf16>
    %517 = arith.truncf %515 : vector<16x128xf32> to vector<16x128xbf16>
    %518 = arith.index_cast %440 : i32 to index
    %c0_200 = arith.constant 0 : index
    %519 = vector.load %arg14[%518, %c0_200] : memref<128x128xbf16, #tpu.memory_space<vmem>>, vector<16x128xbf16>
    tpu.vector_store %arg14[%518, %c0_200], %516 {strides = array<i32>} : memref<128x128xbf16, #tpu.memory_space<vmem>>, vector<16x128xbf16>,
    %520 = arith.index_cast %443 : i32 to index
    %c0_201 = arith.constant 0 : index
    %521 = vector.load %arg15[%520, %c0_201] : memref<128x128xbf16, #tpu.memory_space<vmem>>, vector<16x128xbf16>
    tpu.vector_store %arg15[%520, %c0_201], %517 {strides = array<i32>} : memref<128x128xbf16, #tpu.memory_space<vmem>>, vector<16x128xbf16>,
    %c6_i32 = arith.constant 6 : i32
    %c16_i32_202 = arith.constant 16 : i32
    %522 = arith.muli %c6_i32, %c16_i32_202 : i32
    %523 = tpu.assume_multiple %522, 16 : i32
    %c7_i32_203 = arith.constant 7 : i32
    %524 = arith.subi %c7_i32_203, %c6_i32 : i32
    %c16_i32_204 = arith.constant 16 : i32
    %525 = arith.muli %524, %c16_i32_204 : i32
    %526 = tpu.assume_multiple %525, 16 : i32
    %527 = arith.index_cast %523 : i32 to index
    %c0_205 = arith.constant 0 : index
    %528 = vector.load %arg12[%527, %c0_205] : memref<128x512xf32, #tpu.memory_space<vmem>>, vector<16x512xf32>
    %c0_206 = arith.constant 0 : index
    %c0_207 = arith.constant 0 : index
    %529 = vector.load %arg3[%c0_206, %c0_207] : memref<128x512xbf16, #tpu.memory_space<vmem>>, vector<128x512xbf16>
    %cst_208 = arith.constant dense<0.000000e+00> : vector<16x512xf32>
    %530 = tpu.matmul %516, %529, %cst_208 {dimension_numbers = #tpu.dot_dimension_numbers<[1], [0], [0], [1], [0, 0, 1, 1], [], []>} : vector<16x128xbf16>, vector<128x512xbf16>, vector<16x512xf32> -> vector<16x512xf32>
    %531 = arith.addf %528, %530 : vector<16x512xf32>
    %532 = arith.index_cast %526 : i32 to index
    %c0_209 = arith.constant 0 : index
    %533 = vector.load %arg13[%532, %c0_209] : memref<128x512xf32, #tpu.memory_space<vmem>>, vector<16x512xf32>
    %c0_210 = arith.constant 0 : index
    %c0_211 = arith.constant 0 : index
    %534 = vector.load %arg6[%c0_210, %c0_211] : memref<128x512xbf16, #tpu.memory_space<vmem>>, vector<128x512xbf16>
    %cst_212 = arith.constant dense<0.000000e+00> : vector<16x512xf32>
    %535 = tpu.matmul %517, %534, %cst_212 {dimension_numbers = #tpu.dot_dimension_numbers<[1], [0], [0], [1], [0, 0, 1, 1], [], []>} : vector<16x128xbf16>, vector<128x512xbf16>, vector<16x512xf32> -> vector<16x512xf32>
    %536 = arith.addf %533, %535 : vector<16x512xf32>
    %537 = vector.extract_strided_slice %531 {offsets = [0, 0], sizes = [16, 128], strides = [1, 1]} : vector<16x512xf32> to vector<16x128xf32>
    %cst_213 = arith.constant 5.000000e-01 : f32
    %538 = vector.broadcast %cst_213 : f32 to vector<16x128xf32>
    %539 = arith.mulf %538, %537 : vector<16x128xf32>
    %540 = math.tanh %539 : vector<16x128xf32>
    %cst_214 = arith.constant 5.000000e-01 : f32
    %541 = vector.broadcast %cst_214 : f32 to vector<16x128xf32>
    %542 = arith.mulf %541, %540 : vector<16x128xf32>
    %cst_215 = arith.constant 5.000000e-01 : f32
    %543 = vector.broadcast %cst_215 : f32 to vector<16x128xf32>
    %544 = arith.addf %542, %543 : vector<16x128xf32>
    %545 = vector.extract_strided_slice %531 {offsets = [0, 128], sizes = [16, 128], strides = [1, 1]} : vector<16x512xf32> to vector<16x128xf32>
    %cst_216 = arith.constant 5.000000e-01 : f32
    %546 = vector.broadcast %cst_216 : f32 to vector<16x128xf32>
    %547 = arith.mulf %546, %545 : vector<16x128xf32>
    %548 = math.tanh %547 : vector<16x128xf32>
    %cst_217 = arith.constant 5.000000e-01 : f32
    %549 = vector.broadcast %cst_217 : f32 to vector<16x128xf32>
    %550 = arith.mulf %549, %548 : vector<16x128xf32>
    %cst_218 = arith.constant 5.000000e-01 : f32
    %551 = vector.broadcast %cst_218 : f32 to vector<16x128xf32>
    %552 = arith.addf %550, %551 : vector<16x128xf32>
    %553 = vector.extract_strided_slice %531 {offsets = [0, 256], sizes = [16, 128], strides = [1, 1]} : vector<16x512xf32> to vector<16x128xf32>
    %554 = math.tanh %553 : vector<16x128xf32>
    %555 = vector.extract_strided_slice %531 {offsets = [0, 384], sizes = [16, 128], strides = [1, 1]} : vector<16x512xf32> to vector<16x128xf32>
    %cst_219 = arith.constant 5.000000e-01 : f32
    %556 = vector.broadcast %cst_219 : f32 to vector<16x128xf32>
    %557 = arith.mulf %556, %555 : vector<16x128xf32>
    %558 = math.tanh %557 : vector<16x128xf32>
    %cst_220 = arith.constant 5.000000e-01 : f32
    %559 = vector.broadcast %cst_220 : f32 to vector<16x128xf32>
    %560 = arith.mulf %559, %558 : vector<16x128xf32>
    %cst_221 = arith.constant 5.000000e-01 : f32
    %561 = vector.broadcast %cst_221 : f32 to vector<16x128xf32>
    %562 = arith.addf %560, %561 : vector<16x128xf32>
    %563 = arith.mulf %552, %482 : vector<16x128xf32>
    %564 = arith.mulf %544, %554 : vector<16x128xf32>
    %565 = arith.addf %563, %564 : vector<16x128xf32>
    %566 = math.tanh %565 : vector<16x128xf32>
    %567 = arith.mulf %562, %566 : vector<16x128xf32>
    %568 = vector.extract_strided_slice %536 {offsets = [0, 0], sizes = [16, 128], strides = [1, 1]} : vector<16x512xf32> to vector<16x128xf32>
    %cst_222 = arith.constant 5.000000e-01 : f32
    %569 = vector.broadcast %cst_222 : f32 to vector<16x128xf32>
    %570 = arith.mulf %569, %568 : vector<16x128xf32>
    %571 = math.tanh %570 : vector<16x128xf32>
    %cst_223 = arith.constant 5.000000e-01 : f32
    %572 = vector.broadcast %cst_223 : f32 to vector<16x128xf32>
    %573 = arith.mulf %572, %571 : vector<16x128xf32>
    %cst_224 = arith.constant 5.000000e-01 : f32
    %574 = vector.broadcast %cst_224 : f32 to vector<16x128xf32>
    %575 = arith.addf %573, %574 : vector<16x128xf32>
    %576 = vector.extract_strided_slice %536 {offsets = [0, 128], sizes = [16, 128], strides = [1, 1]} : vector<16x512xf32> to vector<16x128xf32>
    %cst_225 = arith.constant 5.000000e-01 : f32
    %577 = vector.broadcast %cst_225 : f32 to vector<16x128xf32>
    %578 = arith.mulf %577, %576 : vector<16x128xf32>
    %579 = math.tanh %578 : vector<16x128xf32>
    %cst_226 = arith.constant 5.000000e-01 : f32
    %580 = vector.broadcast %cst_226 : f32 to vector<16x128xf32>
    %581 = arith.mulf %580, %579 : vector<16x128xf32>
    %cst_227 = arith.constant 5.000000e-01 : f32
    %582 = vector.broadcast %cst_227 : f32 to vector<16x128xf32>
    %583 = arith.addf %581, %582 : vector<16x128xf32>
    %584 = vector.extract_strided_slice %536 {offsets = [0, 256], sizes = [16, 128], strides = [1, 1]} : vector<16x512xf32> to vector<16x128xf32>
    %585 = math.tanh %584 : vector<16x128xf32>
    %586 = vector.extract_strided_slice %536 {offsets = [0, 384], sizes = [16, 128], strides = [1, 1]} : vector<16x512xf32> to vector<16x128xf32>
    %cst_228 = arith.constant 5.000000e-01 : f32
    %587 = vector.broadcast %cst_228 : f32 to vector<16x128xf32>
    %588 = arith.mulf %587, %586 : vector<16x128xf32>
    %589 = math.tanh %588 : vector<16x128xf32>
    %cst_229 = arith.constant 5.000000e-01 : f32
    %590 = vector.broadcast %cst_229 : f32 to vector<16x128xf32>
    %591 = arith.mulf %590, %589 : vector<16x128xf32>
    %cst_230 = arith.constant 5.000000e-01 : f32
    %592 = vector.broadcast %cst_230 : f32 to vector<16x128xf32>
    %593 = arith.addf %591, %592 : vector<16x128xf32>
    %594 = arith.mulf %583, %513 : vector<16x128xf32>
    %595 = arith.mulf %575, %585 : vector<16x128xf32>
    %596 = arith.addf %594, %595 : vector<16x128xf32>
    %597 = math.tanh %596 : vector<16x128xf32>
    %598 = arith.mulf %593, %597 : vector<16x128xf32>
    %599 = arith.truncf %567 : vector<16x128xf32> to vector<16x128xbf16>
    %600 = arith.truncf %598 : vector<16x128xf32> to vector<16x128xbf16>
    %601 = arith.index_cast %523 : i32 to index
    %c0_231 = arith.constant 0 : index
    %602 = vector.load %arg14[%601, %c0_231] : memref<128x128xbf16, #tpu.memory_space<vmem>>, vector<16x128xbf16>
    tpu.vector_store %arg14[%601, %c0_231], %599 {strides = array<i32>} : memref<128x128xbf16, #tpu.memory_space<vmem>>, vector<16x128xbf16>,
    %603 = arith.index_cast %526 : i32 to index
    %c0_232 = arith.constant 0 : index
    %604 = vector.load %arg15[%603, %c0_232] : memref<128x128xbf16, #tpu.memory_space<vmem>>, vector<16x128xbf16>
    tpu.vector_store %arg15[%603, %c0_232], %600 {strides = array<i32>} : memref<128x128xbf16, #tpu.memory_space<vmem>>, vector<16x128xbf16>,
    %c7_i32_233 = arith.constant 7 : i32
    %c16_i32_234 = arith.constant 16 : i32
    %605 = arith.muli %c7_i32_233, %c16_i32_234 : i32
    %606 = tpu.assume_multiple %605, 16 : i32
    %c7_i32_235 = arith.constant 7 : i32
    %607 = arith.subi %c7_i32_235, %c7_i32_233 : i32
    %c16_i32_236 = arith.constant 16 : i32
    %608 = arith.muli %607, %c16_i32_236 : i32
    %609 = tpu.assume_multiple %608, 16 : i32
    %610 = arith.index_cast %606 : i32 to index
    %c0_237 = arith.constant 0 : index
    %611 = vector.load %arg12[%610, %c0_237] : memref<128x512xf32, #tpu.memory_space<vmem>>, vector<16x512xf32>
    %c0_238 = arith.constant 0 : index
    %c0_239 = arith.constant 0 : index
    %612 = vector.load %arg3[%c0_238, %c0_239] : memref<128x512xbf16, #tpu.memory_space<vmem>>, vector<128x512xbf16>
    %cst_240 = arith.constant dense<0.000000e+00> : vector<16x512xf32>
    %613 = tpu.matmul %599, %612, %cst_240 {dimension_numbers = #tpu.dot_dimension_numbers<[1], [0], [0], [1], [0, 0, 1, 1], [], []>} : vector<16x128xbf16>, vector<128x512xbf16>, vector<16x512xf32> -> vector<16x512xf32>
    %614 = arith.addf %611, %613 : vector<16x512xf32>
    %615 = arith.index_cast %609 : i32 to index
    %c0_241 = arith.constant 0 : index
    %616 = vector.load %arg13[%615, %c0_241] : memref<128x512xf32, #tpu.memory_space<vmem>>, vector<16x512xf32>
    %c0_242 = arith.constant 0 : index
    %c0_243 = arith.constant 0 : index
    %617 = vector.load %arg6[%c0_242, %c0_243] : memref<128x512xbf16, #tpu.memory_space<vmem>>, vector<128x512xbf16>
    %cst_244 = arith.constant dense<0.000000e+00> : vector<16x512xf32>
    %618 = tpu.matmul %600, %617, %cst_244 {dimension_numbers = #tpu.dot_dimension_numbers<[1], [0], [0], [1], [0, 0, 1, 1], [], []>} : vector<16x128xbf16>, vector<128x512xbf16>, vector<16x512xf32> -> vector<16x512xf32>
    %619 = arith.addf %616, %618 : vector<16x512xf32>
    %620 = vector.extract_strided_slice %614 {offsets = [0, 0], sizes = [16, 128], strides = [1, 1]} : vector<16x512xf32> to vector<16x128xf32>
    %cst_245 = arith.constant 5.000000e-01 : f32
    %621 = vector.broadcast %cst_245 : f32 to vector<16x128xf32>
    %622 = arith.mulf %621, %620 : vector<16x128xf32>
    %623 = math.tanh %622 : vector<16x128xf32>
    %cst_246 = arith.constant 5.000000e-01 : f32
    %624 = vector.broadcast %cst_246 : f32 to vector<16x128xf32>
    %625 = arith.mulf %624, %623 : vector<16x128xf32>
    %cst_247 = arith.constant 5.000000e-01 : f32
    %626 = vector.broadcast %cst_247 : f32 to vector<16x128xf32>
    %627 = arith.addf %625, %626 : vector<16x128xf32>
    %628 = vector.extract_strided_slice %614 {offsets = [0, 128], sizes = [16, 128], strides = [1, 1]} : vector<16x512xf32> to vector<16x128xf32>
    %cst_248 = arith.constant 5.000000e-01 : f32
    %629 = vector.broadcast %cst_248 : f32 to vector<16x128xf32>
    %630 = arith.mulf %629, %628 : vector<16x128xf32>
    %631 = math.tanh %630 : vector<16x128xf32>
    %cst_249 = arith.constant 5.000000e-01 : f32
    %632 = vector.broadcast %cst_249 : f32 to vector<16x128xf32>
    %633 = arith.mulf %632, %631 : vector<16x128xf32>
    %cst_250 = arith.constant 5.000000e-01 : f32
    %634 = vector.broadcast %cst_250 : f32 to vector<16x128xf32>
    %635 = arith.addf %633, %634 : vector<16x128xf32>
    %636 = vector.extract_strided_slice %614 {offsets = [0, 256], sizes = [16, 128], strides = [1, 1]} : vector<16x512xf32> to vector<16x128xf32>
    %637 = math.tanh %636 : vector<16x128xf32>
    %638 = vector.extract_strided_slice %614 {offsets = [0, 384], sizes = [16, 128], strides = [1, 1]} : vector<16x512xf32> to vector<16x128xf32>
    %cst_251 = arith.constant 5.000000e-01 : f32
    %639 = vector.broadcast %cst_251 : f32 to vector<16x128xf32>
    %640 = arith.mulf %639, %638 : vector<16x128xf32>
    %641 = math.tanh %640 : vector<16x128xf32>
    %cst_252 = arith.constant 5.000000e-01 : f32
    %642 = vector.broadcast %cst_252 : f32 to vector<16x128xf32>
    %643 = arith.mulf %642, %641 : vector<16x128xf32>
    %cst_253 = arith.constant 5.000000e-01 : f32
    %644 = vector.broadcast %cst_253 : f32 to vector<16x128xf32>
    %645 = arith.addf %643, %644 : vector<16x128xf32>
    %646 = arith.mulf %635, %565 : vector<16x128xf32>
    %647 = arith.mulf %627, %637 : vector<16x128xf32>
    %648 = arith.addf %646, %647 : vector<16x128xf32>
    %649 = math.tanh %648 : vector<16x128xf32>
    %650 = arith.mulf %645, %649 : vector<16x128xf32>
    %651 = vector.extract_strided_slice %619 {offsets = [0, 0], sizes = [16, 128], strides = [1, 1]} : vector<16x512xf32> to vector<16x128xf32>
    %cst_254 = arith.constant 5.000000e-01 : f32
    %652 = vector.broadcast %cst_254 : f32 to vector<16x128xf32>
    %653 = arith.mulf %652, %651 : vector<16x128xf32>
    %654 = math.tanh %653 : vector<16x128xf32>
    %cst_255 = arith.constant 5.000000e-01 : f32
    %655 = vector.broadcast %cst_255 : f32 to vector<16x128xf32>
    %656 = arith.mulf %655, %654 : vector<16x128xf32>
    %cst_256 = arith.constant 5.000000e-01 : f32
    %657 = vector.broadcast %cst_256 : f32 to vector<16x128xf32>
    %658 = arith.addf %656, %657 : vector<16x128xf32>
    %659 = vector.extract_strided_slice %619 {offsets = [0, 128], sizes = [16, 128], strides = [1, 1]} : vector<16x512xf32> to vector<16x128xf32>
    %cst_257 = arith.constant 5.000000e-01 : f32
    %660 = vector.broadcast %cst_257 : f32 to vector<16x128xf32>
    %661 = arith.mulf %660, %659 : vector<16x128xf32>
    %662 = math.tanh %661 : vector<16x128xf32>
    %cst_258 = arith.constant 5.000000e-01 : f32
    %663 = vector.broadcast %cst_258 : f32 to vector<16x128xf32>
    %664 = arith.mulf %663, %662 : vector<16x128xf32>
    %cst_259 = arith.constant 5.000000e-01 : f32
    %665 = vector.broadcast %cst_259 : f32 to vector<16x128xf32>
    %666 = arith.addf %664, %665 : vector<16x128xf32>
    %667 = vector.extract_strided_slice %619 {offsets = [0, 256], sizes = [16, 128], strides = [1, 1]} : vector<16x512xf32> to vector<16x128xf32>
    %668 = math.tanh %667 : vector<16x128xf32>
    %669 = vector.extract_strided_slice %619 {offsets = [0, 384], sizes = [16, 128], strides = [1, 1]} : vector<16x512xf32> to vector<16x128xf32>
    %cst_260 = arith.constant 5.000000e-01 : f32
    %670 = vector.broadcast %cst_260 : f32 to vector<16x128xf32>
    %671 = arith.mulf %670, %669 : vector<16x128xf32>
    %672 = math.tanh %671 : vector<16x128xf32>
    %cst_261 = arith.constant 5.000000e-01 : f32
    %673 = vector.broadcast %cst_261 : f32 to vector<16x128xf32>
    %674 = arith.mulf %673, %672 : vector<16x128xf32>
    %cst_262 = arith.constant 5.000000e-01 : f32
    %675 = vector.broadcast %cst_262 : f32 to vector<16x128xf32>
    %676 = arith.addf %674, %675 : vector<16x128xf32>
    %677 = arith.mulf %666, %596 : vector<16x128xf32>
    %678 = arith.mulf %658, %668 : vector<16x128xf32>
    %679 = arith.addf %677, %678 : vector<16x128xf32>
    %680 = math.tanh %679 : vector<16x128xf32>
    %681 = arith.mulf %676, %680 : vector<16x128xf32>
    %682 = arith.truncf %650 : vector<16x128xf32> to vector<16x128xbf16>
    %683 = arith.truncf %681 : vector<16x128xf32> to vector<16x128xbf16>
    %684 = arith.index_cast %606 : i32 to index
    %c0_263 = arith.constant 0 : index
    %685 = vector.load %arg14[%684, %c0_263] : memref<128x128xbf16, #tpu.memory_space<vmem>>, vector<16x128xbf16>
    tpu.vector_store %arg14[%684, %c0_263], %682 {strides = array<i32>} : memref<128x128xbf16, #tpu.memory_space<vmem>>, vector<16x128xbf16>,
    %686 = arith.index_cast %609 : i32 to index
    %c0_264 = arith.constant 0 : index
    %687 = vector.load %arg15[%686, %c0_264] : memref<128x128xbf16, #tpu.memory_space<vmem>>, vector<16x128xbf16>
    tpu.vector_store %arg15[%686, %c0_264], %683 {strides = array<i32>} : memref<128x128xbf16, #tpu.memory_space<vmem>>, vector<16x128xbf16>,
    %c8_i32_265 = arith.constant 8 : i32
    %c0_i32_266 = arith.constant 0 : i32
    %c1_i32_267 = arith.constant 1 : i32
    %688 = arith.muli %c0_i32_266, %c1_i32_267 : i32
    %c0_i32_268 = arith.constant 0 : i32
    %689 = arith.addi %c0_i32_268, %688 : i32
    %c8_i32_269 = arith.constant 8 : i32
    %690 = arith.muli %689, %c8_i32_269 : i32
    %c128_i32_270 = arith.constant 128 : i32
    %691 = arith.muli %689, %c128_i32_270 : i32
    %692 = tpu.assume_multiple %691, 16 : i32
    %693 = arith.index_cast %692 : i32 to index
    %c0_271 = arith.constant 0 : index
    %694 = vector.load %arg14[%693, %c0_271] : memref<128x128xbf16, #tpu.memory_space<vmem>>, vector<128x128xbf16>
    %c0_272 = arith.constant 0 : index
    %c0_273 = arith.constant 0 : index
    %695 = vector.load %arg8[%c0_272, %c0_273] : memref<128x128xbf16, #tpu.memory_space<vmem>>, vector<128x128xbf16>
    %cst_274 = arith.constant dense<0.000000e+00> : vector<128x128xf32>
    %696 = tpu.matmul %694, %695, %cst_274 {dimension_numbers = #tpu.dot_dimension_numbers<[1], [0], [0], [1], [0, 0, 1, 1], [], []>} : vector<128x128xbf16>, vector<128x128xbf16>, vector<128x128xf32> -> vector<128x128xf32>
    %697 = arith.index_cast %692 : i32 to index
    %c0_275 = arith.constant 0 : index
    %698 = vector.load %arg15[%697, %c0_275] : memref<128x128xbf16, #tpu.memory_space<vmem>>, vector<128x128xbf16>
    %c0_276 = arith.constant 0 : index
    %c0_277 = arith.constant 0 : index
    %699 = vector.load %arg9[%c0_276, %c0_277] : memref<128x128xbf16, #tpu.memory_space<vmem>>, vector<128x128xbf16>
    %cst_278 = arith.constant dense<0.000000e+00> : vector<128x128xf32>
    %700 = tpu.matmul %698, %699, %cst_278 {dimension_numbers = #tpu.dot_dimension_numbers<[1], [0], [0], [1], [0, 0, 1, 1], [], []>} : vector<128x128xbf16>, vector<128x128xbf16>, vector<128x128xf32> -> vector<128x128xf32>
    %701 = arith.addf %696, %700 : vector<128x128xf32>
    %c0_279 = arith.constant 0 : index
    %c0_280 = arith.constant 0 : index
    %702 = vector.load %arg10[%c0_279, %c0_280] : memref<1x128xf32, #tpu.memory_space<vmem>>, vector<1x128xf32>
    %703 = vector.broadcast %702 : vector<1x128xf32> to vector<128x128xf32>
    %704 = arith.addf %701, %703 : vector<128x128xf32>
    %cst_281 = arith.constant dense<0xFF800000> : vector<128xf32>
    %705 = vector.multi_reduction <maximumf>, %704, %cst_281 [1] : vector<128x128xf32> to vector<128xf32>
    %706 = vector.shape_cast %705 : vector<128xf32> to vector<128x1xf32>
    %707 = vector.broadcast %706 : vector<128x1xf32> to vector<128x128xf32>
    %708 = arith.subf %704, %707 : vector<128x128xf32>
    %709 = math.exp %708 : vector<128x128xf32>
    %cst_282 = arith.constant dense<0.000000e+00> : vector<128xf32>
    %710 = vector.multi_reduction <add>, %709, %cst_282 [1] : vector<128x128xf32> to vector<128xf32>
    %711 = vector.shape_cast %710 : vector<128xf32> to vector<128x1xf32>
    %712 = vector.broadcast %711 : vector<128x1xf32> to vector<128x128xf32>
    %713 = arith.divf %709, %712 : vector<128x128xf32>
    %714 = vector.shape_cast %713 : vector<128x128xf32> to vector<8x16x128xf32>
    %715 = arith.index_cast %690 : i32 to index
    %c0_283 = arith.constant 0 : index
    %c0_284 = arith.constant 0 : index
    %716 = vector.load %arg11[%715, %c0_283, %c0_284] : memref<8x16x128xf32, #tpu.memory_space<vmem>>, vector<8x16x128xf32>
    tpu.vector_store %arg11[%715, %c0_283, %c0_284], %714 {strides = array<i32>} : memref<8x16x128xf32, #tpu.memory_space<vmem>>, vector<8x16x128xf32>,
    %c1_i32_285 = arith.constant 1 : i32
    return
  }
  func.func @transform_0(%arg0: i32) -> (i32, i32, i32) {
    %c0_i32 = arith.constant 0 : i32
    %c0_i32_0 = arith.constant 0 : i32
    %c0_i32_1 = arith.constant 0 : i32
    return %c0_i32, %arg0, %c0_i32_0 : i32, i32, i32
  }
  func.func @transform_1(%arg0: i32) -> (i32, i32) {
    %c0_i32 = arith.constant 0 : i32
    %c0_i32_0 = arith.constant 0 : i32
    %c0_i32_1 = arith.constant 0 : i32
    return %c0_i32, %c0_i32_0 : i32, i32
  }
  func.func @transform_2(%arg0: i32) -> (i32, i32) {
    %c0_i32 = arith.constant 0 : i32
    %c0_i32_0 = arith.constant 0 : i32
    %c0_i32_1 = arith.constant 0 : i32
    return %c0_i32, %c0_i32_0 : i32, i32
  }
  func.func @transform_3(%arg0: i32) -> (i32, i32) {
    %c0_i32 = arith.constant 0 : i32
    %c0_i32_0 = arith.constant 0 : i32
    %c0_i32_1 = arith.constant 0 : i32
    return %c0_i32, %c0_i32_0 : i32, i32
  }
  func.func @transform_4(%arg0: i32) -> (i32, i32) {
    %c0_i32 = arith.constant 0 : i32
    %c0_i32_0 = arith.constant 0 : i32
    %c0_i32_1 = arith.constant 0 : i32
    return %c0_i32, %c0_i32_0 : i32, i32
  }
  func.func @transform_5(%arg0: i32) -> (i32, i32) {
    %c0_i32 = arith.constant 0 : i32
    %c0_i32_0 = arith.constant 0 : i32
    %c0_i32_1 = arith.constant 0 : i32
    return %c0_i32, %c0_i32_0 : i32, i32
  }
  func.func @transform_6(%arg0: i32) -> (i32, i32) {
    %c0_i32 = arith.constant 0 : i32
    %c0_i32_0 = arith.constant 0 : i32
    %c0_i32_1 = arith.constant 0 : i32
    return %c0_i32, %c0_i32_0 : i32, i32
  }
  func.func @transform_7(%arg0: i32) -> (i32, i32) {
    %c0_i32 = arith.constant 0 : i32
    %c0_i32_0 = arith.constant 0 : i32
    %c0_i32_1 = arith.constant 0 : i32
    return %c0_i32, %c0_i32_0 : i32, i32
  }
  func.func @transform_8(%arg0: i32) -> (i32, i32) {
    %c0_i32 = arith.constant 0 : i32
    %c0_i32_0 = arith.constant 0 : i32
    %c0_i32_1 = arith.constant 0 : i32
    return %c0_i32, %c0_i32_0 : i32, i32
  }
  func.func @transform_9(%arg0: i32) -> (i32, i32) {
    %c0_i32 = arith.constant 0 : i32
    %c0_i32_0 = arith.constant 0 : i32
    %c0_i32_1 = arith.constant 0 : i32
    return %c0_i32, %c0_i32_0 : i32, i32
  }
  func.func @transform_10(%arg0: i32) -> (i32, i32, i32) {
    %c0_i32 = arith.constant 0 : i32
    %c0_i32_0 = arith.constant 0 : i32
    %c0_i32_1 = arith.constant 0 : i32
    return %c0_i32, %arg0, %c0_i32_0 : i32, i32, i32
  }
}

</mosaic_0001>

<bundles_post_ra>
// kernel: lstm_crf_forward.1
= control target key start
LH: loop header
LB: loop body
LE: loop exit
PB: predicated region body
PF: predicated region fallthrough
CT: control target
= control target key end

     0   :  { %v11680_v1 = vmov 0   ;;  %vm162_vm0 = vcmask 261120   ;;  %s11669_s1 = inlined_call_operand.vmem [shape: bf16[32,512], index: 1, kind: input, shape index: {}]   ;;  %s11670_s0 = inlined_call_operand.vmem [shape: bf16[8,16,32], index: 0, kind: input, shape index: {}]   ;;  %s11671_s4 = inlined_call_operand.vmem [shape: bf16[32,512], index: 4, kind: input, shape index: {}]   ;;  %s11672_s2 = inlined_call_operand.vmem [shape: bf16[128,512], index: 2, kind: input, shape index: {}]   ;;  %s11673_s5 = inlined_call_operand.vmem [shape: bf16[128,512], index: 5, kind: input, shape index: {}]   ;;  %s11674_s3 = inlined_call_operand.vmem [shape: f32[1,512], index: 3, kind: input, shape index: {}]   ;;  %s11675_s6 = inlined_call_operand.vmem [shape: f32[1,512], index: 6, kind: input, shape index: {}]   ;;  %s11676_s7 = inlined_call_operand.vmem [shape: bf16[128,128], index: 7, kind: input, shape index: {}]   ;;  %s11677_s8 = inlined_call_operand.vmem [shape: bf16[128,128], index: 8, kind: input, shape index: {}]   ;;  %s11678_s9 = inlined_call_operand.vmem [shape: f32[1,128], index: 9, kind: input, shape index: {}]   ;;  %s11679_s10 = inlined_call_operand.vmem [shape: f32[8,16,128], index: 10, kind: output, shape index: {}]  }
   0x1   :  { %v7824_v0 = vld [vmem:[%s11669_s1 + $0x24] ss:$16 sps:$4 sm:$0xff]   ;;  %219 = vmatprep.mubr.bf16.mxu0 %v11680_v1  ;;  %332 = vmatprep.mubr.bf16.mxu1 %v11680_v1  ;;  %v7826_v2 = vld [vmem:[%s11669_s1 + $0x2c] ss:$16 sps:$4 sm:$0xff]   ;;  %v7828_v3 = vld [vmem:[%s11669_s1 + $0x20] ss:$16 sps:$4 sm:$0xff]  }
   0x2   :  { %199 = vmatprep.subr.bf16.mxu0 %v7824_v0  ;;  %v7829_v4 = vld [vmem:[%s11669_s1 + $0x28] ss:$16 sps:$4 sm:$0xff]   ;;  %312 = vmatprep.subr.bf16.mxu1 %v7826_v2  ;;  %v7830_v5 = vld [vmem:[%s11669_s1 + $0x4] ss:$16 sps:$4 sm:$0xff]   ;;  %v7832_v6 = vld [vmem:[%s11669_s1 + $0xc] ss:$16 sps:$4 sm:$0xff]  }
   0x3   :  { %200 = vmatpush1.bf16.msra.mxu0 %v7828_v3  ;;  %313 = vmatpush1.bf16.msra.mxu1 %v7829_v4  ;;  %v7834_v7 = vld [vmem:[%s11669_s1] ss:$16 sps:$4 sm:$0xff]   ;;  %v7835_v8 = vld [vmem:[%s11669_s1 + $0x8] ss:$16 sps:$4 sm:$0xff]   ;;  %v7839_v10 = vld [vmem:[%s11671_s4 + $0x24] ss:$16 sps:$4 sm:$0xff]  }
   0x4   :  { %201 = vmatprep.subr.bf16.mxu0 %v7830_v5  ;;  %314 = vmatprep.subr.bf16.mxu1 %v7832_v6  ;;  %v8837_v9 = vld [vmem:[%s11670_s0] sm:$0xff]   ;;  %v7843_v12 = vld [vmem:[%s11671_s4 + $0x2c] ss:$16 sps:$4 sm:$0xff]   ;;  %v7841_v13 = vld [vmem:[%s11671_s4 + $0x28] ss:$16 sps:$4 sm:$0xff]  }
   0x5   :  { %v7837_v11 = vld [vmem:[%s11671_s4 + $0x20] ss:$16 sps:$4 sm:$0xff]   ;;  %v7849_v15 = vld [vmem:[%s11671_s4 + $0x4] ss:$16 sps:$4 sm:$0xff]   ;;  %v8866_v16 = vld [vmem:[%s11670_s0 + $0x8] sm:$0xff]  }
   0x6   :  { %v7847_v14 = vld [vmem:[%s11671_s4] ss:$16 sps:$4 sm:$0xff]   ;;  %v7853_v17 = vld [vmem:[%s11671_s4 + $0xc] ss:$16 sps:$4 sm:$0xff]   ;;  %v7851_v18 = vld [vmem:[%s11671_s4 + $0x8] ss:$16 sps:$4 sm:$0xff]  }
   0x7   :  { %202 = vmatpush1.bf16.msra.mxu0 %v7834_v7  ;;  %315 = vmatpush1.bf16.msra.mxu1 %v7835_v8  ;;  %v7858_v19 = vld [vmem:[%s11672_s2 + $0xe4] ss:$16 sps:$4 sm:$0xff]   ;;  %v7864_v20 = vld [vmem:[%s11672_s2 + $0xec] ss:$16 sps:$4 sm:$0xff]   ;;  %v7856_v27 = vld [vmem:[%s11672_s2 + $0xe0] ss:$16 sps:$4 sm:$0xff]  }
   0x8   :  { %562 = vmatprep.subr.bf16.mxu0 %v7839_v10  ;;  %675 = vmatprep.subr.bf16.mxu1 %v7843_v12  ;;  %v8889_v21 = vld [vmem:[%s11670_s0 + $0x10] sm:$0xff]   ;;  %v8900_v22 = vld [vmem:[%s11670_s0 + $0x18] sm:$0xff]   ;;  %v8911_v23 = vld [vmem:[%s11670_s0 + $0x20] sm:$0xff]  }
   0x9   :  { %v8922_v24 = vld [vmem:[%s11670_s0 + $0x28] sm:$0xff]   ;;  %v8933_v25 = vld [vmem:[%s11670_s0 + $0x30] sm:$0xff]   ;;  %v8944_v26 = vld [vmem:[%s11670_s0 + $0x38] sm:$0xff]  }
   0xa   :  { %6998 = vmatmul.mubr.msk.bf16.vlgmr.msra.gmra.mxu0 %vm162_vm0, %v8837_v9  ;;  %7006 = vmatmul.mubr.msk.bf16.vlgmr.msra.gmra.mxu1 %vm162_vm0, %v8837_v9  ;;  %v7861_v28 = vld [vmem:[%s11672_s2 + $0xc4] ss:$16 sps:$4 sm:$0xff]   ;;  %v7862_v29 = vld [vmem:[%s11672_s2 + $0xe8] ss:$16 sps:$4 sm:$0xff]   ;;  %v7870_v30 = vld [vmem:[%s11672_s2 + $0xcc] ss:$16 sps:$4 sm:$0xff]  }
   0xb   :  { %563 = vmatpush1.bf16.msra.mxu0 %v7837_v11  ;;  %229 = vmatprep.mubr.bf16.mxu0 %v11680_v1  ;;  %v7859_v31 = vld [vmem:[%s11672_s2 + $0xc0] ss:$16 sps:$4 sm:$0xff]   ;;  %v7867_v32 = vld [vmem:[%s11672_s2 + $0xa4] ss:$16 sps:$4 sm:$0xff]   ;;  %v7868_v33 = vld [vmem:[%s11672_s2 + $0xc8] ss:$16 sps:$4 sm:$0xff]  }
   0xc   :  { %342 = vmatprep.mubr.bf16.mxu1 %v11680_v1  ;;  %676 = vmatpush1.bf16.msra.mxu1 %v7841_v13  ;;  %v7865_v34 = vld [vmem:[%s11672_s2 + $0xa0] ss:$16 sps:$4 sm:$0xff]   ;;  %v7876_v35 = vld [vmem:[%s11672_s2 + $0xac] ss:$16 sps:$4 sm:$0xff]   ;;  %v7873_v36 = vld [vmem:[%s11672_s2 + $0x84] ss:$16 sps:$4 sm:$0xff]  }
   0xd   :  { %564 = vmatprep.subr.bf16.mxu0 %v7849_v15  ;;  %677 = vmatprep.subr.bf16.mxu1 %v7853_v17  ;;  %v7874_v37 = vld [vmem:[%s11672_s2 + $0xa8] ss:$16 sps:$4 sm:$0xff]   ;;  %v7882_v38 = vld [vmem:[%s11672_s2 + $0x8c] ss:$16 sps:$4 sm:$0xff]   ;;  %v7871_v39 = vld [vmem:[%s11672_s2 + $0x80] ss:$16 sps:$4 sm:$0xff]  }
   0xe   :  { %v7879_v40 = vld [vmem:[%s11672_s2 + $0x64] ss:$16 sps:$4 sm:$0xff]   ;;  %v7880_v41 = vld [vmem:[%s11672_s2 + $0x88] ss:$16 sps:$4 sm:$0xff]   ;;  %v7877_v42 = vld [vmem:[%s11672_s2 + $0x60] ss:$16 sps:$4 sm:$0xff]  }
   0xf   :  { %565 = vmatpush1.bf16.msra.mxu0 %v7847_v14  ;;  %v7888_v43 = vld [vmem:[%s11672_s2 + $0x6c] ss:$16 sps:$4 sm:$0xff]   ;;  %v7885_v44 = vld [vmem:[%s11672_s2 + $0x44] ss:$16 sps:$4 sm:$0xff]   ;;  %v7886_v45 = vld [vmem:[%s11672_s2 + $0x68] ss:$16 sps:$4 sm:$0xff]  }
  0x10   :  { %678 = vmatpush1.bf16.msra.mxu1 %v7851_v18  ;;  %1042 = vmatprep.subr.bf16.mxu0 %v7858_v19  ;;  %v7894_v46 = vld [vmem:[%s11672_s2 + $0x4c] ss:$16 sps:$4 sm:$0xff]   ;;  %v7883_v47 = vld [vmem:[%s11672_s2 + $0x40] ss:$16 sps:$4 sm:$0xff]   ;;  %v7891_v48 = vld [vmem:[%s11672_s2 + $0x24] ss:$16 sps:$4 sm:$0xff]  }
  0x11   :  { %1085 = vmatprep.subr.bf16.mxu1 %v7864_v20  ;;  %v7892_v49 = vld [vmem:[%s11672_s2 + $0x48] ss:$16 sps:$4 sm:$0xff]   ;;  %v7889_v50 = vld [vmem:[%s11672_s2 + $0x20] ss:$16 sps:$4 sm:$0xff]   ;;  %v7897_v51 = vld [vmem:[%s11672_s2 + $0x2c] ss:$16 sps:$4 sm:$0xff]  }
  0x12   :  { %6999 = vmatmul.mubr.msk.bf16.gmra.mxu0 %vm162_vm0, %v8866_v16  ;;  %7007 = vmatmul.mubr.msk.bf16.gmra.mxu1 %vm162_vm0, %v8866_v16  ;;  %v7895_v52 = vld [vmem:[%s11672_s2 + $0x28] ss:$16 sps:$4 sm:$0xff]   ;;  %v7900_v53 = vld [vmem:[%s11672_s2 + $0x4] ss:$16 sps:$4 sm:$0xff]   ;;  %v7903_v54 = vld [vmem:[%s11672_s2 + $0xc] ss:$16 sps:$4 sm:$0xff]  }
  0x13   :  { %239 = vmatprep.mubr.bf16.mxu0 %v11680_v1  ;;  %352 = vmatprep.mubr.bf16.mxu1 %v11680_v1  ;;  %v7898_v55 = vld [vmem:[%s11672_s2] ss:$16 sps:$4 sm:$0xff]   ;;  %v7901_v56 = vld [vmem:[%s11672_s2 + $0x8] ss:$16 sps:$4 sm:$0xff]   ;;  %v7906_v57 = vld [vmem:[%s11673_s5 + $0xe4] ss:$16 sps:$4 sm:$0xff]  }
  0x14   :  { %v7909_v58 = vld [vmem:[%s11673_s5 + $0xec] ss:$16 sps:$4 sm:$0xff]   ;;  %v7904_v59 = vld [vmem:[%s11673_s5 + $0xe0] ss:$16 sps:$4 sm:$0xff]   ;;  %v7907_v60 = vld [vmem:[%s11673_s5 + $0xe8] ss:$16 sps:$4 sm:$0xff]  }
  0x15   :  { %v7912_v61 = vld [vmem:[%s11673_s5 + $0xc4] ss:$16 sps:$4 sm:$0xff]   ;;  %v7915_v62 = vld [vmem:[%s11673_s5 + $0xcc] ss:$16 sps:$4 sm:$0xff]   ;;  %v7910_v63 = vld [vmem:[%s11673_s5 + $0xc0] ss:$16 sps:$4 sm:$0xff]  }
  0x16   :  { %v7913_v0 = vld [vmem:[%s11673_s5 + $0xc8] ss:$16 sps:$4 sm:$0xff]   ;;  %v7918_v2 = vld [vmem:[%s11673_s5 + $0xa4] ss:$16 sps:$4 sm:$0xff]   ;;  %v7921_v3 = vld [vmem:[%s11673_s5 + $0xac] ss:$16 sps:$4 sm:$0xff]  }
  0x17   :  { %v7916_v4 = vld [vmem:[%s11673_s5 + $0xa0] ss:$16 sps:$4 sm:$0xff]   ;;  %v7919_v5 = vld [vmem:[%s11673_s5 + $0xa8] ss:$16 sps:$4 sm:$0xff]   ;;  %v7924_v6 = vld [vmem:[%s11673_s5 + $0x84] ss:$16 sps:$4 sm:$0xff]  }
  0x18   :  { %v7927_v7 = vld [vmem:[%s11673_s5 + $0x8c] ss:$16 sps:$4 sm:$0xff]   ;;  %v7922_v8 = vld [vmem:[%s11673_s5 + $0x80] ss:$16 sps:$4 sm:$0xff]   ;;  %v7930_v10 = vld [vmem:[%s11673_s5 + $0x64] ss:$16 sps:$4 sm:$0xff]  }
  0x19   :  { %v7933_v11 = vld [vmem:[%s11673_s5 + $0x6c] ss:$16 sps:$4 sm:$0xff]   ;;  %v7928_v12 = vld [vmem:[%s11673_s5 + $0x60] ss:$16 sps:$4 sm:$0xff]   ;;  %v7931_v13 = vld [vmem:[%s11673_s5 + $0x68] ss:$16 sps:$4 sm:$0xff]  }
  0x1a   :  { %7000 = vmatmul.mubr.msk.bf16.gmra.mxu0 %vm162_vm0, %v8889_v21  ;;  %7008 = vmatmul.mubr.msk.bf16.gmra.mxu1 %vm162_vm0, %v8889_v21  ;;  %v7936_v14 = vld [vmem:[%s11673_s5 + $0x44] ss:$16 sps:$4 sm:$0xff]   ;;  %v7939_v15 = vld [vmem:[%s11673_s5 + $0x4c] ss:$16 sps:$4 sm:$0xff]   ;;  %v7937_v17 = vld [vmem:[%s11673_s5 + $0x48] ss:$16 sps:$4 sm:$0xff]  }
  0x1b   :  { %249 = vmatprep.mubr.bf16.mxu0 %v11680_v1  ;;  %362 = vmatprep.mubr.bf16.mxu1 %v11680_v1  ;;  %v7942_v18 = vld [vmem:[%s11673_s5 + $0x24] ss:$16 sps:$4 sm:$0xff]   ;;  %v7945_v19 = vld [vmem:[%s11673_s5 + $0x2c] ss:$16 sps:$4 sm:$0xff]   ;;  %v7940_v20 = vld [vmem:[%s11673_s5 + $0x20] ss:$16 sps:$4 sm:$0xff]  }
  0x22   :  { %7001 = vmatmul.mubr.msk.bf16.gmra.mxu0 %vm162_vm0, %v8900_v22  ;;  %7009 = vmatmul.mubr.msk.bf16.gmra.mxu1 %vm162_vm0, %v8900_v22 }
  0x23   :  { %259 = vmatprep.mubr.bf16.mxu0 %v11680_v1  ;;  %372 = vmatprep.mubr.bf16.mxu1 %v11680_v1 }
  0x2a   :  { %7002 = vmatmul.mubr.msk.bf16.gmra.mxu0 %vm162_vm0, %v8911_v23  ;;  %7010 = vmatmul.mubr.msk.bf16.gmra.mxu1 %vm162_vm0, %v8911_v23 }
  0x2b   :  { %269 = vmatprep.mubr.bf16.mxu0 %v11680_v1  ;;  %382 = vmatprep.mubr.bf16.mxu1 %v11680_v1 }
  0x32   :  { %7003 = vmatmul.mubr.msk.bf16.gmra.mxu0 %vm162_vm0, %v8922_v24  ;;  %7011 = vmatmul.mubr.msk.bf16.gmra.mxu1 %vm162_vm0, %v8922_v24 }
  0x33   :  { %279 = vmatprep.mubr.bf16.mxu0 %v11680_v1  ;;  %392 = vmatprep.mubr.bf16.mxu1 %v11680_v1 }
  0x3a   :  { %7004 = vmatmul.mubr.msk.bf16.gmra.mxu0 %vm162_vm0, %v8933_v25  ;;  %7012 = vmatmul.mubr.msk.bf16.gmra.mxu1 %vm162_vm0, %v8933_v25 }
  0x3b   :  { %289 = vmatprep.mubr.bf16.mxu0 %v11680_v1  ;;  %402 = vmatprep.mubr.bf16.mxu1 %v11680_v1 }
  0x42   :  { %7005 = vmatmul.mubr.msk.bf16.gmra.mxu0 %vm162_vm0, %v8944_v26  ;;  %7013 = vmatmul.mubr.msk.bf16.gmra.mxu1 %vm162_vm0, %v8944_v26 }
  0x43   :  { %582 = vmatprep.mubr.bf16.mxu0 %v11680_v1  ;;  %695 = vmatprep.mubr.bf16.mxu1 %v11680_v1 }
  0x4a   :  { %7022 = vmatmul.mubr.msk.bf16.vlgmr.msra.gmra.mxu0 %vm162_vm0, %v8837_v9  ;;  %7030 = vmatmul.mubr.msk.bf16.vlgmr.msra.gmra.mxu1 %vm162_vm0, %v8837_v9  ;;  %v7925_v9 = vld [vmem:[%s11673_s5 + $0x88] ss:$16 sps:$4 sm:$0xff]  }
  0x4b   :  { %1043 = vmatpush1.bf16.msra.mxu0 %v7856_v27  ;;  %592 = vmatprep.mubr.bf16.mxu0 %v11680_v1 }
  0x4c   :  { %705 = vmatprep.mubr.bf16.mxu1 %v11680_v1  ;;  %1044 = vmatprep.subr.bf16.mxu0 %v7861_v28 }
  0x4d   :  { %1086 = vmatpush1.bf16.msra.mxu1 %v7862_v29 }
  0x4e   :  { %1087 = vmatprep.subr.bf16.mxu1 %v7870_v30 }
  0x4f   :  { %1045 = vmatpush1.bf16.msra.mxu0 %v7859_v31 }
  0x50   :  { %1046 = vmatprep.subr.bf16.mxu0 %v7867_v32 }
  0x51   :  { %1088 = vmatpush1.bf16.msra.mxu1 %v7868_v33 }
  0x52   :  { %7023 = vmatmul.mubr.msk.bf16.gmra.mxu0 %vm162_vm0, %v8866_v16  ;;  %7031 = vmatmul.mubr.msk.bf16.gmra.mxu1 %vm162_vm0, %v8866_v16  ;;  %v7934_v16 = vld [vmem:[%s11673_s5 + $0x40] ss:$16 sps:$4 sm:$0xff]  }
  0x53   :  { %602 = vmatprep.mubr.bf16.mxu0 %v11680_v1  ;;  %715 = vmatprep.mubr.bf16.mxu1 %v11680_v1 }
  0x54   :  { %1047 = vmatpush1.bf16.msra.mxu0 %v7865_v34  ;;  %1089 = vmatprep.subr.bf16.mxu1 %v7876_v35  ;;  %v60_v34 = vld [vmem:[%s11674_s3] sm:$0xf] }
  0x55   :  { %1048 = vmatprep.subr.bf16.mxu0 %v7873_v36  ;;  %1090 = vmatpush1.bf16.msra.mxu1 %v7874_v37 }
  0x56   :  { %1091 = vmatprep.subr.bf16.mxu1 %v7882_v38 }
  0x58   :  { %1049 = vmatpush1.bf16.msra.mxu0 %v7871_v39 }
  0x59   :  { %1050 = vmatprep.subr.bf16.mxu0 %v7879_v40  ;;  %1092 = vmatpush1.bf16.msra.mxu1 %v7880_v41 }
  0x5a   :  { %7024 = vmatmul.mubr.msk.bf16.gmra.mxu0 %vm162_vm0, %v8889_v21  ;;  %7032 = vmatmul.mubr.msk.bf16.gmra.mxu1 %vm162_vm0, %v8889_v21  ;;  %v7943_v21 = vld [vmem:[%s11673_s5 + $0x28] ss:$16 sps:$4 sm:$0xff]  }
  0x5b   :  { %612 = vmatprep.mubr.bf16.mxu0 %v11680_v1  ;;  %725 = vmatprep.mubr.bf16.mxu1 %v11680_v1 }
  0x5c   :  { %1051 = vmatpush1.bf16.msra.mxu0 %v7877_v42  ;;  %1093 = vmatprep.subr.bf16.mxu1 %v7888_v43 }
  0x5d   :  { %1052 = vmatprep.subr.bf16.mxu0 %v7885_v44  ;;  %1094 = vmatpush1.bf16.msra.mxu1 %v7886_v45 }
  0x5e   :  { %1095 = vmatprep.subr.bf16.mxu1 %v7894_v46 }
  0x60   :  { %1053 = vmatpush1.bf16.msra.mxu0 %v7883_v47 }
  0x61   :  { %1054 = vmatprep.subr.bf16.mxu0 %v7891_v48  ;;  %1096 = vmatpush1.bf16.msra.mxu1 %v7892_v49 }
  0x62   :  { %7025 = vmatmul.mubr.msk.bf16.gmra.mxu0 %vm162_vm0, %v8900_v22  ;;  %7033 = vmatmul.mubr.msk.bf16.gmra.mxu1 %vm162_vm0, %v8900_v22  ;;  %v7948_v22 = vld [vmem:[%s11673_s5 + $0x4] ss:$16 sps:$4 sm:$0xff]  }
  0x63   :  { %622 = vmatprep.mubr.bf16.mxu0 %v11680_v1  ;;  %735 = vmatprep.mubr.bf16.mxu1 %v11680_v1 }
  0x64   :  { %1055 = vmatpush1.bf16.msra.mxu0 %v7889_v50  ;;  %1097 = vmatprep.subr.bf16.mxu1 %v7897_v51 }
  0x65   :  { %1056 = vmatprep.subr.bf16.mxu0 %v7900_v53  ;;  %1098 = vmatpush1.bf16.msra.mxu1 %v7895_v52 }
  0x66   :  { %1099 = vmatprep.subr.bf16.mxu1 %v7903_v54 }
  0x68   :  { %1057 = vmatpush1.bf16.msra.mxu0 %v7898_v55 }
  0x69   :  { %1100 = vmatpush1.bf16.msra.mxu1 %v7901_v56  ;;  %1339 = vmatprep.subr.bf16.mxu0 %v7906_v57 }
  0x6a   :  { %7026 = vmatmul.mubr.msk.bf16.gmra.mxu0 %vm162_vm0, %v8911_v23  ;;  %7034 = vmatmul.mubr.msk.bf16.gmra.mxu1 %vm162_vm0, %v8911_v23  ;;  %v7951_v23 = vld [vmem:[%s11673_s5 + $0xc] ss:$16 sps:$4 sm:$0xff]  }
  0x6b   :  { %632 = vmatprep.mubr.bf16.mxu0 %v11680_v1  ;;  %745 = vmatprep.mubr.bf16.mxu1 %v11680_v1 }
  0x6c   :  { %1382 = vmatprep.subr.bf16.mxu1 %v7909_v58 }
  0x72   :  { %7027 = vmatmul.mubr.msk.bf16.gmra.mxu0 %vm162_vm0, %v8922_v24  ;;  %7035 = vmatmul.mubr.msk.bf16.gmra.mxu1 %vm162_vm0, %v8922_v24  ;;  %v7946_v24 = vld [vmem:[%s11673_s5] ss:$16 sps:$4 sm:$0xff]  }
  0x73   :  { %642 = vmatprep.mubr.bf16.mxu0 %v11680_v1  ;;  %755 = vmatprep.mubr.bf16.mxu1 %v11680_v1 }
  0x7a   :  { %7028 = vmatmul.mubr.msk.bf16.gmra.mxu0 %vm162_vm0, %v8933_v25  ;;  %7036 = vmatmul.mubr.msk.bf16.gmra.mxu1 %vm162_vm0, %v8933_v25  ;;  %v7949_v25 = vld [vmem:[%s11673_s5 + $0x8] ss:$16 sps:$4 sm:$0xff]  }
  0x7b   :  { %652 = vmatprep.mubr.bf16.mxu0 %v11680_v1  ;;  %765 = vmatprep.mubr.bf16.mxu1 %v11680_v1 }
  0x82   :  { %7029 = vmatmul.mubr.msk.bf16.gmra.mxu0 %vm162_vm0, %v8944_v26  ;;  %7037 = vmatmul.mubr.msk.bf16.gmra.mxu1 %vm162_vm0, %v8944_v26  ;;  %v62_v26 = vlaneseq }
  0x83   :  { %1074 = vmatprep.mubr.bf16.mxu0 %v11680_v1  ;;  %1117 = vmatprep.mubr.bf16.mxu1 %v11680_v1 }
  0x84   :  { %v9194_v27 = vshrl.u32 %v62_v26, 7  ;;  %v9342_v26 = vld [vmem:[%s11672_s2 + $0xa4] ss:$16 sps:$4 sm:$0xff]  }
  0x86   :  { %v11685_v32 = vsub.s32 0, %v9194_v27  ;;  %v11684_v33 = vsub.s32 2, %v9194_v27  ;;  %v11683_v37 = vsub.s32 1, %v9194_v27  ;;  %v11682_v38 = vsub.s32 3, %v9194_v27 }
  0x88   :  { %v9221_v41 = vrot.slane %v60_v34, %v11685_v32  ;;  %v9225_v42 = vrot.slane %v60_v34, %v11684_v33  ;;  %v9229_v45 = vrot.slane %v60_v34, %v11683_v37  ;;  %v9233_v46 = vrot.slane %v60_v34, %v11682_v38  ;;  %v9347_v34 = vld [vmem:[%s11672_s2 + $0xac] ss:$16 sps:$4 sm:$0xff]  }
  0x8a   :  { %1075 = vmatmul.mubr.bf16.vlgmr.msra.gmra.mxu0 %v11680_v1  ;;  %1118 = vmatmul.mubr.bf16.vlgmr.msra.gmra.mxu1 %v11680_v1 }
  0x8b   :  { %1340 = vmatpush1.bf16.msra.mxu0 %v7904_v59  ;;  %1383 = vmatpush1.bf16.msra.mxu1 %v7907_v60 }
  0x8c   :  { %1341 = vmatprep.subr.bf16.mxu0 %v7912_v61  ;;  %1384 = vmatprep.subr.bf16.mxu1 %v7915_v62 }
  0x8d   :  { %1371 = vmatprep.mubr.bf16.mxu0 %v11680_v1  ;;  %1414 = vmatprep.mubr.bf16.mxu1 %v11680_v1 }
  0x8f   :  { %1342 = vmatpush1.bf16.msra.mxu0 %v7910_v63  ;;  %1385 = vmatpush1.bf16.msra.mxu1 %v7913_v0 }
  0x90   :  { %1343 = vmatprep.subr.bf16.mxu0 %v7918_v2  ;;  %1386 = vmatprep.subr.bf16.mxu1 %v7921_v3 }
  0x93   :  { %1344 = vmatpush1.bf16.msra.mxu0 %v7916_v4  ;;  %1387 = vmatpush1.bf16.msra.mxu1 %v7919_v5  ;;  %v9272_v4 = vld [vmem:[%s11672_s2 + $0xe4] ss:$16 sps:$4 sm:$0xff]   ;;  %v9277_v5 = vld [vmem:[%s11672_s2 + $0xec] ss:$16 sps:$4 sm:$0xff]  }
  0x94   :  { %1345 = vmatprep.subr.bf16.mxu0 %v7924_v6  ;;  %1388 = vmatprep.subr.bf16.mxu1 %v7927_v7 }
  0x97   :  { %1346 = vmatpush1.bf16.msra.mxu0 %v7922_v8  ;;  %1389 = vmatpush1.bf16.msra.mxu1 %v7925_v9  ;;  %v9282_v8 = vld [vmem:[%s11672_s2 + $0xe0] ss:$16 sps:$4 sm:$0xff]   ;;  %v9287_v9 = vld [vmem:[%s11672_s2 + $0xe8] ss:$16 sps:$4 sm:$0xff]  }
  0x98   :  { %1347 = vmatprep.subr.bf16.mxu0 %v7930_v10  ;;  %1390 = vmatprep.subr.bf16.mxu1 %v7933_v11 }
  0x9b   :  { %1348 = vmatpush1.bf16.msra.mxu0 %v7928_v12  ;;  %1391 = vmatpush1.bf16.msra.mxu1 %v7931_v13 }
  0x9c   :  { %1349 = vmatprep.subr.bf16.mxu0 %v7936_v14  ;;  %1392 = vmatprep.subr.bf16.mxu1 %v7939_v15  ;;  %v9306_v14 = vld [vmem:[%s11672_s2 + $0xc4] ss:$16 sps:$4 sm:$0xff]   ;;  %v9311_v15 = vld [vmem:[%s11672_s2 + $0xcc] ss:$16 sps:$4 sm:$0xff]  }
  0x9f   :  { %1350 = vmatpush1.bf16.msra.mxu0 %v7934_v16  ;;  %1393 = vmatpush1.bf16.msra.mxu1 %v7937_v17 }
  0xa0   :  { %1351 = vmatprep.subr.bf16.mxu0 %v7942_v18  ;;  %1394 = vmatprep.subr.bf16.mxu1 %v7945_v19  ;;  %v9316_v18 = vld [vmem:[%s11672_s2 + $0xc0] ss:$16 sps:$4 sm:$0xff]   ;;  %v9321_v19 = vld [vmem:[%s11672_s2 + $0xc8] ss:$16 sps:$4 sm:$0xff]  }
  0xa3   :  { %1352 = vmatpush1.bf16.msra.mxu0 %v7940_v20  ;;  %1395 = vmatpush1.bf16.msra.mxu1 %v7943_v21 }
  0xa4   :  { %1353 = vmatprep.subr.bf16.mxu0 %v7948_v22  ;;  %1396 = vmatprep.subr.bf16.mxu1 %v7951_v23 }
  0xa7   :  { %1354 = vmatpush1.bf16.msra.mxu0 %v7946_v24  ;;  %1397 = vmatpush1.bf16.msra.mxu1 %v7949_v25 }
  0xa8   :  { %1729 = vmatprep.subr.bf16.mxu0 %v9272_v4  ;;  %1772 = vmatprep.subr.bf16.mxu1 %v9277_v5 }
  0xaa   :  { %1372 = vmatmul.mubr.bf16.vlgmr.msra.gmra.mxu0 %v11680_v1  ;;  %1415 = vmatmul.mubr.bf16.vlgmr.msra.gmra.mxu1 %v11680_v1 }
  0xab   :  { %1761 = vmatprep.mubr.bf16.mxu0 %v11680_v1  ;;  %1804 = vmatprep.mubr.bf16.mxu1 %v11680_v1 }
  0xac   :  { %1730 = vmatpush1.bf16.msra.mxu0 %v9282_v8  ;;  %1773 = vmatpush1.bf16.msra.mxu1 %v9287_v9 }
  0xad   :  { %1731 = vmatprep.subr.bf16.mxu0 %v9306_v14  ;;  %1774 = vmatprep.subr.bf16.mxu1 %v9311_v15 }
  0xb0   :  { %1732 = vmatpush1.bf16.msra.mxu0 %v9316_v18  ;;  %1775 = vmatpush1.bf16.msra.mxu1 %v9321_v19 }
  0xb1   :  { %1733 = vmatprep.subr.bf16.mxu0 %v9342_v26  ;;  %1776 = vmatprep.subr.bf16.mxu1 %v9347_v34 }
  0xca   :  { %v9196_v28 = vpop.f32.mrf.mxu0  ;;  %v9198_v29 = vpop.f32.mrf.mxu1 }
  0xcc   :  { %v9200_v30 = vpop.f32.mrf.mxu0  ;;  %v9202_v31 = vpop.f32.mrf.mxu1 }
  0xce   :  { %v9209_v35 = vpop.f32.mrf.mxu0  ;;  %v9211_v36 = vpop.f32.mrf.mxu1 }
  0xd0   :  { %v9215_v39 = vpop.f32.mrf.mxu0  ;;  %v9217_v40 = vpop.f32.mrf.mxu1 }
  0xd2   :  { %v231_v43 = vpop.f32.mrf.mxu0  ;;  %v344_v44 = vpop.f32.mrf.mxu1 }
  0xd3   :  { %v9236_v47 = vadd.f32 %v231_v43, %v9221_v41  ;;  %v9239_v48 = vadd.f32 %v344_v44, %v9225_v42 }
  0xd4   :  { %v233_v49 = vpop.f32.mrf.mxu0  ;;  %v346_v50 = vpop.f32.mrf.mxu1 }
  0xd5   :  { %11734 = vst [vmem:[#allocation6_spill] sm:$0xff] %v9236_v47  ;;  %11735 = vst [vmem:[#allocation7_spill] sm:$0xff] %v9239_v48  ;;  %v9242_v51 = vadd.f32 %v233_v49, %v9229_v45  ;;  %v9245_v52 = vadd.f32 %v346_v50, %v9233_v46  ;;  %v9352_v49 = vld [vmem:[%s11672_s2 + $0xa0] ss:$16 sps:$4 sm:$0xff]   ;;  %v9357_v50 = vld [vmem:[%s11672_s2 + $0xa8] ss:$16 sps:$4 sm:$0xff]   ;;  %v335_v47 = vadd.f32 %v9198_v29, %v9225_v42 }
  0xd6   :  { %v235_v53 = vpop.f32.mrf.mxu0  ;;  %v348_v54 = vpop.f32.mrf.mxu1  ;;  %1734 = vmatpush1.bf16.msra.mxu0 %v9352_v49  ;;  %1777 = vmatpush1.bf16.msra.mxu1 %v9357_v50  ;;  %v339_v29 = vadd.f32 %v9211_v36, %v9225_v42 }
  0xd7   :  { %11736 = vst [vmem:[#allocation8_spill] sm:$0xff] %v9242_v51  ;;  %11737 = vst [vmem:[#allocation9_spill] sm:$0xff] %v9245_v52  ;;  %v9248_v55 = vadd.f32 %v235_v53, %v9221_v41  ;;  %v9251_v56 = vadd.f32 %v348_v54, %v9225_v42 }
  0xd8   :  { %v9253_v57 = vpop.f32.mrf.mxu0  ;;  %v9255_v58 = vpop.f32.mrf.mxu1 }
  0xd9   :  { %11738 = vst [vmem:[#allocation10_spill] sm:$0xff] %v9248_v55  ;;  %11739 = vst [vmem:[#allocation11_spill] sm:$0xff] %v9251_v56  ;;  %v11799_v56 = vsub.s32 2, %v9194_v27 }
  0xda   :  { %11740 = vst [vmem:[#allocation12_spill] sm:$0xff] %v9253_v57  ;;  %11741 = vst [vmem:[#allocation13_spill] sm:$0xff] %v9255_v58  ;;  %v241_v59 = vpop.f32.mrf.mxu0  ;;  %v354_v60 = vpop.f32.mrf.mxu1 }
  0xdb   :  { %v9258_v61 = vadd.f32 %v241_v59, %v9221_v41  ;;  %v9261_v62 = vadd.f32 %v354_v60, %v9225_v42 }
  0xdc   :  { %v243_v63 = vpop.f32.mrf.mxu0  ;;  %v356_v0 = vpop.f32.mrf.mxu1 }
  0xdd   :  { %11742 = vst [vmem:[#allocation14_spill] sm:$0xff] %v9258_v61  ;;  %11743 = vst [vmem:[#allocation15_spill] sm:$0xff] %v9261_v62  ;;  %v9264_v2 = vadd.f32 %v243_v63, %v9229_v45  ;;  %v9267_v3 = vadd.f32 %v356_v0, %v9233_v46  ;;  %v9376_v63 = vld [vmem:[%s11672_s2 + $0x84] ss:$16 sps:$4 sm:$0xff]   ;;  %v9381_v0 = vld [vmem:[%s11672_s2 + $0x8c] ss:$16 sps:$4 sm:$0xff]  }
  0xde   :  { %v245_v6 = vpop.f32.mrf.mxu0  ;;  %v358_v7 = vpop.f32.mrf.mxu1  ;;  %1735 = vmatprep.subr.bf16.mxu0 %v9376_v63  ;;  %1778 = vmatprep.subr.bf16.mxu1 %v9381_v0 }
  0xdf   :  { %11744 = vst [vmem:[#allocation16_spill] sm:$0xff] %v9264_v2  ;;  %11745 = vst [vmem:[#allocation17_spill] sm:$0xff] %v9267_v3  ;;  %v9290_v10 = vadd.f32 %v245_v6, %v9221_v41  ;;  %v9293_v11 = vadd.f32 %v358_v7, %v9225_v42  ;;  %v9537_v3 = vld [vmem:[%s11672_s2 + $0x8] ss:$16 sps:$4 sm:$0xff]  }
  0xe0   :  { %v9297_v12 = vpop.f32.mrf.mxu0  ;;  %v9299_v13 = vpop.f32.mrf.mxu1  ;;  %11783 = vst [vmem:[#allocation55_spill] sm:$0xff] %v9537_v3 }
  0xe1   :  { %11746 = vst [vmem:[#allocation18_spill] sm:$0xff] %v9290_v10  ;;  %11747 = vst [vmem:[#allocation19_spill] sm:$0xff] %v9293_v11  ;;  %v9552_v10 = vld [vmem:[%s11673_s5 + $0xe4] ss:$16 sps:$4 sm:$0xff]  }
  0xe2   :  { %11748 = vst [vmem:[#allocation20_spill] sm:$0xff] %v9297_v12  ;;  %11749 = vst [vmem:[#allocation21_spill] sm:$0xff] %v9299_v13  ;;  %v251_v16 = vpop.f32.mrf.mxu0  ;;  %v364_v17 = vpop.f32.mrf.mxu1  ;;  %v9557_v12 = vld [vmem:[%s11673_s5 + $0xec] ss:$16 sps:$4 sm:$0xff]  }
  0xe3   :  { %v9324_v20 = vadd.f32 %v251_v16, %v9221_v41  ;;  %v9327_v21 = vadd.f32 %v364_v17, %v9225_v42  ;;  %v9386_v16 = vld [vmem:[%s11672_s2 + $0x80] ss:$16 sps:$4 sm:$0xff]   ;;  %v9391_v17 = vld [vmem:[%s11672_s2 + $0x88] ss:$16 sps:$4 sm:$0xff]   ;;  %11786 = vst [vmem:[#allocation58_spill] sm:$0xff] %v9552_v10  ;;  %11787 = vst [vmem:[#allocation59_spill] sm:$0xff] %v9557_v12 }
  0xe4   :  { %v253_v22 = vpop.f32.mrf.mxu0  ;;  %v366_v23 = vpop.f32.mrf.mxu1  ;;  %1736 = vmatpush1.bf16.msra.mxu0 %v9386_v16  ;;  %1779 = vmatpush1.bf16.msra.mxu1 %v9391_v17 }
  0xe5   :  { %11750 = vst [vmem:[#allocation22_spill] sm:$0xff] %v9324_v20  ;;  %11751 = vst [vmem:[#allocation23_spill] sm:$0xff] %v9327_v21  ;;  %v9334_v24 = vadd.f32 %v253_v22, %v9229_v45  ;;  %v9337_v25 = vadd.f32 %v366_v23, %v9233_v46  ;;  %v9532_v20 = vld [vmem:[%s11672_s2] ss:$16 sps:$4 sm:$0xff]  }
  0xe6   :  { %v255_v43 = vpop.f32.mrf.mxu0  ;;  %v368_v44 = vpop.f32.mrf.mxu1  ;;  %11782 = vst [vmem:[#allocation54_spill] sm:$0xff] %v9532_v20 }
  0xe7   :  { %11752 = vst [vmem:[#allocation24_spill] sm:$0xff] %v9334_v24  ;;  %11753 = vst [vmem:[#allocation25_spill] sm:$0xff] %v9337_v25  ;;  %v9360_v53 = vadd.f32 %v255_v43, %v9221_v41  ;;  %v9363_v54 = vadd.f32 %v368_v44, %v9225_v42 }
  0xe8   :  { %v9367_v59 = vpop.f32.mrf.mxu0  ;;  %v9369_v60 = vpop.f32.mrf.mxu1 }
  0xe9   :  { %11754 = vst [vmem:[#allocation26_spill] sm:$0xff] %v9360_v53  ;;  %11755 = vst [vmem:[#allocation27_spill] sm:$0xff] %v9363_v54  ;;  %v9482_v53 = vld [vmem:[%s11672_s2 + $0x24] ss:$16 sps:$4 sm:$0xff]  }
  0xea   :  { %11756 = vst [vmem:[#allocation28_spill] sm:$0xff] %v9367_v59  ;;  %11757 = vst [vmem:[#allocation29_spill] sm:$0xff] %v9369_v60  ;;  %v261_v6 = vpop.f32.mrf.mxu0  ;;  %v374_v7 = vpop.f32.mrf.mxu1  ;;  %v9487_v59 = vld [vmem:[%s11672_s2 + $0x2c] ss:$16 sps:$4 sm:$0xff]  }
  0xeb   :  { %v9394_v22 = vadd.f32 %v261_v6, %v9221_v41  ;;  %v9397_v23 = vadd.f32 %v374_v7, %v9225_v42  ;;  %v9412_v6 = vld [vmem:[%s11672_s2 + $0x64] ss:$16 sps:$4 sm:$0xff]   ;;  %v9417_v7 = vld [vmem:[%s11672_s2 + $0x6c] ss:$16 sps:$4 sm:$0xff]   ;;  %11770 = vst [vmem:[#allocation42_spill] sm:$0xff] %v9482_v53  ;;  %11771 = vst [vmem:[#allocation43_spill] sm:$0xff] %v9487_v59 }
  0xec   :  { %v263_v43 = vpop.f32.mrf.mxu0  ;;  %v376_v44 = vpop.f32.mrf.mxu1  ;;  %1737 = vmatprep.subr.bf16.mxu0 %v9412_v6  ;;  %1780 = vmatprep.subr.bf16.mxu1 %v9417_v7 }
  0xed   :  { %11758 = vst [vmem:[#allocation30_spill] sm:$0xff] %v9394_v22  ;;  %11759 = vst [vmem:[#allocation31_spill] sm:$0xff] %v9397_v23  ;;  %v9404_v1 = vadd.f32 %v263_v43, %v9229_v45  ;;  %v9407_v38 = vadd.f32 %v376_v44, %v9233_v46  ;;  %v9422_v43 = vld [vmem:[%s11672_s2 + $0x60] ss:$16 sps:$4 sm:$0xff]   ;;  %v9427_v44 = vld [vmem:[%s11672_s2 + $0x68] ss:$16 sps:$4 sm:$0xff]  }
  0xee   :  { %v265_v37 = vpop.f32.mrf.mxu0  ;;  %v378_v33 = vpop.f32.mrf.mxu1  ;;  %1738 = vmatpush1.bf16.msra.mxu0 %v9422_v43  ;;  %1781 = vmatpush1.bf16.msra.mxu1 %v9427_v44 }
  0xef   :  { %11760 = vst [vmem:[#allocation32_spill] sm:$0xff] %v9404_v1  ;;  %11761 = vst [vmem:[#allocation33_spill] sm:$0xff] %v9407_v38  ;;  %v9430_v32 = vadd.f32 %v265_v37, %v9221_v41  ;;  %v9433_v38 = vadd.f32 %v378_v33, %v9225_v42  ;;  %v9446_v37 = vld [vmem:[%s11672_s2 + $0x44] ss:$16 sps:$4 sm:$0xff]   ;;  %v9451_v33 = vld [vmem:[%s11672_s2 + $0x4c] ss:$16 sps:$4 sm:$0xff]  }
  0xf0   :  { %v9437_v23 = vpop.f32.mrf.mxu0  ;;  %v9439_v1 = vpop.f32.mrf.mxu1  ;;  %1739 = vmatprep.subr.bf16.mxu0 %v9446_v37  ;;  %1782 = vmatprep.subr.bf16.mxu1 %v9451_v33 }
  0xf1   :  { %11762 = vst [vmem:[#allocation34_spill] sm:$0xff] %v9430_v32  ;;  %11763 = vst [vmem:[#allocation35_spill] sm:$0xff] %v9433_v38  ;;  %v9462_v32 = vld [vmem:[%s11672_s2 + $0x40] ss:$16 sps:$4 sm:$0xff]  }
  0xf2   :  { %11764 = vst [vmem:[#allocation36_spill] sm:$0xff] %v9437_v23  ;;  %11765 = vst [vmem:[#allocation37_spill] sm:$0xff] %v9439_v1  ;;  %v271_v22 = vpop.f32.mrf.mxu0  ;;  %v384_v25 = vpop.f32.mrf.mxu1  ;;  %v9467_v23 = vld [vmem:[%s11672_s2 + $0x48] ss:$16 sps:$4 sm:$0xff]   ;;  %1740 = vmatpush1.bf16.msra.mxu0 %v9462_v32 }
  0xf3   :  { %v9454_v38 = vadd.f32 %v271_v22, %v9221_v41  ;;  %v9457_v1 = vadd.f32 %v384_v25, %v9225_v42  ;;  %1783 = vmatpush1.bf16.msra.mxu1 %v9467_v23  ;;  %1741 = vmatprep.subr.bf16.mxu0 %v9482_v53 }
  0xf4   :  { %v273_v60 = vpop.f32.mrf.mxu0  ;;  %v386_v54 = vpop.f32.mrf.mxu1  ;;  %1784 = vmatprep.subr.bf16.mxu1 %v9487_v59 }
  0xf5   :  { %11766 = vst [vmem:[#allocation38_spill] sm:$0xff] %v9454_v38  ;;  %11767 = vst [vmem:[#allocation39_spill] sm:$0xff] %v9457_v1  ;;  %v9472_v22 = vadd.f32 %v273_v60, %v9229_v45  ;;  %v9475_v25 = vadd.f32 %v386_v54, %v9233_v46 }
  0xf6   :  { %v275_v1 = vpop.f32.mrf.mxu0  ;;  %v388_v38 = vpop.f32.mrf.mxu1 }
  0xf7   :  { %11768 = vst [vmem:[#allocation40_spill] sm:$0xff] %v9472_v22  ;;  %11769 = vst [vmem:[#allocation41_spill] sm:$0xff] %v9475_v25  ;;  %v9490_v60 = vadd.f32 %v275_v1, %v9221_v41  ;;  %v9493_v54 = vadd.f32 %v388_v38, %v9225_v42  ;;  %v9498_v25 = vld [vmem:[%s11672_s2 + $0x20] ss:$16 sps:$4 sm:$0xff]   ;;  %v9503_v22 = vld [vmem:[%s11672_s2 + $0x28] ss:$16 sps:$4 sm:$0xff]  }
  0xf8   :  { %11774 = vst [vmem:[#allocation46_spill] sm:$0xff] %v9498_v25  ;;  %11775 = vst [vmem:[#allocation47_spill] sm:$0xff] %v9503_v22  ;;  %v9505_v21 = vpop.f32.mrf.mxu0  ;;  %v9507_v24 = vpop.f32.mrf.mxu1  ;;  %1742 = vmatpush1.bf16.msra.mxu0 %v9498_v25  ;;  %1785 = vmatpush1.bf16.msra.mxu1 %v9503_v22 }
  0xf9   :  { %11772 = vst [vmem:[#allocation44_spill] sm:$0xff] %v9490_v60  ;;  %11773 = vst [vmem:[#allocation45_spill] sm:$0xff] %v9493_v54  ;;  %v9516_v54 = vld [vmem:[%s11672_s2 + $0x4] ss:$16 sps:$4 sm:$0xff]   ;;  %v9521_v60 = vld [vmem:[%s11672_s2 + $0xc] ss:$16 sps:$4 sm:$0xff]  }
  0xfa   :  { %11776 = vst [vmem:[#allocation48_spill] sm:$0xff] %v9505_v21  ;;  %11777 = vst [vmem:[#allocation49_spill] sm:$0xff] %v9507_v24  ;;  %v281_v1 = vpop.f32.mrf.mxu0  ;;  %v394_v38 = vpop.f32.mrf.mxu1  ;;  %1743 = vmatprep.subr.bf16.mxu0 %v9516_v54  ;;  %1786 = vmatprep.subr.bf16.mxu1 %v9521_v60 }
  0xfb   :  { %11778 = vst [vmem:[#allocation50_spill] sm:$0xff] %v9516_v54  ;;  %11779 = vst [vmem:[#allocation51_spill] sm:$0xff] %v9521_v60  ;;  %v9524_v24 = vadd.f32 %v281_v1, %v9221_v41  ;;  %v9527_v21 = vadd.f32 %v394_v38, %v9225_v42 }
  0xfc   :  { %v283_v13 = vpop.f32.mrf.mxu0  ;;  %v396_v11 = vpop.f32.mrf.mxu1  ;;  %1744 = vmatpush1.bf16.msra.mxu0 %v9532_v20  ;;  %1787 = vmatpush1.bf16.msra.mxu1 %v9537_v3  ;;  %v226_v3 = vadd.f32 %v9209_v35, %v9221_v41 }
  0xfd   :  { %11780 = vst [vmem:[#allocation52_spill] sm:$0xff] %v9524_v24  ;;  %11781 = vst [vmem:[#allocation53_spill] sm:$0xff] %v9527_v21  ;;  %v9542_v1 = vadd.f32 %v283_v13, %v9229_v45  ;;  %v9545_v38 = vadd.f32 %v396_v11, %v9233_v46  ;;  %2026 = vmatprep.subr.bf16.mxu0 %v9552_v10  ;;  %2069 = vmatprep.subr.bf16.mxu1 %v9557_v12 }
  0xfe   :  { %v285_v21 = vpop.f32.mrf.mxu0  ;;  %v398_v24 = vpop.f32.mrf.mxu1 }
  0xff   :  { %11784 = vst [vmem:[#allocation56_spill] sm:$0xff] %v9542_v1  ;;  %11785 = vst [vmem:[#allocation57_spill] sm:$0xff] %v9545_v38  ;;  %v9560_v13 = vadd.f32 %v285_v21, %v9221_v41  ;;  %v9563_v11 = vadd.f32 %v398_v24, %v9225_v42  ;;  %v488_v24 = vld [vmem:[%s11675_s6] sm:$0xf] }
 0x100   :  { %v9565_v38 = vpop.f32.mrf.mxu0  ;;  %v9567_v1 = vpop.f32.mrf.mxu1  ;;  %v9598_v55 = vrot.slane %v488_v24, %v11799_v56 }
 0x101   :  { %11788 = vst [vmem:[#allocation60_spill] sm:$0xff] %v9560_v13  ;;  %11789 = vst [vmem:[#allocation61_spill] sm:$0xff] %v9563_v11 }
 0x102   :  { %11790 = vst [vmem:[#allocation62_spill] sm:$0xff] %v9565_v38  ;;  %11791 = vst [vmem:[#allocation63_spill] sm:$0xff] %v9567_v1  ;;  %v291_v62 = vpop.f32.mrf.mxu0  ;;  %v404_v2 = vpop.f32.mrf.mxu1 }
 0x103   :  { %v9572_v61 = vadd.f32 %v291_v62, %v9221_v41  ;;  %v9575_v52 = vadd.f32 %v404_v2, %v9225_v42 }
 0x104   :  { %v293_v21 = vpop.f32.mrf.mxu0  ;;  %v406_v13 = vpop.f32.mrf.mxu1 }
 0x105   :  { %11792 = vst [vmem:[#allocation64_spill] sm:$0xff] %v9572_v61  ;;  %11793 = vst [vmem:[#allocation65_spill] sm:$0xff] %v9575_v52  ;;  %v9581_v1 = vadd.f32 %v293_v21, %v9229_v45  ;;  %v9584_v11 = vadd.f32 %v406_v13, %v9233_v46  ;;  %v11798_v52 = vsub.s32 0, %v9194_v27 }
 0x106   :  { %v295_v38 = vpop.f32.mrf.mxu0  ;;  %v408_v58 = vpop.f32.mrf.mxu1 }
 0x107   :  { %11794 = vst [vmem:[#allocation66_spill] sm:$0xff] %v9581_v1  ;;  %11795 = vst [vmem:[#allocation67_spill] sm:$0xff] %v9584_v11  ;;  %v9587_v62 = vadd.f32 %v295_v38, %v9221_v41  ;;  %v9590_v2 = vadd.f32 %v408_v58, %v9225_v42  ;;  %v9594_v61 = vrot.slane %v488_v24, %v11798_v52  ;;  %v11802_v11 = vsub.s32 1, %v9194_v27 }
 0x108   :  { %v9600_v21 = vpop.f32.mrf.mxu0  ;;  %v9602_v13 = vpop.f32.mrf.mxu1  ;;  %v11803_v38 = vsub.s32 3, %v9194_v27 }
 0x109   :  { %11796 = vst [vmem:[#allocation68_spill] sm:$0xff] %v9587_v62  ;;  %11797 = vst [vmem:[#allocation69_spill] sm:$0xff] %v9590_v2  ;;  %v9606_v1 = vrot.slane %v488_v24, %v11802_v11 }
 0x10a   :  { %11800 = vst [vmem:[#allocation70_spill] sm:$0xff] %v9600_v21  ;;  %11801 = vst [vmem:[#allocation71_spill] sm:$0xff] %v9602_v13  ;;  %v9610_v58 = vrot.slane %v488_v24, %v11803_v38  ;;  %v584_v2 = vpop.f32.mrf.mxu0  ;;  %v697_v62 = vpop.f32.mrf.mxu1 }
 0x10b   :  { %v9613_v52 = vadd.f32 %v584_v2, %v9594_v61  ;;  %v9616_v56 = vadd.f32 %v697_v62, %v9598_v55 }
 0x10c   :  { %v586_v57 = vpop.f32.mrf.mxu0  ;;  %v699_v21 = vpop.f32.mrf.mxu1 }
 0x10d   :  { %11804 = vst [vmem:[#allocation72_spill] sm:$0xff] %v9613_v52  ;;  %11805 = vst [vmem:[#allocation73_spill] sm:$0xff] %v9616_v56  ;;  %v9619_v13 = vadd.f32 %v586_v57, %v9606_v1  ;;  %v9622_v11 = vadd.f32 %v699_v21, %v9610_v58 }
 0x10e   :  { %v588_v48 = vpop.f32.mrf.mxu0  ;;  %v701_v27 = vpop.f32.mrf.mxu1 }
 0x10f   :  { %11806 = vst [vmem:[#allocation74_spill] sm:$0xff] %v9619_v13  ;;  %11807 = vst [vmem:[#allocation75_spill] sm:$0xff] %v9622_v11  ;;  %v9625_v24 = vadd.f32 %v588_v48, %v9594_v61  ;;  %v9628_v38 = vadd.f32 %v701_v27, %v9598_v55 }
 0x110   :  { %v590_v2 = vpop.f32.mrf.mxu0  ;;  %v703_v52 = vpop.f32.mrf.mxu1 }
 0x111   :  { %11808 = vst [vmem:[#allocation76_spill] sm:$0xff] %v9625_v24  ;;  %11809 = vst [vmem:[#allocation77_spill] sm:$0xff] %v9628_v38  ;;  %v9631_v62 = vadd.f32 %v590_v2, %v9606_v1  ;;  %v9634_v56 = vadd.f32 %v703_v52, %v9610_v58 }
 0x112   :  { %v594_v57 = vpop.f32.mrf.mxu0  ;;  %v707_v13 = vpop.f32.mrf.mxu1 }
 0x113   :  { %11810 = vst [vmem:[#allocation78_spill] sm:$0xff] %v9631_v62  ;;  %11811 = vst [vmem:[#allocation79_spill] sm:$0xff] %v9634_v56  ;;  %v9637_v21 = vadd.f32 %v594_v57, %v9594_v61  ;;  %v9640_v11 = vadd.f32 %v707_v13, %v9598_v55 }
 0x114   :  { %v596_v48 = vpop.f32.mrf.mxu0  ;;  %v709_v24 = vpop.f32.mrf.mxu1 }
 0x115   :  { %11812 = vst [vmem:[#allocation80_spill] sm:$0xff] %v9637_v21  ;;  %11813 = vst [vmem:[#allocation81_spill] sm:$0xff] %v9640_v11  ;;  %v9643_v27 = vadd.f32 %v596_v48, %v9606_v1  ;;  %v9646_v38 = vadd.f32 %v709_v24, %v9610_v58 }
 0x116   :  { %v598_v2 = vpop.f32.mrf.mxu0  ;;  %v711_v62 = vpop.f32.mrf.mxu1 }
 0x117   :  { %11814 = vst [vmem:[#allocation82_spill] sm:$0xff] %v9643_v27  ;;  %11815 = vst [vmem:[#allocation83_spill] sm:$0xff] %v9646_v38  ;;  %v9649_v52 = vadd.f32 %v598_v2, %v9594_v61  ;;  %v9652_v56 = vadd.f32 %v711_v62, %v9598_v55 }
 0x118   :  { %v600_v57 = vpop.f32.mrf.mxu0  ;;  %v713_v21 = vpop.f32.mrf.mxu1 }
 0x119   :  { %11816 = vst [vmem:[#allocation84_spill] sm:$0xff] %v9649_v52  ;;  %11817 = vst [vmem:[#allocation85_spill] sm:$0xff] %v9652_v56  ;;  %v9655_v13 = vadd.f32 %v600_v57, %v9606_v1  ;;  %v9658_v11 = vadd.f32 %v713_v21, %v9610_v58 }
 0x11a   :  { %v604_v48 = vpop.f32.mrf.mxu0  ;;  %v717_v27 = vpop.f32.mrf.mxu1 }
 0x11b   :  { %11818 = vst [vmem:[#allocation86_spill] sm:$0xff] %v9655_v13  ;;  %11819 = vst [vmem:[#allocation87_spill] sm:$0xff] %v9658_v11  ;;  %v9661_v24 = vadd.f32 %v604_v48, %v9594_v61  ;;  %v9664_v38 = vadd.f32 %v717_v27, %v9598_v55 }
 0x11c   :  { %v606_v2 = vpop.f32.mrf.mxu0  ;;  %v719_v52 = vpop.f32.mrf.mxu1 }
 0x11d   :  { %11820 = vst [vmem:[#allocation88_spill] sm:$0xff] %v9661_v24  ;;  %11821 = vst [vmem:[#allocation89_spill] sm:$0xff] %v9664_v38  ;;  %v9667_v62 = vadd.f32 %v606_v2, %v9606_v1  ;;  %v9670_v56 = vadd.f32 %v719_v52, %v9610_v58 }
 0x11e   :  { %v608_v57 = vpop.f32.mrf.mxu0  ;;  %v721_v13 = vpop.f32.mrf.mxu1 }
 0x11f   :  { %11822 = vst [vmem:[#allocation90_spill] sm:$0xff] %v9667_v62  ;;  %11823 = vst [vmem:[#allocation91_spill] sm:$0xff] %v9670_v56  ;;  %v9673_v21 = vadd.f32 %v608_v57, %v9594_v61  ;;  %v9676_v11 = vadd.f32 %v721_v13, %v9598_v55 }
 0x120   :  { %v610_v48 = vpop.f32.mrf.mxu0  ;;  %v723_v24 = vpop.f32.mrf.mxu1 }
 0x121   :  { %11824 = vst [vmem:[#allocation92_spill] sm:$0xff] %v9673_v21  ;;  %11825 = vst [vmem:[#allocation93_spill] sm:$0xff] %v9676_v11  ;;  %v9679_v27 = vadd.f32 %v610_v48, %v9606_v1  ;;  %v9682_v38 = vadd.f32 %v723_v24, %v9610_v58 }
 0x122   :  { %v614_v2 = vpop.f32.mrf.mxu0  ;;  %v727_v62 = vpop.f32.mrf.mxu1 }
 0x123   :  { %11826 = vst [vmem:[#allocation94_spill] sm:$0xff] %v9679_v27  ;;  %11827 = vst [vmem:[#allocation95_spill] sm:$0xff] %v9682_v38  ;;  %v9685_v52 = vadd.f32 %v614_v2, %v9594_v61  ;;  %v9688_v56 = vadd.f32 %v727_v62, %v9598_v55 }
 0x124   :  { %v616_v57 = vpop.f32.mrf.mxu0  ;;  %v729_v21 = vpop.f32.mrf.mxu1 }
 0x125   :  { %11828 = vst [vmem:[#allocation96_spill] sm:$0xff] %v9685_v52  ;;  %11829 = vst [vmem:[#allocation97_spill] sm:$0xff] %v9688_v56  ;;  %v9691_v13 = vadd.f32 %v616_v57, %v9606_v1  ;;  %v9694_v11 = vadd.f32 %v729_v21, %v9610_v58 }
 0x126   :  { %v618_v48 = vpop.f32.mrf.mxu0  ;;  %v731_v27 = vpop.f32.mrf.mxu1 }
 0x127   :  { %11830 = vst [vmem:[#allocation98_spill] sm:$0xff] %v9691_v13  ;;  %11831 = vst [vmem:[#allocation99_spill] sm:$0xff] %v9694_v11  ;;  %v9697_v24 = vadd.f32 %v618_v48, %v9594_v61  ;;  %v9700_v38 = vadd.f32 %v731_v27, %v9598_v55 }
 0x128   :  { %v620_v2 = vpop.f32.mrf.mxu0  ;;  %v733_v52 = vpop.f32.mrf.mxu1 }
 0x129   :  { %11832 = vst [vmem:[#allocation100_spill] sm:$0xff] %v9697_v24  ;;  %11833 = vst [vmem:[#allocation101_spill] sm:$0xff] %v9700_v38  ;;  %v9703_v62 = vadd.f32 %v620_v2, %v9606_v1  ;;  %v9706_v56 = vadd.f32 %v733_v52, %v9610_v58 }
 0x12a   :  { %v624_v57 = vpop.f32.mrf.mxu0  ;;  %v737_v13 = vpop.f32.mrf.mxu1 }
 0x12b   :  { %11834 = vst [vmem:[#allocation102_spill] sm:$0xff] %v9703_v62  ;;  %11835 = vst [vmem:[#allocation103_spill] sm:$0xff] %v9706_v56  ;;  %v9709_v21 = vadd.f32 %v624_v57, %v9594_v61  ;;  %v9712_v11 = vadd.f32 %v737_v13, %v9598_v55 }
 0x12c   :  { %v626_v48 = vpop.f32.mrf.mxu0  ;;  %v739_v24 = vpop.f32.mrf.mxu1 }
 0x12d   :  { %11836 = vst [vmem:[#allocation104_spill] sm:$0xff] %v9709_v21  ;;  %11837 = vst [vmem:[#allocation105_spill] sm:$0xff] %v9712_v11  ;;  %v9715_v27 = vadd.f32 %v626_v48, %v9606_v1  ;;  %v9718_v38 = vadd.f32 %v739_v24, %v9610_v58 }
 0x12e   :  { %v628_v2 = vpop.f32.mrf.mxu0  ;;  %v741_v62 = vpop.f32.mrf.mxu1 }
 0x12f   :  { %11838 = vst [vmem:[#allocation106_spill] sm:$0xff] %v9715_v27  ;;  %11839 = vst [vmem:[#allocation107_spill] sm:$0xff] %v9718_v38  ;;  %v9721_v52 = vadd.f32 %v628_v2, %v9594_v61  ;;  %v9724_v56 = vadd.f32 %v741_v62, %v9598_v55 }
 0x130   :  { %v630_v57 = vpop.f32.mrf.mxu0  ;;  %v743_v21 = vpop.f32.mrf.mxu1 }
 0x131   :  { %11840 = vst [vmem:[#allocation108_spill] sm:$0xff] %v9721_v52  ;;  %11841 = vst [vmem:[#allocation109_spill] sm:$0xff] %v9724_v56  ;;  %v9727_v13 = vadd.f32 %v630_v57, %v9606_v1  ;;  %v9730_v11 = vadd.f32 %v743_v21, %v9610_v58 }
 0x132   :  { %v634_v48 = vpop.f32.mrf.mxu0  ;;  %v747_v27 = vpop.f32.mrf.mxu1 }
 0x133   :  { %11842 = vst [vmem:[#allocation110_spill] sm:$0xff] %v9727_v13  ;;  %11843 = vst [vmem:[#allocation111_spill] sm:$0xff] %v9730_v11  ;;  %v9733_v24 = vadd.f32 %v634_v48, %v9594_v61  ;;  %v9736_v38 = vadd.f32 %v747_v27, %v9598_v55 }
 0x134   :  { %v636_v2 = vpop.f32.mrf.mxu0  ;;  %v749_v52 = vpop.f32.mrf.mxu1 }
 0x135   :  { %11844 = vst [vmem:[#allocation112_spill] sm:$0xff] %v9733_v24  ;;  %11845 = vst [vmem:[#allocation113_spill] sm:$0xff] %v9736_v38  ;;  %v9739_v62 = vadd.f32 %v636_v2, %v9606_v1  ;;  %v9742_v56 = vadd.f32 %v749_v52, %v9610_v58 }
 0x136   :  { %v638_v57 = vpop.f32.mrf.mxu0  ;;  %v751_v13 = vpop.f32.mrf.mxu1 }
 0x137   :  { %11846 = vst [vmem:[#allocation114_spill] sm:$0xff] %v9739_v62  ;;  %11847 = vst [vmem:[#allocation115_spill] sm:$0xff] %v9742_v56  ;;  %v9745_v21 = vadd.f32 %v638_v57, %v9594_v61  ;;  %v9748_v11 = vadd.f32 %v751_v13, %v9598_v55 }
 0x138   :  { %v640_v48 = vpop.f32.mrf.mxu0  ;;  %v753_v24 = vpop.f32.mrf.mxu1 }
 0x139   :  { %11848 = vst [vmem:[#allocation116_spill] sm:$0xff] %v9745_v21  ;;  %11849 = vst [vmem:[#allocation117_spill] sm:$0xff] %v9748_v11  ;;  %v9751_v27 = vadd.f32 %v640_v48, %v9606_v1  ;;  %v9754_v38 = vadd.f32 %v753_v24, %v9610_v58 }
 0x13a   :  { %v644_v2 = vpop.f32.mrf.mxu0  ;;  %v757_v62 = vpop.f32.mrf.mxu1 }
 0x13b   :  { %11850 = vst [vmem:[#allocation118_spill] sm:$0xff] %v9751_v27  ;;  %11851 = vst [vmem:[#allocation119_spill] sm:$0xff] %v9754_v38  ;;  %v9757_v52 = vadd.f32 %v644_v2, %v9594_v61  ;;  %v9760_v56 = vadd.f32 %v757_v62, %v9598_v55 }
 0x13c   :  { %v646_v57 = vpop.f32.mrf.mxu0  ;;  %v759_v21 = vpop.f32.mrf.mxu1 }
 0x13d   :  { %11852 = vst [vmem:[#allocation120_spill] sm:$0xff] %v9757_v52  ;;  %11853 = vst [vmem:[#allocation121_spill] sm:$0xff] %v9760_v56  ;;  %v9763_v13 = vadd.f32 %v646_v57, %v9606_v1  ;;  %v9766_v11 = vadd.f32 %v759_v21, %v9610_v58 }
 0x13e   :  { %v648_v48 = vpop.f32.mrf.mxu0  ;;  %v761_v27 = vpop.f32.mrf.mxu1 }
 0x13f   :  { %11854 = vst [vmem:[#allocation122_spill] sm:$0xff] %v9763_v13  ;;  %11855 = vst [vmem:[#allocation123_spill] sm:$0xff] %v9766_v11  ;;  %v9769_v24 = vadd.f32 %v648_v48, %v9594_v61  ;;  %v9772_v38 = vadd.f32 %v761_v27, %v9598_v55 }
 0x140   :  { %v650_v2 = vpop.f32.mrf.mxu0  ;;  %v763_v52 = vpop.f32.mrf.mxu1 }
 0x141   :  { %11856 = vst [vmem:[#allocation124_spill] sm:$0xff] %v9769_v24  ;;  %11857 = vst [vmem:[#allocation125_spill] sm:$0xff] %v9772_v38  ;;  %v9775_v62 = vadd.f32 %v650_v2, %v9606_v1  ;;  %v9778_v56 = vadd.f32 %v763_v52, %v9610_v58  ;;  %v222_v52 = vadd.f32 %v9196_v28, %v9221_v41 }
 0x142   :  { %v9780_v57 = vpop.f32.mrf.mxu0  ;;  %v9782_v21 = vpop.f32.mrf.mxu1  ;;  %v228_v28 = vadd.f32 %v9215_v39, %v9229_v45  ;;  %v337_v39 = vadd.f32 %v9202_v31, %v9233_v46 }
 0x143   :  { %11858 = vst [vmem:[#allocation126_spill] sm:$0xff] %v9775_v62  ;;  %11859 = vst [vmem:[#allocation127_spill] sm:$0xff] %v9778_v56  ;;  %v224_v62 = vadd.f32 %v9200_v30, %v9229_v45 }
 0x144   :  { %v9784_v11 = vpop.f32.mrf.mxu0  ;;  %v9786_v13 = vpop.f32.mrf.mxu1 }
 0x146   :  { %v9788_v48 = vpop.f32.mrf.mxu0  ;;  %v9790_v27 = vpop.f32.mrf.mxu1 }
 0x148   :  { %v9792_v38 = vpop.f32.mrf.mxu0  ;;  %v9794_v24 = vpop.f32.mrf.mxu1 }
 0x14a   :  { %v1076_v2 = vpop.f32.mrf.mxu0  ;;  %v1119_v56 = vpop.f32.mrf.mxu1 }
 0x14b   :  { %v1128_v51 = vadd.f32 %v1076_v2, %v222_v52  ;;  %v1130_v54 = vadd.f32 %v1119_v56, %v335_v47 }
 0x14c   :  { %v1078_v12 = vpop.f32.mrf.mxu0  ;;  %v1121_v10 = vpop.f32.mrf.mxu1 }
 0x14d   :  { %v1433_v20 = vmul.f32 0.5, %v1128_v51  ;;  %v1129_v60 = vadd.f32 %v1078_v12, %v224_v62  ;;  %v341_v51 = vadd.f32 %v9217_v40, %v9233_v46 }
 0x14e   :  { %v1080_v22 = vpop.f32.mrf.mxu0  ;;  %v1123_v30 = vpop.f32.mrf.mxu1 }
 0x14f   :  { %8368 = vtanh.f32 %v1433_v20  ;;  %v1441_v25 = vmul.f32 0.5, %v1129_v60  ;;  %v1132_v59 = vadd.f32 %v1080_v22, %v226_v3  ;;  %v1134_v35 = vadd.f32 %v1123_v30, %v339_v29 }
 0x150   :  { %v1082_v52 = vpop.f32.mrf.mxu0  ;;  %v1125_v47 = vpop.f32.mrf.mxu1  ;;  %v1131_v3 = vadd.f32 %v1121_v10, %v337_v39  ;;  %v655_v39 = vadd.f32 %v9780_v57, %v9594_v61  ;;  %v768_v57 = vadd.f32 %v9782_v21, %v9598_v55 }
 0x151   :  { %8370 = vtanh.f32 %v1441_v25  ;;  %v1434_v2 = vmul.f32 0.5, %v1132_v59  ;;  %v1133_v53 = vadd.f32 %v1082_v52, %v228_v28  ;;  %v1135_v12 = vadd.f32 %v1125_v47, %v341_v51 }
 0x152   :  { %8372 = vtanh.f32 %v1130_v54  ;;  %v1451_v59 = vmul.f32 0.5, %v1131_v3 }
 0x153   :  { %8374 = vtanh.f32 %v1434_v2  ;;  %v1442_v41 = vmul.f32 0.5, %v1133_v53  ;;  %v1452_v54 = vmul.f32 0.5, %v1135_v12  ;;  %v657_v12 = vadd.f32 %v9784_v11, %v9606_v1 }
 0x155   :  { %8376 = vtanh.f32 %v1442_v41 }
 0x156   :  { %8378 = vtanh.f32 %v1134_v35 }
 0x157   :  { %8380 = vtanh.f32 %v1451_v59 }
 0x158   :  { %8382 = vtanh.f32 %v1452_v54 }
 0x15c   :  { %v8369_v20 = vpop.eup %8368 }
 0x15d   :  { %v1437_v36 = vmul.f32 0.5, %v8369_v20 }
 0x15e   :  { %v8371_v42 = vpop.eup %8370 }
 0x15f   :  { %v8373_v22 = vpop.eup %8372  ;;  %v1439_v25 = vadd.f32 0.5, %v1437_v36  ;;  %v1445_v60 = vmul.f32 0.5, %v8371_v42  ;;  %v659_v42 = vadd.f32 %v9788_v48, %v9594_v61  ;;  %v772_v48 = vadd.f32 %v9790_v27, %v9598_v55 }
 0x160   :  { %v8375_v53 = vpop.eup %8374 }
 0x161   :  { %v1447_v56 = vadd.f32 0.5, %v1445_v60  ;;  %v1461_v62 = vmul.f32 %v8373_v22, %v1439_v25  ;;  %v1438_v28 = vmul.f32 0.5, %v8375_v53  ;;  %v661_v53 = vadd.f32 %v9792_v38, %v9606_v1 }
 0x162   :  { %v8377_v30 = vpop.eup %8376  ;;  %v770_v38 = vadd.f32 %v9786_v13, %v9610_v58  ;;  %v9842_v13 = vld [vmem:[%s11673_s5 + $0xe8] ss:$16 sps:$4 sm:$0xff]  }
 0x163   :  { %v1459_v31 = vmul.f32 0.0, %v1447_v56  ;;  %v1440_v52 = vadd.f32 0.5, %v1438_v28  ;;  %v1446_v29 = vmul.f32 0.5, %v8377_v30  ;;  %v8379_v40 = vpop.eup %8378 }
 0x164   :  { %v8381_v54 = vpop.eup %8380 }
 0x165   :  { %v9812_v10 = vadd.f32 %v1461_v62, %v1459_v31  ;;  %v1448_v2 = vadd.f32 0.5, %v1446_v29  ;;  %v1462_v35 = vmul.f32 %v8379_v40, %v1440_v52  ;;  %v8383_v62 = vpop.eup %8382  ;;  %v1455_v21 = vmul.f32 0.5, %v8381_v54  ;;  %v9859_v54 = vld [vmem:[%s11673_s5 + $0xc0] ss:$16 sps:$4 sm:$0xff]  }
 0x166   :  { %v1456_v29 = vmul.f32 0.5, %v8383_v62  ;;  %v9871_v62 = vld [vmem:[%s11673_s5 + $0xa4] ss:$16 sps:$4 sm:$0xff]  }
 0x167   :  { %v1460_v41 = vmul.f32 0.0, %v1448_v2  ;;  %8384 = vtanh.f32 %v9812_v10 }
 0x169   :  { %v9817_v47 = vadd.f32 %v1462_v35, %v1460_v41  ;;  %v1457_v35 = vadd.f32 0.5, %v1455_v21  ;;  %v1458_v41 = vadd.f32 0.5, %v1456_v29  ;;  %v9885_v29 = vld [vmem:[%s11673_s5 + $0xa0] ss:$16 sps:$4 sm:$0xff]  }
 0x16a   :  { %v1373_v51 = vpop.f32.mrf.mxu0  ;;  %v1416_v3 = vpop.f32.mrf.mxu1 }
 0x16b   :  { %8386 = vtanh.f32 %v9817_v47  ;;  %v1425_v20 = vadd.f32 %v1373_v51, %v655_v39  ;;  %v1427_v28 = vadd.f32 %v1416_v3, %v768_v57  ;;  %v774_v3 = vadd.f32 %v9794_v24, %v9610_v58  ;;  %v9847_v58 = vld [vmem:[%s11673_s5 + $0xc4] ss:$16 sps:$4 sm:$0xff]   ;;  %v9852_v24 = vld [vmem:[%s11673_s5 + $0xcc] ss:$16 sps:$4 sm:$0xff]  }
 0x16c   :  { %v1375_v36 = vpop.f32.mrf.mxu0  ;;  %v1418_v25 = vpop.f32.mrf.mxu1 }
 0x16d   :  { %v1469_v59 = vmul.f32 0.5, %v1425_v20  ;;  %v1426_v22 = vadd.f32 %v1375_v36, %v657_v12  ;;  %v1428_v12 = vadd.f32 %v1418_v25, %v770_v38  ;;  %v9837_v36 = vld [vmem:[%s11673_s5 + $0xe0] ss:$16 sps:$4 sm:$0xff]  }
 0x16e   :  { %v1377_v60 = vpop.f32.mrf.mxu0  ;;  %v1420_v52 = vpop.f32.mrf.mxu1 }
 0x16f   :  { %8388 = vtanh.f32 %v1469_v59  ;;  %v1477_v11 = vmul.f32 0.5, %v1426_v22  ;;  %v1429_v56 = vadd.f32 %v1377_v60, %v659_v42  ;;  %v1431_v2 = vadd.f32 %v1420_v52, %v772_v48 }
 0x170   :  { %v1379_v30 = vpop.f32.mrf.mxu0  ;;  %v1422_v39 = vpop.f32.mrf.mxu1  ;;  %v1487_v57 = vmul.f32 0.5, %v1428_v12  ;;  %v9916_v12 = vld [vmem:[%s11673_s5 + $0x88] ss:$16 sps:$4 sm:$0xff]  }
 0x171   :  { %8390 = vtanh.f32 %v1477_v11  ;;  %v1470_v31 = vmul.f32 0.5, %v1429_v56  ;;  %v1430_v61 = vadd.f32 %v1379_v30, %v661_v53  ;;  %v1432_v20 = vadd.f32 %v1422_v39, %v774_v3  ;;  %v9864_v53 = vld [vmem:[%s11673_s5 + $0xc8] ss:$16 sps:$4 sm:$0xff]   ;;  %v9902_v39 = vld [vmem:[%s11673_s5 + $0x8c] ss:$16 sps:$4 sm:$0xff]  }
 0x173   :  { %8392 = vtanh.f32 %v1470_v31  ;;  %v1478_v40 = vmul.f32 0.5, %v1430_v61  ;;  %v1488_v60 = vmul.f32 0.5, %v1432_v20  ;;  %v11860_v31 = vmov 0  }
 0x174   :  { %8394 = vtanh.f32 %v1427_v28  ;;  %v8385_v1 = vpop.eup %8384  ;;  %v9876_v28 = vld [vmem:[%s11673_s5 + $0xac] ss:$16 sps:$4 sm:$0xff]  }
 0x175   :  { %8396 = vtanh.f32 %v1478_v40  ;;  %v1467_v55 = vmul.f32 %v8385_v1, %v1457_v35  ;;  %v9890_v40 = vld [vmem:[%s11673_s5 + $0xa8] ss:$16 sps:$4 sm:$0xff]  }
 0x176   :  { %8398 = vtanh.f32 %v1431_v2  ;;  %v9895_v2 = vld [vmem:[%s11673_s5 + $0x84] ss:$16 sps:$4 sm:$0xff]  }
 0x177   :  { %8400 = vtanh.f32 %v1487_v57 }
 0x178   :  { %v8387_v51 = vpop.eup %8386  ;;  %8402 = vtanh.f32 %v1488_v60  ;;  %v9943_v60 = vld [vmem:[%s11673_s5 + $0x68] ss:$16 sps:$4 sm:$0xff]  }
 0x179   :  { %v1468_v27 = vmul.f32 %v8387_v51, %v1458_v41 }
 0x17b   :  { %v1505_v42 = vpack.c.bf16 %v1468_v27, %v1467_v55  ;;  %v9911_v27 = vld [vmem:[%s11673_s5 + $0x80] ss:$16 sps:$4 sm:$0xff]  }
 0x17c   :  { %v8389_v59 = vpop.eup %8388 }
 0x17d   :  { %v1473_v22 = vmul.f32 0.5, %v8389_v59  ;;  %7651 = vst [vmem:[#allocation4] sm:$0xff] %v1505_v42   ;;  %1762 = vmatmul.mubr.bf16.vlgmr.msra.gmra.mxu0 %v1505_v42  ;;  %1805 = vmatmul.mubr.bf16.vlgmr.msra.gmra.mxu1 %v1505_v42  ;;  %v9923_v59 = vld [vmem:[%s11673_s5 + $0x64] ss:$16 sps:$4 sm:$0xff]  }
 0x17e   :  { %v8391_v25 = vpop.eup %8390  ;;  %2027 = vmatpush1.bf16.msra.mxu0 %v9837_v36  ;;  %2070 = vmatpush1.bf16.msra.mxu1 %v9842_v13 }
 0x17f   :  { %v1475_v11 = vadd.f32 0.5, %v1473_v22  ;;  %v1481_v56 = vmul.f32 0.5, %v8391_v25  ;;  %2028 = vmatprep.subr.bf16.mxu0 %v9847_v58  ;;  %2071 = vmatprep.subr.bf16.mxu1 %v9852_v24  ;;  %v9928_v22 = vld [vmem:[%s11673_s5 + $0x6c] ss:$16 sps:$4 sm:$0xff]   ;;  %v9938_v25 = vld [vmem:[%s11673_s5 + $0x60] ss:$16 sps:$4 sm:$0xff]  }
 0x180   :  { %v8393_v30 = vpop.eup %8392  ;;  %2058 = vmatprep.mubr.bf16.mxu0 %v11860_v31  ;;  %2101 = vmatprep.mubr.bf16.mxu1 %v11860_v31 }
 0x181   :  { %v8395_v61 = vpop.eup %8394  ;;  %v1483_v48 = vadd.f32 0.5, %v1481_v56  ;;  %v1474_v52 = vmul.f32 0.5, %v8393_v30  ;;  %v9956_v56 = vld [vmem:[%s11673_s5 + $0x4c] ss:$16 sps:$4 sm:$0xff]  }
 0x182   :  { %v8397_v21 = vpop.eup %8396  ;;  %2029 = vmatpush1.bf16.msra.mxu0 %v9859_v54  ;;  %2072 = vmatpush1.bf16.msra.mxu1 %v9864_v53  ;;  %v1497_v38 = vmul.f32 %v8395_v61, %v1475_v11  ;;  %v9951_v11 = vld [vmem:[%s11673_s5 + $0x44] ss:$16 sps:$4 sm:$0xff]   ;;  %v9963_v61 = vld [vmem:[%s11673_s5 + $0x40] ss:$16 sps:$4 sm:$0xff]  }
 0x183   :  { %v1495_v1 = vmul.f32 0.0, %v1483_v48  ;;  %v1476_v35 = vadd.f32 0.5, %v1474_v52  ;;  %v1482_v41 = vmul.f32 0.5, %v8397_v21  ;;  %2030 = vmatprep.subr.bf16.mxu0 %v9871_v62  ;;  %2073 = vmatprep.subr.bf16.mxu1 %v9876_v28  ;;  %v8399_v55 = vpop.eup %8398  ;;  %11861 = vst [vmem:[#allocation128_spill] sm:$0xff] %v9963_v61  ;;  %v9968_v48 = vld [vmem:[%s11673_s5 + $0x48] ss:$16 sps:$4 sm:$0xff]  }
 0x184   :  { %v8401_v30 = vpop.eup %8400  ;;  %11862 = vst [vmem:[#allocation129_spill] sm:$0xff] %v9968_v48  ;;  %v9975_v21 = vld [vmem:[%s11673_s5 + $0x24] ss:$16 sps:$4 sm:$0xff]  }
 0x185   :  { %v9904_v51 = vadd.f32 %v1497_v38, %v1495_v1  ;;  %v1484_v3 = vadd.f32 0.5, %v1482_v41  ;;  %v1498_v42 = vmul.f32 %v8399_v55, %v1476_v35  ;;  %v8403_v52 = vpop.eup %8402  ;;  %11863 = vst [vmem:[#allocation130_spill] sm:$0xff] %v9975_v21  ;;  %v9980_v1 = vld [vmem:[%s11673_s5 + $0x2c] ss:$16 sps:$4 sm:$0xff]   ;;  %v9987_v38 = vld [vmem:[%s11673_s5 + $0x20] ss:$16 sps:$4 sm:$0xff]  }
 0x186   :  { %2031 = vmatpush1.bf16.msra.mxu0 %v9885_v29  ;;  %2074 = vmatpush1.bf16.msra.mxu1 %v9890_v40  ;;  %11864 = vst [vmem:[#allocation131_spill] sm:$0xff] %v9980_v1  ;;  %11865 = vst [vmem:[#allocation132_spill] sm:$0xff] %v9987_v38  ;;  %v9992_v35 = vld [vmem:[%s11673_s5 + $0x28] ss:$16 sps:$4 sm:$0xff]   ;;  %v1491_v41 = vmul.f32 0.5, %v8401_v30 }
 0x187   :  { %v1496_v20 = vmul.f32 0.0, %v1484_v3  ;;  %2032 = vmatprep.subr.bf16.mxu0 %v9895_v2  ;;  %2075 = vmatprep.subr.bf16.mxu1 %v9902_v39  ;;  %8404 = vtanh.f32 %v9904_v51  ;;  %11866 = vst [vmem:[#allocation133_spill] sm:$0xff] %v9992_v35  ;;  %v1492_v3 = vmul.f32 0.5, %v8403_v52  ;;  %v9999_v55 = vld [vmem:[%s11673_s5 + $0x4] ss:$16 sps:$4 sm:$0xff]  }
 0x188   :  { %v10011_v30 = vld [vmem:[%s11673_s5] ss:$16 sps:$4 sm:$0xff]   ;;  %v10016_v52 = vld [vmem:[%s11673_s5 + $0x8] ss:$16 sps:$4 sm:$0xff]  }
 0x189   :  { %v9931_v57 = vadd.f32 %v1498_v42, %v1496_v20  ;;  %v10004_v20 = vld [vmem:[%s11673_s5 + $0xc] ss:$16 sps:$4 sm:$0xff]  }
 0x18a   :  { %2033 = vmatpush1.bf16.msra.mxu0 %v9911_v27  ;;  %2076 = vmatpush1.bf16.msra.mxu1 %v9916_v12 }
 0x18b   :  { %8406 = vtanh.f32 %v9931_v57  ;;  %2034 = vmatprep.subr.bf16.mxu0 %v9923_v59  ;;  %2077 = vmatprep.subr.bf16.mxu1 %v9928_v22 }
 0x18e   :  { %2035 = vmatpush1.bf16.msra.mxu0 %v9938_v25  ;;  %2078 = vmatpush1.bf16.msra.mxu1 %v9943_v60 }
 0x18f   :  { %2036 = vmatprep.subr.bf16.mxu0 %v9951_v11  ;;  %2079 = vmatprep.subr.bf16.mxu1 %v9956_v56 }
 0x192   :  { %2037 = vmatpush1.bf16.msra.mxu0 %v9963_v61  ;;  %2080 = vmatpush1.bf16.msra.mxu1 %v9968_v48 }
 0x193   :  { %2038 = vmatprep.subr.bf16.mxu0 %v9975_v21  ;;  %2081 = vmatprep.subr.bf16.mxu1 %v9980_v1  ;;  %v1493_v1 = vadd.f32 0.5, %v1491_v41  ;;  %v1494_v21 = vadd.f32 0.5, %v1492_v3  ;;  %v11882_v3 = vld [vmem:[#allocation11_spill] sm:$0xff] }
 0x194   :  { %v8405_v42 = vpop.eup %8404 }
 0x196   :  { %2039 = vmatpush1.bf16.msra.mxu0 %v9987_v38  ;;  %2082 = vmatpush1.bf16.msra.mxu1 %v9992_v35  ;;  %v1503_v38 = vmul.f32 %v8405_v42, %v1493_v1 }
 0x197   :  { %2040 = vmatprep.subr.bf16.mxu0 %v9999_v55  ;;  %2083 = vmatprep.subr.bf16.mxu1 %v10004_v20 }
 0x198   :  { %v8407_v48 = vpop.eup %8406 }
 0x199   :  { %v1504_v61 = vmul.f32 %v8407_v48, %v1494_v21  ;;  %v11881_v48 = vld [vmem:[#allocation10_spill] sm:$0xff] }
 0x19a   :  { %2041 = vmatpush1.bf16.msra.mxu0 %v10011_v30  ;;  %2084 = vmatpush1.bf16.msra.mxu1 %v10016_v52 }
 0x19b   :  { %v1506_v35 = vpack.c.bf16 %v1504_v61, %v1503_v38  ;;  %2417 = vmatprep.subr.bf16.mxu0 %v9272_v4  ;;  %2460 = vmatprep.subr.bf16.mxu1 %v9277_v5  ;;  %v11867_v4 = vld [vmem:[#allocation42_spill] sm:$0xff]  ;;  %v11868_v5 = vld [vmem:[#allocation43_spill] sm:$0xff] }
 0x19d   :  { %7656 = vst [vmem:[#allocation5 + $0x38] sm:$0xff] %v1506_v35   ;;  %2059 = vmatmul.mubr.bf16.vlgmr.msra.gmra.mxu0 %v1506_v35  ;;  %2102 = vmatmul.mubr.bf16.vlgmr.msra.gmra.mxu1 %v1506_v35 }
 0x19e   :  { %2418 = vmatpush1.bf16.msra.mxu0 %v9282_v8  ;;  %2461 = vmatpush1.bf16.msra.mxu1 %v9287_v9  ;;  %v11869_v8 = vld [vmem:[#allocation46_spill] sm:$0xff]  ;;  %v11870_v9 = vld [vmem:[#allocation47_spill] sm:$0xff] }
 0x19f   :  { %2419 = vmatprep.subr.bf16.mxu0 %v9306_v14  ;;  %2462 = vmatprep.subr.bf16.mxu1 %v9311_v15  ;;  %v11871_v14 = vld [vmem:[#allocation50_spill] sm:$0xff]  ;;  %v11872_v15 = vld [vmem:[#allocation51_spill] sm:$0xff] }
 0x1a0   :  { %2449 = vmatprep.mubr.bf16.mxu0 %v11860_v31  ;;  %2492 = vmatprep.mubr.bf16.mxu1 %v11860_v31 }
 0x1a2   :  { %2420 = vmatpush1.bf16.msra.mxu0 %v9316_v18  ;;  %2463 = vmatpush1.bf16.msra.mxu1 %v9321_v19  ;;  %v11873_v18 = vld [vmem:[#allocation54_spill] sm:$0xff]  ;;  %v11874_v19 = vld [vmem:[#allocation55_spill] sm:$0xff] }
 0x1a3   :  { %2421 = vmatprep.subr.bf16.mxu0 %v9342_v26  ;;  %2464 = vmatprep.subr.bf16.mxu1 %v9347_v34  ;;  %v11875_v26 = vld [vmem:[#allocation58_spill] sm:$0xff] }
 0x1a6   :  { %2422 = vmatpush1.bf16.msra.mxu0 %v9352_v49  ;;  %2465 = vmatpush1.bf16.msra.mxu1 %v9357_v50  ;;  %v11877_v50 = vld [vmem:[#allocation6_spill] sm:$0xff] }
 0x1a7   :  { %2423 = vmatprep.subr.bf16.mxu0 %v9376_v63  ;;  %2466 = vmatprep.subr.bf16.mxu1 %v9381_v0 }
 0x1aa   :  { %2424 = vmatpush1.bf16.msra.mxu0 %v9386_v16  ;;  %2467 = vmatpush1.bf16.msra.mxu1 %v9391_v17 }
 0x1ab   :  { %2425 = vmatprep.subr.bf16.mxu0 %v9412_v6  ;;  %2468 = vmatprep.subr.bf16.mxu1 %v9417_v7  ;;  %v11879_v7 = vld [vmem:[#allocation7_spill] sm:$0xff] }
 0x1ae   :  { %2426 = vmatpush1.bf16.msra.mxu0 %v9422_v43  ;;  %2469 = vmatpush1.bf16.msra.mxu1 %v9427_v44 }
 0x1af   :  { %2427 = vmatprep.subr.bf16.mxu0 %v9446_v37  ;;  %2470 = vmatprep.subr.bf16.mxu1 %v9451_v33  ;;  %v11880_v37 = vld [vmem:[#allocation12_spill] sm:$0xff] }
 0x1b0   :  { %v238_v33 = vadd.f32 %v11880_v37, %v9229_v45 }
 0x1b2   :  { %2428 = vmatpush1.bf16.msra.mxu0 %v9462_v32  ;;  %2471 = vmatpush1.bf16.msra.mxu1 %v9467_v23  ;;  %v11876_v32 = vld [vmem:[#allocation59_spill] sm:$0xff]  ;;  %v11878_v23 = vld [vmem:[#allocation8_spill] sm:$0xff] }
 0x1b3   :  { %2429 = vmatprep.subr.bf16.mxu0 %v11867_v4  ;;  %2472 = vmatprep.subr.bf16.mxu1 %v11868_v5 }
 0x1b6   :  { %2430 = vmatpush1.bf16.msra.mxu0 %v11869_v8  ;;  %2473 = vmatpush1.bf16.msra.mxu1 %v11870_v9  ;;  %v11883_v8 = vld [vmem:[#allocation13_spill] sm:$0xff] }
 0x1b7   :  { %2431 = vmatprep.subr.bf16.mxu0 %v11871_v14  ;;  %2474 = vmatprep.subr.bf16.mxu1 %v11872_v15  ;;  %v351_v9 = vadd.f32 %v11883_v8, %v9233_v46  ;;  %v11884_v14 = vld [vmem:[#allocation9_spill] sm:$0xff]  ;;  %v11886_v8 = vld [vmem:[#allocation122_spill] sm:$0xff] }
 0x1ba   :  { %2432 = vmatpush1.bf16.msra.mxu0 %v11873_v18  ;;  %2475 = vmatpush1.bf16.msra.mxu1 %v11874_v19 }
 0x1bb   :  { %2714 = vmatprep.subr.bf16.mxu0 %v11875_v26  ;;  %2757 = vmatprep.subr.bf16.mxu1 %v11876_v32 }
 0x23d   :  { %v1763_v34 = vpop.f32.mrf.mxu0  ;;  %v1806_v49 = vpop.f32.mrf.mxu1 }
 0x23e   :  { %v1815_v63 = vadd.f32 %v1763_v34, %v11877_v50  ;;  %v1817_v43 = vadd.f32 %v1806_v49, %v11879_v7 }
 0x23f   :  { %v1765_v0 = vpop.f32.mrf.mxu0  ;;  %v1808_v16 = vpop.f32.mrf.mxu1 }
 0x240   :  { %v2120_v17 = vmul.f32 0.5, %v1815_v63  ;;  %v1816_v6 = vadd.f32 %v1765_v0, %v11878_v23  ;;  %v1818_v15 = vadd.f32 %v1808_v16, %v11884_v14  ;;  %v11887_v14 = vld [vmem:[#allocation121_spill] sm:$0xff] }
 0x241   :  { %v1767_v44 = vpop.f32.mrf.mxu0  ;;  %v1810_v1 = vpop.f32.mrf.mxu1 }
 0x242   :  { %8408 = vtanh.f32 %v2120_v17  ;;  %v2128_v61 = vmul.f32 0.5, %v1816_v6  ;;  %v1819_v21 = vadd.f32 %v1767_v44, %v11881_v48  ;;  %v1821_v42 = vadd.f32 %v1810_v1, %v11882_v3  ;;  %v11885_v3 = vld [vmem:[#allocation120_spill] sm:$0xff] }
 0x243   :  { %v1769_v38 = vpop.f32.mrf.mxu0  ;;  %v1812_v5 = vpop.f32.mrf.mxu1  ;;  %v2138_v34 = vmul.f32 0.5, %v1818_v15 }
 0x244   :  { %8410 = vtanh.f32 %v2128_v61  ;;  %v2121_v35 = vmul.f32 0.5, %v1819_v21  ;;  %v1820_v41 = vadd.f32 %v1769_v38, %v238_v33  ;;  %v1822_v18 = vadd.f32 %v1812_v5, %v351_v9 }
 0x245   :  { %8412 = vtanh.f32 %v1817_v43 }
 0x246   :  { %8414 = vtanh.f32 %v2121_v35  ;;  %v2129_v4 = vmul.f32 0.5, %v1820_v41  ;;  %v2139_v0 = vmul.f32 0.5, %v1822_v18 }
 0x248   :  { %8416 = vtanh.f32 %v2129_v4 }
 0x249   :  { %8418 = vtanh.f32 %v1821_v42 }
 0x24a   :  { %8420 = vtanh.f32 %v2138_v34 }
 0x24b   :  { %8422 = vtanh.f32 %v2139_v0  ;;  %v11889_v0 = vld [vmem:[#allocation126_spill] sm:$0xff] }
 0x24f   :  { %v8409_v19 = vpop.eup %8408 }
 0x250   :  { %v2124_v26 = vmul.f32 0.5, %v8409_v19 }
 0x251   :  { %v8411_v32 = vpop.eup %8410 }
 0x252   :  { %v8413_v49 = vpop.eup %8412  ;;  %v2126_v50 = vadd.f32 0.5, %v2124_v26  ;;  %v2132_v63 = vmul.f32 0.5, %v8411_v32  ;;  %v11888_v26 = vld [vmem:[#allocation124_spill] sm:$0xff] }
 0x253   :  { %v8415_v17 = vpop.eup %8414 }
 0x254   :  { %v2134_v23 = vadd.f32 0.5, %v2132_v63  ;;  %v2148_v6 = vmul.f32 %v8413_v49, %v2126_v50  ;;  %v2125_v7 = vmul.f32 0.5, %v8415_v17 }
 0x255   :  { %v8417_v43 = vpop.eup %8416 }
 0x256   :  { %v2146_v44 = vmul.f32 %v2134_v23, %v9812_v10  ;;  %v2127_v37 = vadd.f32 0.5, %v2125_v7  ;;  %v2133_v33 = vmul.f32 0.5, %v8417_v43  ;;  %v8419_v16 = vpop.eup %8418  ;;  %v11890_v7 = vld [vmem:[#allocation125_spill] sm:$0xff] }
 0x257   :  { %v8421_v19 = vpop.eup %8420 }
 0x258   :  { %v10069_v61 = vadd.f32 %v2148_v6, %v2146_v44  ;;  %v2135_v48 = vadd.f32 0.5, %v2133_v33  ;;  %v2149_v21 = vmul.f32 %v8419_v16, %v2127_v37  ;;  %v8423_v34 = vpop.eup %8422  ;;  %v2142_v23 = vmul.f32 0.5, %v8421_v19 }
 0x259   :  { %v2143_v6 = vmul.f32 0.5, %v8423_v34 }
 0x25a   :  { %v2147_v1 = vmul.f32 %v2135_v48, %v9817_v47  ;;  %8424 = vtanh.f32 %v10069_v61  ;;  %v2144_v33 = vadd.f32 0.5, %v2142_v23 }
 0x25b   :  { %v2145_v16 = vadd.f32 0.5, %v2143_v6  ;;  %v10153_v6 = vld [vmem:[%s11672_s2 + $0xc4] ss:$16 sps:$4 sm:$0xff]  }
 0x25c   :  { %v10073_v38 = vadd.f32 %v2149_v21, %v2147_v1 }
 0x25d   :  { %v2060_v35 = vpop.f32.mrf.mxu0  ;;  %v2103_v41 = vpop.f32.mrf.mxu1 }
 0x25e   :  { %8426 = vtanh.f32 %v10073_v38  ;;  %v2112_v10 = vadd.f32 %v2060_v35, %v11885_v3  ;;  %v2114_v15 = vadd.f32 %v2103_v41, %v11887_v14  ;;  %v11891_v41 = vld [vmem:[#allocation123_spill] sm:$0xff] }
 0x25f   :  { %v2062_v42 = vpop.f32.mrf.mxu0  ;;  %v2105_v4 = vpop.f32.mrf.mxu1 }
 0x260   :  { %v2156_v5 = vmul.f32 0.5, %v2112_v10  ;;  %v2113_v9 = vadd.f32 %v2062_v42, %v11886_v8  ;;  %v2115_v3 = vadd.f32 %v2105_v4, %v11891_v41  ;;  %v11892_v10 = vld [vmem:[#allocation127_spill] sm:$0xff] }
 0x261   :  { %v2064_v18 = vpop.f32.mrf.mxu0  ;;  %v2107_v49 = vpop.f32.mrf.mxu1  ;;  %v10216_v41 = vld [vmem:[%s11672_s2 + $0x88] ss:$16 sps:$4 sm:$0xff]  }
 0x262   :  { %8428 = vtanh.f32 %v2156_v5  ;;  %v2164_v47 = vmul.f32 0.5, %v2113_v9  ;;  %v2116_v32 = vadd.f32 %v2064_v18, %v11888_v26  ;;  %v2118_v43 = vadd.f32 %v2107_v49, %v11890_v7  ;;  %v10158_v7 = vld [vmem:[%s11672_s2 + $0xcc] ss:$16 sps:$4 sm:$0xff]  }
 0x263   :  { %v2066_v50 = vpop.f32.mrf.mxu0  ;;  %v2109_v21 = vpop.f32.mrf.mxu1 }
 0x264   :  { %8430 = vtanh.f32 %v2164_v47  ;;  %v2157_v63 = vmul.f32 0.5, %v2116_v32  ;;  %v2117_v17 = vadd.f32 %v2066_v50, %v11889_v0  ;;  %v2119_v42 = vadd.f32 %v2109_v21, %v11892_v10  ;;  %v10201_v21 = vld [vmem:[%s11672_s2 + $0x84] ss:$16 sps:$4 sm:$0xff]   ;;  %v10230_v10 = vld [vmem:[%s11672_s2 + $0x6c] ss:$16 sps:$4 sm:$0xff]  }
 0x265   :  { %8432 = vtanh.f32 %v2114_v15  ;;  %v2174_v15 = vmul.f32 0.5, %v2115_v3  ;;  %v10225_v3 = vld [vmem:[%s11672_s2 + $0x64] ss:$16 sps:$4 sm:$0xff]  }
 0x266   :  { %8434 = vtanh.f32 %v2157_v63  ;;  %v2165_v44 = vmul.f32 0.5, %v2117_v17  ;;  %v2175_v26 = vmul.f32 0.5, %v2119_v42  ;;  %v10235_v42 = vld [vmem:[%s11672_s2 + $0x60] ss:$16 sps:$4 sm:$0xff]  }
 0x267   :  { %v8425_v37 = vpop.eup %8424 }
 0x268   :  { %8436 = vtanh.f32 %v2165_v44  ;;  %v2154_v1 = vmul.f32 %v8425_v37, %v2144_v33  ;;  %v10168_v44 = vld [vmem:[%s11672_s2 + $0xc8] ss:$16 sps:$4 sm:$0xff]   ;;  %v10177_v37 = vld [vmem:[%s11672_s2 + $0xa4] ss:$16 sps:$4 sm:$0xff]   ;;  %v10182_v33 = vld [vmem:[%s11672_s2 + $0xac] ss:$16 sps:$4 sm:$0xff]  }
 0x269   :  { %8438 = vtanh.f32 %v2118_v43  ;;  %v10163_v43 = vld [vmem:[%s11672_s2 + $0xc0] ss:$16 sps:$4 sm:$0xff]  }
 0x26a   :  { %8440 = vtanh.f32 %v2174_v15  ;;  %v10264_v15 = vld [vmem:[%s11672_s2 + $0x48] ss:$16 sps:$4 sm:$0xff]  }
 0x26b   :  { %v8427_v48 = vpop.eup %8426  ;;  %8442 = vtanh.f32 %v2175_v26  ;;  %v10288_v26 = vld [vmem:[%s11672_s2 + $0x28] ss:$16 sps:$4 sm:$0xff]  }
 0x26c   :  { %v2155_v35 = vmul.f32 %v8427_v48, %v2145_v16  ;;  %v10187_v16 = vld [vmem:[%s11672_s2 + $0xa0] ss:$16 sps:$4 sm:$0xff]   ;;  %v10192_v48 = vld [vmem:[%s11672_s2 + $0xa8] ss:$16 sps:$4 sm:$0xff]  }
 0x26e   :  { %v2192_v5 = vpack.c.bf16 %v2155_v35, %v2154_v1  ;;  %v10206_v1 = vld [vmem:[%s11672_s2 + $0x8c] ss:$16 sps:$4 sm:$0xff]   ;;  %v10211_v35 = vld [vmem:[%s11672_s2 + $0x80] ss:$16 sps:$4 sm:$0xff]  }
 0x26f   :  { %v8429_v8 = vpop.eup %8428 }
 0x270   :  { %v2160_v9 = vmul.f32 0.5, %v8429_v8  ;;  %7661 = vst [vmem:[#allocation4 + $0x8] sm:$0xff] %v2192_v5   ;;  %2450 = vmatmul.mubr.bf16.vlgmr.msra.gmra.mxu0 %v2192_v5  ;;  %2493 = vmatmul.mubr.bf16.vlgmr.msra.gmra.mxu1 %v2192_v5  ;;  %v10240_v5 = vld [vmem:[%s11672_s2 + $0x68] ss:$16 sps:$4 sm:$0xff]   ;;  %v10249_v8 = vld [vmem:[%s11672_s2 + $0x44] ss:$16 sps:$4 sm:$0xff]  }
 0x271   :  { %v8431_v14 = vpop.eup %8430  ;;  %2715 = vmatpush1.bf16.msra.mxu0 %v9837_v36  ;;  %2758 = vmatpush1.bf16.msra.mxu1 %v9842_v13 }
 0x272   :  { %v8433_v18 = vpop.eup %8432  ;;  %v2162_v19 = vadd.f32 0.5, %v2160_v9  ;;  %v2168_v47 = vmul.f32 0.5, %v8431_v14  ;;  %2716 = vmatprep.subr.bf16.mxu0 %v9847_v58  ;;  %2759 = vmatprep.subr.bf16.mxu1 %v9852_v24  ;;  %v10254_v9 = vld [vmem:[%s11672_s2 + $0x4c] ss:$16 sps:$4 sm:$0xff]   ;;  %v10259_v14 = vld [vmem:[%s11672_s2 + $0x40] ss:$16 sps:$4 sm:$0xff]  }
 0x273   :  { %v8435_v4 = vpop.eup %8434  ;;  %2746 = vmatprep.mubr.bf16.mxu0 %v11860_v31  ;;  %2789 = vmatprep.mubr.bf16.mxu1 %v11860_v31 }
 0x274   :  { %v2170_v32 = vadd.f32 0.5, %v2168_v47  ;;  %v2184_v34 = vmul.f32 %v8433_v18, %v2162_v19  ;;  %v2161_v49 = vmul.f32 0.5, %v8435_v4  ;;  %v10273_v18 = vld [vmem:[%s11672_s2 + $0x24] ss:$16 sps:$4 sm:$0xff]   ;;  %v10278_v19 = vld [vmem:[%s11672_s2 + $0x2c] ss:$16 sps:$4 sm:$0xff]  }
 0x275   :  { %v8437_v50 = vpop.eup %8436  ;;  %2717 = vmatpush1.bf16.msra.mxu0 %v9859_v54  ;;  %2760 = vmatpush1.bf16.msra.mxu1 %v9864_v53  ;;  %v10283_v47 = vld [vmem:[%s11672_s2 + $0x20] ss:$16 sps:$4 sm:$0xff]   ;;  %v10297_v4 = vld [vmem:[%s11672_s2 + $0x4] ss:$16 sps:$4 sm:$0xff]  }
 0x276   :  { %v2182_v36 = vmul.f32 %v2170_v32, %v9904_v51  ;;  %v2163_v13 = vadd.f32 0.5, %v2161_v49  ;;  %v2169_v58 = vmul.f32 0.5, %v8437_v50  ;;  %2718 = vmatprep.subr.bf16.mxu0 %v9871_v62  ;;  %2761 = vmatprep.subr.bf16.mxu1 %v9876_v28  ;;  %v8439_v24 = vpop.eup %8438  ;;  %v11895_v51 = vld [vmem:[#allocation130_spill] sm:$0xff]  ;;  %v10302_v32 = vld [vmem:[%s11672_s2 + $0xc] ss:$16 sps:$4 sm:$0xff]  }
 0x277   :  { %v8441_v62 = vpop.eup %8440  ;;  %v10312_v49 = vld [vmem:[%s11672_s2 + $0x8] ss:$16 sps:$4 sm:$0xff]   ;;  %v10321_v50 = vld [vmem:[%s11673_s5 + $0xe4] ss:$16 sps:$4 sm:$0xff]  }
 0x278   :  { %v10095_v63 = vadd.f32 %v2184_v34, %v2182_v36  ;;  %v2171_v0 = vadd.f32 0.5, %v2169_v58  ;;  %v2185_v17 = vmul.f32 %v8439_v24, %v2163_v13  ;;  %v8443_v28 = vpop.eup %8442  ;;  %v10307_v34 = vld [vmem:[%s11672_s2] ss:$16 sps:$4 sm:$0xff]   ;;  %v10326_v36 = vld [vmem:[%s11673_s5 + $0xec] ss:$16 sps:$4 sm:$0xff]  }
 0x279   :  { %2719 = vmatpush1.bf16.msra.mxu0 %v9885_v29  ;;  %2762 = vmatpush1.bf16.msra.mxu1 %v9890_v40  ;;  %v11893_v29 = vld [vmem:[#allocation128_spill] sm:$0xff]  ;;  %v11894_v40 = vld [vmem:[#allocation129_spill] sm:$0xff]  ;;  %v11899_v24 = vld [vmem:[#allocation14_spill] sm:$0xff] }
 0x27a   :  { %v2183_v54 = vmul.f32 %v2171_v0, %v9931_v57  ;;  %2720 = vmatprep.subr.bf16.mxu0 %v9895_v2  ;;  %2763 = vmatprep.subr.bf16.mxu1 %v9902_v39  ;;  %8444 = vtanh.f32 %v10095_v63  ;;  %v2178_v2 = vmul.f32 0.5, %v8441_v62  ;;  %v2179_v39 = vmul.f32 0.5, %v8443_v28  ;;  %v11900_v28 = vld [vmem:[#allocation16_spill] sm:$0xff] }
 0x27c   :  { %v10103_v53 = vadd.f32 %v2185_v17, %v2183_v54  ;;  %v2180_v57 = vadd.f32 0.5, %v2178_v2 }
 0x27d   :  { %2721 = vmatpush1.bf16.msra.mxu0 %v9911_v27  ;;  %2764 = vmatpush1.bf16.msra.mxu1 %v9916_v12  ;;  %v11896_v27 = vld [vmem:[#allocation131_spill] sm:$0xff] }
 0x27e   :  { %8446 = vtanh.f32 %v10103_v53  ;;  %2722 = vmatprep.subr.bf16.mxu0 %v9923_v59  ;;  %2765 = vmatprep.subr.bf16.mxu1 %v9928_v22  ;;  %v11897_v59 = vld [vmem:[#allocation132_spill] sm:$0xff]  ;;  %v11898_v22 = vld [vmem:[#allocation133_spill] sm:$0xff] }
 0x281   :  { %2723 = vmatpush1.bf16.msra.mxu0 %v9938_v25  ;;  %2766 = vmatpush1.bf16.msra.mxu1 %v9943_v60  ;;  %v2181_v25 = vadd.f32 0.5, %v2179_v39 }
 0x282   :  { %2724 = vmatprep.subr.bf16.mxu0 %v9951_v11  ;;  %2767 = vmatprep.subr.bf16.mxu1 %v9956_v56 }
 0x285   :  { %2725 = vmatpush1.bf16.msra.mxu0 %v11893_v29  ;;  %2768 = vmatpush1.bf16.msra.mxu1 %v11894_v40  ;;  %v11901_v40 = vld [vmem:[#allocation15_spill] sm:$0xff] }
 0x286   :  { %2726 = vmatprep.subr.bf16.mxu0 %v11895_v51  ;;  %2769 = vmatprep.subr.bf16.mxu1 %v11896_v27  ;;  %v11902_v51 = vld [vmem:[#allocation20_spill] sm:$0xff] }
 0x287   :  { %v8445_v12 = vpop.eup %8444  ;;  %v248_v27 = vadd.f32 %v11902_v51, %v9229_v45 }
 0x288   :  { %v2190_v11 = vmul.f32 %v8445_v12, %v2180_v57 }
 0x289   :  { %2727 = vmatpush1.bf16.msra.mxu0 %v11897_v59  ;;  %2770 = vmatpush1.bf16.msra.mxu1 %v11898_v22  ;;  %v11903_v59 = vld [vmem:[#allocation18_spill] sm:$0xff] }
 0x28a   :  { %2728 = vmatprep.subr.bf16.mxu0 %v9999_v55  ;;  %2771 = vmatprep.subr.bf16.mxu1 %v10004_v20  ;;  %v10129_v55 = vld [vmem:[%s11672_s2 + $0xe4] ss:$16 sps:$4 sm:$0xff]   ;;  %v10134_v20 = vld [vmem:[%s11672_s2 + $0xec] ss:$16 sps:$4 sm:$0xff]  }
 0x28b   :  { %v8447_v60 = vpop.eup %8446 }
 0x28c   :  { %v2191_v56 = vmul.f32 %v8447_v60, %v2181_v25 }
 0x28d   :  { %2729 = vmatpush1.bf16.msra.mxu0 %v10011_v30  ;;  %2772 = vmatpush1.bf16.msra.mxu1 %v10016_v52  ;;  %v10139_v30 = vld [vmem:[%s11672_s2 + $0xe0] ss:$16 sps:$4 sm:$0xff]   ;;  %v10144_v52 = vld [vmem:[%s11672_s2 + $0xe8] ss:$16 sps:$4 sm:$0xff]  }
 0x28e   :  { %v2193_v23 = vpack.c.bf16 %v2191_v56, %v2190_v11  ;;  %3105 = vmatprep.subr.bf16.mxu0 %v10129_v55  ;;  %3148 = vmatprep.subr.bf16.mxu1 %v10134_v20  ;;  %v11904_v56 = vld [vmem:[#allocation19_spill] sm:$0xff] }
 0x290   :  { %7666 = vst [vmem:[#allocation5 + $0x30] sm:$0xff] %v2193_v23   ;;  %2747 = vmatmul.mubr.bf16.vlgmr.msra.gmra.mxu0 %v2193_v23  ;;  %2790 = vmatmul.mubr.bf16.vlgmr.msra.gmra.mxu1 %v2193_v23 }
 0x291   :  { %3137 = vmatprep.mubr.bf16.mxu0 %v11860_v31  ;;  %3180 = vmatprep.mubr.bf16.mxu1 %v11860_v31 }
 0x292   :  { %3106 = vmatpush1.bf16.msra.mxu0 %v10139_v30  ;;  %3149 = vmatpush1.bf16.msra.mxu1 %v10144_v52 }
 0x293   :  { %3107 = vmatprep.subr.bf16.mxu0 %v10153_v6  ;;  %3150 = vmatprep.subr.bf16.mxu1 %v10158_v7 }
 0x296   :  { %3108 = vmatpush1.bf16.msra.mxu0 %v10163_v43  ;;  %3151 = vmatpush1.bf16.msra.mxu1 %v10168_v44 }
 0x297   :  { %3109 = vmatprep.subr.bf16.mxu0 %v10177_v37  ;;  %3152 = vmatprep.subr.bf16.mxu1 %v10182_v33 }
 0x29a   :  { %3110 = vmatpush1.bf16.msra.mxu0 %v10187_v16  ;;  %3153 = vmatpush1.bf16.msra.mxu1 %v10192_v48 }
 0x29b   :  { %3111 = vmatprep.subr.bf16.mxu0 %v10201_v21  ;;  %3154 = vmatprep.subr.bf16.mxu1 %v10206_v1 }
 0x29e   :  { %3112 = vmatpush1.bf16.msra.mxu0 %v10211_v35  ;;  %3155 = vmatpush1.bf16.msra.mxu1 %v10216_v41 }
 0x29f   :  { %3113 = vmatprep.subr.bf16.mxu0 %v10225_v3  ;;  %3156 = vmatprep.subr.bf16.mxu1 %v10230_v10 }
 0x2a2   :  { %3114 = vmatpush1.bf16.msra.mxu0 %v10235_v42  ;;  %3157 = vmatpush1.bf16.msra.mxu1 %v10240_v5 }
 0x2a3   :  { %3115 = vmatprep.subr.bf16.mxu0 %v10249_v8  ;;  %3158 = vmatprep.subr.bf16.mxu1 %v10254_v9 }
 0x2a6   :  { %3116 = vmatpush1.bf16.msra.mxu0 %v10259_v14  ;;  %3159 = vmatpush1.bf16.msra.mxu1 %v10264_v15 }
 0x2a7   :  { %3117 = vmatprep.subr.bf16.mxu0 %v10273_v18  ;;  %3160 = vmatprep.subr.bf16.mxu1 %v10278_v19 }
 0x2aa   :  { %3118 = vmatpush1.bf16.msra.mxu0 %v10283_v47  ;;  %3161 = vmatpush1.bf16.msra.mxu1 %v10288_v26 }
 0x2ab   :  { %3119 = vmatprep.subr.bf16.mxu0 %v10297_v4  ;;  %3162 = vmatprep.subr.bf16.mxu1 %v10302_v32 }
 0x2ae   :  { %3120 = vmatpush1.bf16.msra.mxu0 %v10307_v34  ;;  %3163 = vmatpush1.bf16.msra.mxu1 %v10312_v49 }
 0x2af   :  { %3402 = vmatprep.subr.bf16.mxu0 %v10321_v50  ;;  %3445 = vmatprep.subr.bf16.mxu1 %v10326_v36 }
 0x330   :  { %v2451_v13 = vpop.f32.mrf.mxu0  ;;  %v2494_v58 = vpop.f32.mrf.mxu1 }
 0x331   :  { %v2503_v0 = vadd.f32 %v2451_v13, %v11899_v24  ;;  %v2505_v2 = vadd.f32 %v2494_v58, %v11901_v40  ;;  %v11905_v24 = vld [vmem:[#allocation21_spill] sm:$0xff] }
 0x332   :  { %v2453_v17 = vpop.f32.mrf.mxu0  ;;  %v2496_v54 = vpop.f32.mrf.mxu1 }
 0x333   :  { %v2808_v62 = vmul.f32 0.5, %v2503_v0  ;;  %v2504_v29 = vadd.f32 %v2453_v17, %v11900_v28  ;;  %v361_v0 = vadd.f32 %v11905_v24, %v9233_v46  ;;  %v11906_v17 = vld [vmem:[#allocation17_spill] sm:$0xff] }
 0x334   :  { %v2455_v39 = vpop.f32.mrf.mxu0  ;;  %v2498_v57 = vpop.f32.mrf.mxu1 }
 0x335   :  { %8448 = vtanh.f32 %v2808_v62  ;;  %v2816_v12 = vmul.f32 0.5, %v2504_v29  ;;  %v2507_v22 = vadd.f32 %v2455_v39, %v11903_v59  ;;  %v2509_v23 = vadd.f32 %v2498_v57, %v11904_v56 }
 0x336   :  { %v2457_v25 = vpop.f32.mrf.mxu0  ;;  %v2500_v58 = vpop.f32.mrf.mxu1  ;;  %v2506_v62 = vadd.f32 %v2496_v54, %v11906_v17 }
 0x337   :  { %8450 = vtanh.f32 %v2816_v12  ;;  %v2809_v60 = vmul.f32 0.5, %v2507_v22  ;;  %v2508_v11 = vadd.f32 %v2457_v25, %v248_v27  ;;  %v2510_v28 = vadd.f32 %v2500_v58, %v361_v0 }
 0x338   :  { %8452 = vtanh.f32 %v2505_v2  ;;  %v2826_v51 = vmul.f32 0.5, %v2506_v62 }
 0x339   :  { %8454 = vtanh.f32 %v2809_v60  ;;  %v2817_v13 = vmul.f32 0.5, %v2508_v11  ;;  %v2827_v59 = vmul.f32 0.5, %v2510_v28 }
 0x33b   :  { %8456 = vtanh.f32 %v2817_v13 }
 0x33c   :  { %8458 = vtanh.f32 %v2509_v23 }
 0x33d   :  { %8460 = vtanh.f32 %v2826_v51 }
 0x33e   :  { %8462 = vtanh.f32 %v2827_v59  ;;  %v11909_v59 = vld [vmem:[#allocation113_spill] sm:$0xff] }
 0x342   :  { %v8449_v29 = vpop.eup %8448 }
 0x343   :  { %v2812_v40 = vmul.f32 0.5, %v8449_v29 }
 0x344   :  { %v8451_v39 = vpop.eup %8450 }
 0x345   :  { %v8453_v12 = vpop.eup %8452  ;;  %v2814_v27 = vadd.f32 0.5, %v2812_v40  ;;  %v2820_v2 = vmul.f32 0.5, %v8451_v39  ;;  %v11907_v40 = vld [vmem:[#allocation112_spill] sm:$0xff] }
 0x346   :  { %v8455_v22 = vpop.eup %8454 }
 0x347   :  { %v2822_v57 = vadd.f32 0.5, %v2820_v2  ;;  %v2836_v25 = vmul.f32 %v8453_v12, %v2814_v27  ;;  %v2813_v60 = vmul.f32 0.5, %v8455_v22  ;;  %v11908_v27 = vld [vmem:[#allocation114_spill] sm:$0xff] }
 0x348   :  { %v8457_v11 = vpop.eup %8456 }
 0x349   :  { %v2834_v56 = vmul.f32 %v2822_v57, %v10069_v61  ;;  %v2815_v23 = vadd.f32 0.5, %v2813_v60  ;;  %v2821_v13 = vmul.f32 0.5, %v8457_v11  ;;  %v8459_v54 = vpop.eup %8458  ;;  %v11910_v60 = vld [vmem:[#allocation116_spill] sm:$0xff] }
 0x34b   :  { %v10341_v58 = vadd.f32 %v2836_v25, %v2834_v56  ;;  %v2823_v24 = vadd.f32 0.5, %v2821_v13  ;;  %v2837_v0 = vmul.f32 %v8459_v54, %v2815_v23  ;;  %v8461_v25 = vpop.eup %8460 }
 0x34c   :  { %v8463_v56 = vpop.eup %8462 }
 0x34d   :  { %v2835_v17 = vmul.f32 %v2823_v24, %v10073_v38  ;;  %8464 = vtanh.f32 %v10341_v58  ;;  %v11911_v24 = vld [vmem:[#allocation118_spill] sm:$0xff] }
 0x34f   :  { %v10345_v62 = vadd.f32 %v2837_v0, %v2835_v17  ;;  %v2830_v17 = vmul.f32 0.5, %v8461_v25  ;;  %v10363_v25 = vld [vmem:[%s11673_s5 + $0xe8] ss:$16 sps:$4 sm:$0xff]  }
 0x350   :  { %v2748_v28 = vpop.f32.mrf.mxu0  ;;  %v2791_v29 = vpop.f32.mrf.mxu1 }
 0x351   :  { %8466 = vtanh.f32 %v10345_v62  ;;  %v2800_v61 = vadd.f32 %v2748_v28, %v11907_v40  ;;  %v2802_v22 = vadd.f32 %v2791_v29, %v11909_v59  ;;  %v2831_v28 = vmul.f32 0.5, %v8463_v56  ;;  %v11912_v40 = vld [vmem:[#allocation117_spill] sm:$0xff]  ;;  %v11914_v56 = vld [vmem:[#allocation119_spill] sm:$0xff] }
 0x352   :  { %v2750_v39 = vpop.f32.mrf.mxu0  ;;  %v2793_v51 = vpop.f32.mrf.mxu1 }
 0x353   :  { %v2844_v12 = vmul.f32 0.5, %v2800_v61  ;;  %v2801_v2 = vadd.f32 %v2750_v39, %v11908_v27  ;;  %v2833_v27 = vadd.f32 0.5, %v2831_v28 }
 0x354   :  { %v2752_v57 = vpop.f32.mrf.mxu0  ;;  %v2795_v23 = vpop.f32.mrf.mxu1 }
 0x355   :  { %8468 = vtanh.f32 %v2844_v12  ;;  %v2852_v38 = vmul.f32 0.5, %v2801_v2  ;;  %v2804_v11 = vadd.f32 %v2752_v57, %v11910_v60  ;;  %v2806_v61 = vadd.f32 %v2795_v23, %v11912_v40 }
 0x356   :  { %v2754_v13 = vpop.f32.mrf.mxu0  ;;  %v2832_v12 = vadd.f32 0.5, %v2830_v17  ;;  %v2797_v59 = vpop.f32.mrf.mxu1  ;;  %v10379_v17 = vld [vmem:[%s11673_s5 + $0xc0] ss:$16 sps:$4 sm:$0xff]  }
 0x357   :  { %8470 = vtanh.f32 %v2852_v38  ;;  %v2845_v54 = vmul.f32 0.5, %v2804_v11  ;;  %v2805_v0 = vadd.f32 %v2754_v13, %v11911_v24  ;;  %v11913_v38 = vld [vmem:[#allocation115_spill] sm:$0xff]  ;;  %v2807_v23 = vadd.f32 %v2797_v59, %v11914_v56 }
 0x358   :  { %8472 = vtanh.f32 %v2802_v22  ;;  %v2803_v11 = vadd.f32 %v2793_v51, %v11913_v38  ;;  %v10358_v22 = vld [vmem:[%s11673_s5 + $0xe0] ss:$16 sps:$4 sm:$0xff]   ;;  %v10374_v51 = vld [vmem:[%s11673_s5 + $0xcc] ss:$16 sps:$4 sm:$0xff]  }
 0x359   :  { %8474 = vtanh.f32 %v2845_v54  ;;  %v2853_v29 = vmul.f32 0.5, %v2805_v0  ;;  %v10369_v54 = vld [vmem:[%s11673_s5 + $0xc4] ss:$16 sps:$4 sm:$0xff]   ;;  %v10398_v59 = vld [vmem:[%s11673_s5 + $0xac] ss:$16 sps:$4 sm:$0xff]  }
 0x35a   :  { %v8465_v39 = vpop.eup %8464  ;;  %v2862_v40 = vmul.f32 0.5, %v2803_v11 }
 0x35b   :  { %8476 = vtanh.f32 %v2853_v29  ;;  %v2842_v57 = vmul.f32 %v8465_v39, %v2832_v12  ;;  %v10391_v29 = vld [vmem:[%s11673_s5 + $0xa4] ss:$16 sps:$4 sm:$0xff]  }
 0x35c   :  { %8478 = vtanh.f32 %v2806_v61  ;;  %v10386_v61 = vld [vmem:[%s11673_s5 + $0xc8] ss:$16 sps:$4 sm:$0xff]  }
 0x35d   :  { %8480 = vtanh.f32 %v2862_v40  ;;  %v10420_v40 = vld [vmem:[%s11673_s5 + $0x84] ss:$16 sps:$4 sm:$0xff]  }
 0x35e   :  { %v8467_v2 = vpop.eup %8466  ;;  %11915 = vst [vmem:[#allocation42_spill] sm:$0xff] %v10420_v40 }
 0x35f   :  { %v2843_v60 = vmul.f32 %v8467_v2, %v2833_v27  ;;  %v2863_v2 = vmul.f32 0.5, %v2807_v23  ;;  %v10407_v23 = vld [vmem:[%s11673_s5 + $0xa0] ss:$16 sps:$4 sm:$0xff]  }
 0x361   :  { %v2880_v13 = vpack.c.bf16 %v2843_v60, %v2842_v57  ;;  %8482 = vtanh.f32 %v2863_v2  ;;  %v10434_v2 = vld [vmem:[%s11673_s5 + $0x80] ss:$16 sps:$4 sm:$0xff]  }
 0x362   :  { %v8469_v24 = vpop.eup %8468  ;;  %11917 = vst [vmem:[#allocation46_spill] sm:$0xff] %v10434_v2 }
 0x363   :  { %v2848_v0 = vmul.f32 0.5, %v8469_v24  ;;  %7671 = vst [vmem:[#allocation4 + $0x10] sm:$0xff] %v2880_v13   ;;  %3138 = vmatmul.mubr.bf16.vlgmr.msra.gmra.mxu0 %v2880_v13  ;;  %3181 = vmatmul.mubr.bf16.vlgmr.msra.gmra.mxu1 %v2880_v13  ;;  %v10412_v13 = vld [vmem:[%s11673_s5 + $0xa8] ss:$16 sps:$4 sm:$0xff]  }
 0x364   :  { %v8471_v28 = vpop.eup %8470  ;;  %3403 = vmatpush1.bf16.msra.mxu0 %v10358_v22  ;;  %3446 = vmatpush1.bf16.msra.mxu1 %v10363_v25 }
 0x365   :  { %v8473_v39 = vpop.eup %8472  ;;  %v2850_v12 = vadd.f32 0.5, %v2848_v0  ;;  %v2856_v27 = vmul.f32 0.5, %v8471_v28  ;;  %3404 = vmatprep.subr.bf16.mxu0 %v10369_v54  ;;  %3447 = vmatprep.subr.bf16.mxu1 %v10374_v51 }
 0x366   :  { %v8475_v57 = vpop.eup %8474  ;;  %3434 = vmatprep.mubr.bf16.mxu0 %v11860_v31  ;;  %3477 = vmatprep.mubr.bf16.mxu1 %v11860_v31 }
 0x367   :  { %v2858_v60 = vadd.f32 0.5, %v2856_v27  ;;  %v2872_v38 = vmul.f32 %v8473_v39, %v2850_v12  ;;  %v2849_v11 = vmul.f32 0.5, %v8475_v57  ;;  %v10425_v39 = vld [vmem:[%s11673_s5 + $0x8c] ss:$16 sps:$4 sm:$0xff]  }
 0x368   :  { %v8477_v56 = vpop.eup %8476  ;;  %3405 = vmatpush1.bf16.msra.mxu0 %v10379_v17  ;;  %3448 = vmatpush1.bf16.msra.mxu1 %v10386_v61  ;;  %11916 = vst [vmem:[#allocation43_spill] sm:$0xff] %v10425_v39 }
 0x369   :  { %v2870_v24 = vmul.f32 %v2858_v60, %v10095_v63  ;;  %v2851_v0 = vadd.f32 0.5, %v2849_v11  ;;  %v2857_v28 = vmul.f32 0.5, %v8477_v56  ;;  %3406 = vmatprep.subr.bf16.mxu0 %v10391_v29  ;;  %3449 = vmatprep.subr.bf16.mxu1 %v10398_v59  ;;  %v8479_v12 = vpop.eup %8478  ;;  %v10439_v60 = vld [vmem:[%s11673_s5 + $0x88] ss:$16 sps:$4 sm:$0xff]   ;;  %v10452_v56 = vld [vmem:[%s11673_s5 + $0x6c] ss:$16 sps:$4 sm:$0xff]  }
 0x36a   :  { %11918 = vst [vmem:[#allocation47_spill] sm:$0xff] %v10439_v60  ;;  %11920 = vst [vmem:[#allocation51_spill] sm:$0xff] %v10452_v56 }
 0x36b   :  { %v10427_v27 = vadd.f32 %v2872_v38, %v2870_v24  ;;  %v2859_v63 = vadd.f32 0.5, %v2857_v28  ;;  %v2873_v57 = vmul.f32 %v8479_v12, %v2851_v0  ;;  %v10447_v38 = vld [vmem:[%s11673_s5 + $0x64] ss:$16 sps:$4 sm:$0xff]   ;;  %v10467_v0 = vld [vmem:[%s11673_s5 + $0x68] ss:$16 sps:$4 sm:$0xff]  }
 0x36c   :  { %3407 = vmatpush1.bf16.msra.mxu0 %v10407_v23  ;;  %3450 = vmatpush1.bf16.msra.mxu1 %v10412_v13  ;;  %11919 = vst [vmem:[#allocation50_spill] sm:$0xff] %v10447_v38  ;;  %11922 = vst [vmem:[#allocation55_spill] sm:$0xff] %v10467_v0  ;;  %v10475_v28 = vld [vmem:[%s11673_s5 + $0x44] ss:$16 sps:$4 sm:$0xff]   ;;  %v10480_v12 = vld [vmem:[%s11673_s5 + $0x4c] ss:$16 sps:$4 sm:$0xff]  }
 0x36d   :  { %v2871_v11 = vmul.f32 %v2859_v63, %v10103_v53  ;;  %3408 = vmatprep.subr.bf16.mxu0 %v10420_v40  ;;  %3451 = vmatprep.subr.bf16.mxu1 %v10425_v39  ;;  %8484 = vtanh.f32 %v10427_v27  ;;  %v10462_v53 = vld [vmem:[%s11673_s5 + $0x60] ss:$16 sps:$4 sm:$0xff]   ;;  %11923 = vst [vmem:[#allocation58_spill] sm:$0xff] %v10475_v28  ;;  %11924 = vst [vmem:[#allocation59_spill] sm:$0xff] %v10480_v12 }
 0x36e   :  { %11921 = vst [vmem:[#allocation54_spill] sm:$0xff] %v10462_v53  ;;  %v10487_v63 = vld [vmem:[%s11673_s5 + $0x40] ss:$16 sps:$4 sm:$0xff]  }
 0x36f   :  { %v10455_v24 = vadd.f32 %v2873_v57, %v2871_v11  ;;  %11925 = vst [vmem:[#allocation6_spill] sm:$0xff] %v10487_v63  ;;  %v10492_v57 = vld [vmem:[%s11673_s5 + $0x48] ss:$16 sps:$4 sm:$0xff]   ;;  %v8481_v11 = vpop.eup %8480 }
 0x370   :  { %3409 = vmatpush1.bf16.msra.mxu0 %v10434_v2  ;;  %3452 = vmatpush1.bf16.msra.mxu1 %v10439_v60  ;;  %11926 = vst [vmem:[#allocation8_spill] sm:$0xff] %v10492_v57 }
 0x371   :  { %8486 = vtanh.f32 %v10455_v24  ;;  %3410 = vmatprep.subr.bf16.mxu0 %v10447_v38  ;;  %3453 = vmatprep.subr.bf16.mxu1 %v10452_v56  ;;  %v8483_v56 = vpop.eup %8482  ;;  %v2866_v38 = vmul.f32 0.5, %v8481_v11  ;;  %v10540_v11 = vld [vmem:[%s11673_s5 + $0x8] ss:$16 sps:$4 sm:$0xff]  }
 0x372   :  { %v2867_v60 = vmul.f32 0.5, %v8483_v56  ;;  %v10535_v56 = vld [vmem:[%s11673_s5] ss:$16 sps:$4 sm:$0xff]  }
 0x374   :  { %3411 = vmatpush1.bf16.msra.mxu0 %v10462_v53  ;;  %3454 = vmatpush1.bf16.msra.mxu1 %v10467_v0  ;;  %v10499_v53 = vld [vmem:[%s11673_s5 + $0x24] ss:$16 sps:$4 sm:$0xff]   ;;  %v10504_v0 = vld [vmem:[%s11673_s5 + $0x2c] ss:$16 sps:$4 sm:$0xff]  }
 0x375   :  { %3412 = vmatprep.subr.bf16.mxu0 %v10475_v28  ;;  %3455 = vmatprep.subr.bf16.mxu1 %v10480_v12  ;;  %11927 = vst [vmem:[#allocation7_spill] sm:$0xff] %v10499_v53  ;;  %11928 = vst [vmem:[#allocation12_spill] sm:$0xff] %v10504_v0  ;;  %v10511_v28 = vld [vmem:[%s11673_s5 + $0x20] ss:$16 sps:$4 sm:$0xff]   ;;  %v10516_v12 = vld [vmem:[%s11673_s5 + $0x28] ss:$16 sps:$4 sm:$0xff]  }
 0x376   :  { %11929 = vst [vmem:[#allocation10_spill] sm:$0xff] %v10511_v28  ;;  %11930 = vst [vmem:[#allocation11_spill] sm:$0xff] %v10516_v12 }
 0x378   :  { %3413 = vmatpush1.bf16.msra.mxu0 %v10487_v63  ;;  %3456 = vmatpush1.bf16.msra.mxu1 %v10492_v57  ;;  %v10523_v57 = vld [vmem:[%s11673_s5 + $0x4] ss:$16 sps:$4 sm:$0xff]   ;;  %v10528_v63 = vld [vmem:[%s11673_s5 + $0xc] ss:$16 sps:$4 sm:$0xff]  }
 0x379   :  { %3414 = vmatprep.subr.bf16.mxu0 %v10499_v53  ;;  %3457 = vmatprep.subr.bf16.mxu1 %v10504_v0  ;;  %v2868_v0 = vadd.f32 0.5, %v2866_v38  ;;  %v2869_v53 = vadd.f32 0.5, %v2867_v60 }
 0x37a   :  { %v8485_v2 = vpop.eup %8484 }
 0x37c   :  { %3415 = vmatpush1.bf16.msra.mxu0 %v10511_v28  ;;  %3458 = vmatpush1.bf16.msra.mxu1 %v10516_v12  ;;  %v2878_v28 = vmul.f32 %v8485_v2, %v2868_v0 }
 0x37d   :  { %3416 = vmatprep.subr.bf16.mxu0 %v10523_v57  ;;  %3459 = vmatprep.subr.bf16.mxu1 %v10528_v63 }
 0x37e   :  { %v8487_v39 = vpop.eup %8486 }
 0x37f   :  { %v2879_v40 = vmul.f32 %v8487_v39, %v2869_v53 }
 0x380   :  { %3417 = vmatpush1.bf16.msra.mxu0 %v10535_v56  ;;  %3460 = vmatpush1.bf16.msra.mxu1 %v10540_v11 }
 0x381   :  { %v2881_v12 = vpack.c.bf16 %v2879_v40, %v2878_v28  ;;  %3792 = vmatprep.subr.bf16.mxu0 %v10129_v55  ;;  %3835 = vmatprep.subr.bf16.mxu1 %v10134_v20 }
 0x383   :  { %7676 = vst [vmem:[#allocation5 + $0x28] sm:$0xff] %v2881_v12   ;;  %3435 = vmatmul.mubr.bf16.vlgmr.msra.gmra.mxu0 %v2881_v12  ;;  %3478 = vmatmul.mubr.bf16.vlgmr.msra.gmra.mxu1 %v2881_v12 }
 0x384   :  { %3793 = vmatpush1.bf16.msra.mxu0 %v10139_v30  ;;  %3836 = vmatpush1.bf16.msra.mxu1 %v10144_v52  ;;  %v11931_v30 = vld [vmem:[#allocation22_spill] sm:$0xff] }
 0x385   :  { %3794 = vmatprep.subr.bf16.mxu0 %v10153_v6  ;;  %3837 = vmatprep.subr.bf16.mxu1 %v10158_v7 }
 0x386   :  { %3824 = vmatprep.mubr.bf16.mxu0 %v11860_v31  ;;  %3867 = vmatprep.mubr.bf16.mxu1 %v11860_v31 }
 0x388   :  { %3795 = vmatpush1.bf16.msra.mxu0 %v10163_v43  ;;  %3838 = vmatpush1.bf16.msra.mxu1 %v10168_v44  ;;  %v11932_v44 = vld [vmem:[#allocation24_spill] sm:$0xff] }
 0x389   :  { %3796 = vmatprep.subr.bf16.mxu0 %v10177_v37  ;;  %3839 = vmatprep.subr.bf16.mxu1 %v10182_v33  ;;  %v11933_v33 = vld [vmem:[#allocation23_spill] sm:$0xff] }
 0x38c   :  { %3797 = vmatpush1.bf16.msra.mxu0 %v10187_v16  ;;  %3840 = vmatpush1.bf16.msra.mxu1 %v10192_v48 }
 0x38d   :  { %3798 = vmatprep.subr.bf16.mxu0 %v10201_v21  ;;  %3841 = vmatprep.subr.bf16.mxu1 %v10206_v1  ;;  %v11934_v21 = vld [vmem:[#allocation28_spill] sm:$0xff] }
 0x38e   :  { %v258_v1 = vadd.f32 %v11934_v21, %v9229_v45 }
 0x390   :  { %3799 = vmatpush1.bf16.msra.mxu0 %v10211_v35  ;;  %3842 = vmatpush1.bf16.msra.mxu1 %v10216_v41  ;;  %v11935_v41 = vld [vmem:[#allocation26_spill] sm:$0xff] }
 0x391   :  { %3800 = vmatprep.subr.bf16.mxu0 %v10225_v3  ;;  %3843 = vmatprep.subr.bf16.mxu1 %v10230_v10 }
 0x394   :  { %3801 = vmatpush1.bf16.msra.mxu0 %v10235_v42  ;;  %3844 = vmatpush1.bf16.msra.mxu1 %v10240_v5 }
 0x395   :  { %3802 = vmatprep.subr.bf16.mxu0 %v10249_v8  ;;  %3845 = vmatprep.subr.bf16.mxu1 %v10254_v9  ;;  %v11936_v9 = vld [vmem:[#allocation27_spill] sm:$0xff] }
 0x398   :  { %3803 = vmatpush1.bf16.msra.mxu0 %v10259_v14  ;;  %3846 = vmatpush1.bf16.msra.mxu1 %v10264_v15 }
 0x399   :  { %3804 = vmatprep.subr.bf16.mxu0 %v10273_v18  ;;  %3847 = vmatprep.subr.bf16.mxu1 %v10278_v19  ;;  %v11937_v19 = vld [vmem:[#allocation29_spill] sm:$0xff] }
 0x39c   :  { %3805 = vmatpush1.bf16.msra.mxu0 %v10283_v47  ;;  %3848 = vmatpush1.bf16.msra.mxu1 %v10288_v26  ;;  %v371_v47 = vadd.f32 %v11937_v19, %v9233_v46  ;;  %v11938_v26 = vld [vmem:[#allocation25_spill] sm:$0xff] }
 0x39d   :  { %3806 = vmatprep.subr.bf16.mxu0 %v10297_v4  ;;  %3849 = vmatprep.subr.bf16.mxu1 %v10302_v32 }
 0x3a0   :  { %3807 = vmatpush1.bf16.msra.mxu0 %v10307_v34  ;;  %3850 = vmatpush1.bf16.msra.mxu1 %v10312_v49 }
 0x3a1   :  { %4088 = vmatprep.subr.bf16.mxu0 %v10321_v50  ;;  %4131 = vmatprep.subr.bf16.mxu1 %v10326_v36 }
 0x423   :  { %v3139_v55 = vpop.f32.mrf.mxu0  ;;  %v3182_v20 = vpop.f32.mrf.mxu1 }
 0x424   :  { %v3191_v52 = vadd.f32 %v3139_v55, %v11931_v30  ;;  %v3193_v16 = vadd.f32 %v3182_v20, %v11933_v33 }
 0x425   :  { %v3141_v6 = vpop.f32.mrf.mxu0  ;;  %v3184_v7 = vpop.f32.mrf.mxu1 }
 0x426   :  { %v3496_v43 = vmul.f32 0.5, %v3191_v52  ;;  %v3192_v37 = vadd.f32 %v3141_v6, %v11932_v44  ;;  %v3194_v4 = vadd.f32 %v3184_v7, %v11938_v26  ;;  %v11943_v26 = vld [vmem:[#allocation110_spill] sm:$0xff] }
 0x427   :  { %v3143_v48 = vpop.f32.mrf.mxu0  ;;  %v3186_v10 = vpop.f32.mrf.mxu1 }
 0x428   :  { %8488 = vtanh.f32 %v3496_v43  ;;  %v3504_v35 = vmul.f32 0.5, %v3192_v37  ;;  %v3195_v3 = vadd.f32 %v3143_v48, %v11935_v41  ;;  %v3197_v14 = vadd.f32 %v3186_v10, %v11936_v9  ;;  %v11939_v48 = vld [vmem:[#allocation104_spill] sm:$0xff]  ;;  %v11940_v41 = vld [vmem:[#allocation106_spill] sm:$0xff]  ;;  %v11941_v10 = vld [vmem:[#allocation105_spill] sm:$0xff] }
 0x429   :  { %v3145_v42 = vpop.f32.mrf.mxu0  ;;  %v3188_v18 = vpop.f32.mrf.mxu1  ;;  %v3514_v36 = vmul.f32 0.5, %v3194_v4  ;;  %v11942_v9 = vld [vmem:[#allocation108_spill] sm:$0xff] }
 0x42a   :  { %8490 = vtanh.f32 %v3504_v35  ;;  %v3497_v5 = vmul.f32 0.5, %v3195_v3  ;;  %v3196_v8 = vadd.f32 %v3145_v42, %v258_v1  ;;  %v3198_v32 = vadd.f32 %v3188_v18, %v371_v47 }
 0x42b   :  { %8492 = vtanh.f32 %v3193_v16 }
 0x42c   :  { %8494 = vtanh.f32 %v3497_v5  ;;  %v3505_v15 = vmul.f32 0.5, %v3196_v8  ;;  %v3515_v60 = vmul.f32 0.5, %v3198_v32 }
 0x42e   :  { %8496 = vtanh.f32 %v3505_v15 }
 0x42f   :  { %8498 = vtanh.f32 %v3197_v14 }
 0x430   :  { %8500 = vtanh.f32 %v3514_v36 }
 0x431   :  { %8502 = vtanh.f32 %v3515_v60 }
 0x435   :  { %v8489_v34 = vpop.eup %8488 }
 0x436   :  { %v3500_v49 = vmul.f32 0.5, %v8489_v34 }
 0x437   :  { %v8491_v50 = vpop.eup %8490 }
 0x438   :  { %v8493_v40 = vpop.eup %8492  ;;  %v3502_v39 = vadd.f32 0.5, %v3500_v49  ;;  %v3508_v2 = vmul.f32 0.5, %v8491_v50  ;;  %v11944_v49 = vld [vmem:[#allocation109_spill] sm:$0xff] }
 0x439   :  { %v8495_v38 = vpop.eup %8494 }
 0x43a   :  { %v3510_v53 = vadd.f32 0.5, %v3508_v2  ;;  %v3524_v0 = vmul.f32 %v8493_v40, %v3502_v39  ;;  %v3501_v28 = vmul.f32 0.5, %v8495_v38 }
 0x43b   :  { %v8497_v12 = vpop.eup %8496 }
 0x43c   :  { %v3522_v55 = vmul.f32 %v3510_v53, %v10341_v58  ;;  %v3503_v20 = vadd.f32 0.5, %v3501_v28  ;;  %v3509_v30 = vmul.f32 0.5, %v8497_v12  ;;  %v8499_v52 = vpop.eup %8498  ;;  %v11945_v28 = vld [vmem:[#allocation107_spill] sm:$0xff] }
 0x43d   :  { %v8501_v8 = vpop.eup %8500 }
 0x43e   :  { %v10593_v6 = vadd.f32 %v3524_v0, %v3522_v55  ;;  %v3511_v7 = vadd.f32 0.5, %v3509_v30  ;;  %v3525_v43 = vmul.f32 %v8499_v52, %v3503_v20  ;;  %v8503_v15 = vpop.eup %8502  ;;  %v3518_v32 = vmul.f32 0.5, %v8501_v8  ;;  %v11946_v55 = vld [vmem:[#allocation111_spill] sm:$0xff] }
 0x43f   :  { %v3519_v34 = vmul.f32 0.5, %v8503_v15  ;;  %v11950_v8 = vld [vmem:[#allocation47_spill] sm:$0xff] }
 0x440   :  { %v3523_v44 = vmul.f32 %v3511_v7, %v10345_v62  ;;  %8504 = vtanh.f32 %v10593_v6  ;;  %v3520_v39 = vadd.f32 0.5, %v3518_v32  ;;  %v11956_v15 = vld [vmem:[#allocation59_spill] sm:$0xff] }
 0x441   :  { %v3521_v2 = vadd.f32 0.5, %v3519_v34  ;;  %v11959_v32 = vld [vmem:[#allocation7_spill] sm:$0xff]  ;;  %v11960_v34 = vld [vmem:[#allocation12_spill] sm:$0xff] }
 0x442   :  { %v10597_v37 = vadd.f32 %v3525_v43, %v3523_v44 }
 0x443   :  { %v3436_v33 = vpop.f32.mrf.mxu0  ;;  %v3479_v16 = vpop.f32.mrf.mxu1 }
 0x444   :  { %8506 = vtanh.f32 %v10597_v37  ;;  %v3488_v58 = vadd.f32 %v3436_v33, %v11939_v48  ;;  %v3490_v42 = vadd.f32 %v3479_v16, %v11941_v10 }
 0x445   :  { %v3438_v21 = vpop.f32.mrf.mxu0  ;;  %v3481_v1 = vpop.f32.mrf.mxu1 }
 0x446   :  { %v3532_v35 = vmul.f32 0.5, %v3488_v58  ;;  %v3489_v3 = vadd.f32 %v3438_v21, %v11940_v41  ;;  %v3491_v12 = vadd.f32 %v3481_v1, %v11945_v28  ;;  %v10682_v28 = vld [vmem:[%s11672_s2 + $0xcc] ss:$16 sps:$4 sm:$0xff]  }
 0x447   :  { %v3440_v5 = vpop.f32.mrf.mxu0  ;;  %v3483_v18 = vpop.f32.mrf.mxu1 }
 0x448   :  { %8508 = vtanh.f32 %v3532_v35  ;;  %v3540_v62 = vmul.f32 0.5, %v3489_v3  ;;  %v3492_v14 = vadd.f32 %v3440_v5, %v11942_v9  ;;  %v3494_v50 = vadd.f32 %v3483_v18, %v11944_v49 }
 0x449   :  { %v3442_v19 = vpop.f32.mrf.mxu0  ;;  %v3485_v38 = vpop.f32.mrf.mxu1  ;;  %v3550_v44 = vmul.f32 0.5, %v3491_v12  ;;  %v10687_v12 = vld [vmem:[%s11672_s2 + $0xc0] ss:$16 sps:$4 sm:$0xff]  }
 0x44a   :  { %8510 = vtanh.f32 %v3540_v62  ;;  %v3533_v47 = vmul.f32 0.5, %v3492_v14  ;;  %v3493_v4 = vadd.f32 %v3442_v19, %v11943_v26  ;;  %v3495_v20 = vadd.f32 %v3485_v38, %v11946_v55  ;;  %v11951_v62 = vld [vmem:[#allocation50_spill] sm:$0xff]  ;;  %v10692_v55 = vld [vmem:[%s11672_s2 + $0xc8] ss:$16 sps:$4 sm:$0xff]  }
 0x44b   :  { %8512 = vtanh.f32 %v3490_v42  ;;  %v11955_v14 = vld [vmem:[#allocation58_spill] sm:$0xff] }
 0x44c   :  { %8514 = vtanh.f32 %v3533_v47  ;;  %v3541_v36 = vmul.f32 0.5, %v3493_v4  ;;  %v3551_v58 = vmul.f32 0.5, %v3495_v20  ;;  %v11957_v19 = vld [vmem:[#allocation6_spill] sm:$0xff]  ;;  %v11958_v47 = vld [vmem:[#allocation8_spill] sm:$0xff] }
 0x44d   :  { %v8505_v40 = vpop.eup %8504  ;;  %v10701_v20 = vld [vmem:[%s11672_s2 + $0xa4] ss:$16 sps:$4 sm:$0xff]  }
 0x44e   :  { %8516 = vtanh.f32 %v3541_v36  ;;  %v3530_v53 = vmul.f32 %v8505_v40, %v3520_v39  ;;  %v11962_v36 = vld [vmem:[#allocation11_spill] sm:$0xff] }
 0x44f   :  { %8518 = vtanh.f32 %v3494_v50  ;;  %v11961_v50 = vld [vmem:[#allocation10_spill] sm:$0xff] }
 0x450   :  { %8520 = vtanh.f32 %v3550_v44  ;;  %v10730_v44 = vld [vmem:[%s11672_s2 + $0x8c] ss:$16 sps:$4 sm:$0xff]  }
 0x451   :  { %v8507_v60 = vpop.eup %8506  ;;  %8522 = vtanh.f32 %v3551_v58  ;;  %v10754_v58 = vld [vmem:[%s11672_s2 + $0x6c] ss:$16 sps:$4 sm:$0xff]  }
 0x452   :  { %v3531_v0 = vmul.f32 %v8507_v60, %v3521_v2 }
 0x454   :  { %v3568_v30 = vpack.c.bf16 %v3531_v0, %v3530_v53  ;;  %v10677_v0 = vld [vmem:[%s11672_s2 + $0xc4] ss:$16 sps:$4 sm:$0xff]  }
 0x455   :  { %v8509_v52 = vpop.eup %8508 }
 0x456   :  { %v3536_v7 = vmul.f32 0.5, %v8509_v52  ;;  %7681 = vst [vmem:[#allocation4 + $0x18] sm:$0xff] %v3568_v30   ;;  %3825 = vmatmul.mubr.bf16.vlgmr.msra.gmra.mxu0 %v3568_v30  ;;  %3868 = vmatmul.mubr.bf16.vlgmr.msra.gmra.mxu1 %v3568_v30  ;;  %v10706_v30 = vld [vmem:[%s11672_s2 + $0xac] ss:$16 sps:$4 sm:$0xff]   ;;  %v10711_v52 = vld [vmem:[%s11672_s2 + $0xa0] ss:$16 sps:$4 sm:$0xff]  }
 0x457   :  { %v8511_v43 = vpop.eup %8510  ;;  %4089 = vmatpush1.bf16.msra.mxu0 %v10358_v22  ;;  %4132 = vmatpush1.bf16.msra.mxu1 %v10363_v25 }
 0x458   :  { %v8513_v33 = vpop.eup %8512  ;;  %v3538_v16 = vadd.f32 0.5, %v3536_v7  ;;  %v3544_v48 = vmul.f32 0.5, %v8511_v43  ;;  %4090 = vmatprep.subr.bf16.mxu0 %v10369_v54  ;;  %4133 = vmatprep.subr.bf16.mxu1 %v10374_v51  ;;  %v10716_v7 = vld [vmem:[%s11672_s2 + $0xa8] ss:$16 sps:$4 sm:$0xff]   ;;  %v10725_v43 = vld [vmem:[%s11672_s2 + $0x84] ss:$16 sps:$4 sm:$0xff]  }
 0x459   :  { %v8515_v21 = vpop.eup %8514  ;;  %4120 = vmatprep.mubr.bf16.mxu0 %v11860_v31  ;;  %4163 = vmatprep.mubr.bf16.mxu1 %v11860_v31 }
 0x45a   :  { %v3546_v1 = vadd.f32 0.5, %v3544_v48  ;;  %v3560_v35 = vmul.f32 %v8513_v33, %v3538_v16  ;;  %v3537_v41 = vmul.f32 0.5, %v8515_v21  ;;  %v10735_v33 = vld [vmem:[%s11672_s2 + $0x80] ss:$16 sps:$4 sm:$0xff]   ;;  %v10740_v16 = vld [vmem:[%s11672_s2 + $0x88] ss:$16 sps:$4 sm:$0xff]  }
 0x45b   :  { %v8517_v3 = vpop.eup %8516  ;;  %4091 = vmatpush1.bf16.msra.mxu0 %v10379_v17  ;;  %4134 = vmatpush1.bf16.msra.mxu1 %v10386_v61  ;;  %v11947_v61 = vld [vmem:[#allocation42_spill] sm:$0xff] }
 0x45c   :  { %v3558_v22 = vmul.f32 %v3546_v1, %v10427_v27  ;;  %v3539_v25 = vadd.f32 0.5, %v3537_v41  ;;  %v3545_v54 = vmul.f32 0.5, %v8517_v3  ;;  %4092 = vmatprep.subr.bf16.mxu0 %v10391_v29  ;;  %4135 = vmatprep.subr.bf16.mxu1 %v10398_v59  ;;  %v8519_v51 = vpop.eup %8518  ;;  %v11948_v27 = vld [vmem:[#allocation43_spill] sm:$0xff]  ;;  %v11949_v59 = vld [vmem:[#allocation46_spill] sm:$0xff] }
 0x45d   :  { %v8521_v9 = vpop.eup %8520  ;;  %v10749_v48 = vld [vmem:[%s11672_s2 + $0x64] ss:$16 sps:$4 sm:$0xff]   ;;  %v10759_v21 = vld [vmem:[%s11672_s2 + $0x60] ss:$16 sps:$4 sm:$0xff]   ;;  %v10764_v1 = vld [vmem:[%s11672_s2 + $0x68] ss:$16 sps:$4 sm:$0xff]  }
 0x45e   :  { %v10619_v10 = vadd.f32 %v3560_v35, %v3558_v22  ;;  %v3547_v42 = vadd.f32 0.5, %v3545_v54  ;;  %v3561_v5 = vmul.f32 %v8519_v51, %v3539_v25  ;;  %v8523_v18 = vpop.eup %8522  ;;  %v3554_v26 = vmul.f32 0.5, %v8521_v9  ;;  %v10773_v35 = vld [vmem:[%s11672_s2 + $0x44] ss:$16 sps:$4 sm:$0xff]   ;;  %v10778_v41 = vld [vmem:[%s11672_s2 + $0x4c] ss:$16 sps:$4 sm:$0xff]  }
 0x45f   :  { %4093 = vmatpush1.bf16.msra.mxu0 %v10407_v23  ;;  %4136 = vmatpush1.bf16.msra.mxu1 %v10412_v13  ;;  %v11952_v23 = vld [vmem:[#allocation51_spill] sm:$0xff]  ;;  %v11953_v13 = vld [vmem:[#allocation54_spill] sm:$0xff]  ;;  %v3555_v4 = vmul.f32 0.5, %v8523_v18  ;;  %v11964_v18 = vld [vmem:[#allocation32_spill] sm:$0xff] }
 0x460   :  { %v3559_v17 = vmul.f32 %v3547_v42, %v10455_v24  ;;  %4094 = vmatprep.subr.bf16.mxu0 %v11947_v61  ;;  %4137 = vmatprep.subr.bf16.mxu1 %v11948_v27  ;;  %8524 = vtanh.f32 %v10619_v10  ;;  %v11954_v24 = vld [vmem:[#allocation55_spill] sm:$0xff]  ;;  %v3556_v40 = vadd.f32 0.5, %v3554_v26  ;;  %v10783_v3 = vld [vmem:[%s11672_s2 + $0x40] ss:$16 sps:$4 sm:$0xff]   ;;  %v10797_v25 = vld [vmem:[%s11672_s2 + $0x24] ss:$16 sps:$4 sm:$0xff]  }
 0x461   :  { %v3557_v39 = vadd.f32 0.5, %v3555_v4  ;;  %v10788_v22 = vld [vmem:[%s11672_s2 + $0x48] ss:$16 sps:$4 sm:$0xff]   ;;  %v10802_v54 = vld [vmem:[%s11672_s2 + $0x2c] ss:$16 sps:$4 sm:$0xff]  }
 0x462   :  { %v10627_v29 = vadd.f32 %v3561_v5, %v3559_v17  ;;  %v10807_v51 = vld [vmem:[%s11672_s2 + $0x20] ss:$16 sps:$4 sm:$0xff]   ;;  %v10812_v42 = vld [vmem:[%s11672_s2 + $0x28] ss:$16 sps:$4 sm:$0xff]   ;;  %v10821_v5 = vld [vmem:[%s11672_s2 + $0x4] ss:$16 sps:$4 sm:$0xff]  }
 0x463   :  { %4095 = vmatpush1.bf16.msra.mxu0 %v11949_v59  ;;  %4138 = vmatpush1.bf16.msra.mxu1 %v11950_v8  ;;  %v10826_v17 = vld [vmem:[%s11672_s2 + $0xc] ss:$16 sps:$4 sm:$0xff]   ;;  %v10831_v61 = vld [vmem:[%s11672_s2] ss:$16 sps:$4 sm:$0xff]   ;;  %v10836_v27 = vld [vmem:[%s11672_s2 + $0x8] ss:$16 sps:$4 sm:$0xff]  }
 0x464   :  { %8526 = vtanh.f32 %v10627_v29  ;;  %4096 = vmatprep.subr.bf16.mxu0 %v11951_v62  ;;  %4139 = vmatprep.subr.bf16.mxu1 %v11952_v23  ;;  %v10845_v59 = vld [vmem:[%s11673_s5 + $0xe4] ss:$16 sps:$4 sm:$0xff]   ;;  %v10850_v8 = vld [vmem:[%s11673_s5 + $0xec] ss:$16 sps:$4 sm:$0xff]  }
 0x467   :  { %4097 = vmatpush1.bf16.msra.mxu0 %v11953_v13  ;;  %4140 = vmatpush1.bf16.msra.mxu1 %v11954_v24  ;;  %v11963_v13 = vld [vmem:[#allocation30_spill] sm:$0xff] }
 0x468   :  { %4098 = vmatprep.subr.bf16.mxu0 %v11955_v14  ;;  %4141 = vmatprep.subr.bf16.mxu1 %v11956_v15 }
 0x46b   :  { %4099 = vmatpush1.bf16.msra.mxu0 %v11957_v19  ;;  %4142 = vmatpush1.bf16.msra.mxu1 %v11958_v47  ;;  %v11965_v47 = vld [vmem:[#allocation31_spill] sm:$0xff] }
 0x46c   :  { %4100 = vmatprep.subr.bf16.mxu0 %v11959_v32  ;;  %4143 = vmatprep.subr.bf16.mxu1 %v11960_v34  ;;  %v11966_v32 = vld [vmem:[#allocation36_spill] sm:$0xff] }
 0x46d   :  { %v8525_v49 = vpop.eup %8524  ;;  %v268_v34 = vadd.f32 %v11966_v32, %v9229_v45 }
 0x46e   :  { %v3566_v60 = vmul.f32 %v8525_v49, %v3556_v40 }
 0x46f   :  { %4101 = vmatpush1.bf16.msra.mxu0 %v11961_v50  ;;  %4144 = vmatpush1.bf16.msra.mxu1 %v11962_v36  ;;  %v11967_v50 = vld [vmem:[#allocation34_spill] sm:$0xff] }
 0x470   :  { %4102 = vmatprep.subr.bf16.mxu0 %v10523_v57  ;;  %4145 = vmatprep.subr.bf16.mxu1 %v10528_v63  ;;  %v10653_v57 = vld [vmem:[%s11672_s2 + $0xe4] ss:$16 sps:$4 sm:$0xff]   ;;  %v10658_v63 = vld [vmem:[%s11672_s2 + $0xec] ss:$16 sps:$4 sm:$0xff]  }
 0x471   :  { %v8527_v2 = vpop.eup %8526 }
 0x472   :  { %v3567_v38 = vmul.f32 %v8527_v2, %v3557_v39 }
 0x473   :  { %4103 = vmatpush1.bf16.msra.mxu0 %v10535_v56  ;;  %4146 = vmatpush1.bf16.msra.mxu1 %v10540_v11  ;;  %v10663_v56 = vld [vmem:[%s11672_s2 + $0xe0] ss:$16 sps:$4 sm:$0xff]   ;;  %v10668_v11 = vld [vmem:[%s11672_s2 + $0xe8] ss:$16 sps:$4 sm:$0xff]  }
 0x474   :  { %v3569_v53 = vpack.c.bf16 %v3567_v38, %v3566_v60  ;;  %4478 = vmatprep.subr.bf16.mxu0 %v10653_v57  ;;  %4521 = vmatprep.subr.bf16.mxu1 %v10658_v63  ;;  %v11968_v38 = vld [vmem:[#allocation35_spill] sm:$0xff] }
 0x476   :  { %7686 = vst [vmem:[#allocation5 + $0x20] sm:$0xff] %v3569_v53   ;;  %4121 = vmatmul.mubr.bf16.vlgmr.msra.gmra.mxu0 %v3569_v53  ;;  %4164 = vmatmul.mubr.bf16.vlgmr.msra.gmra.mxu1 %v3569_v53 }
 0x477   :  { %4510 = vmatprep.mubr.bf16.mxu0 %v11860_v31  ;;  %4553 = vmatprep.mubr.bf16.mxu1 %v11860_v31 }
 0x478   :  { %4479 = vmatpush1.bf16.msra.mxu0 %v10663_v56  ;;  %4522 = vmatpush1.bf16.msra.mxu1 %v10668_v11 }
 0x479   :  { %4480 = vmatprep.subr.bf16.mxu0 %v10677_v0  ;;  %4523 = vmatprep.subr.bf16.mxu1 %v10682_v28 }
 0x47c   :  { %4481 = vmatpush1.bf16.msra.mxu0 %v10687_v12  ;;  %4524 = vmatpush1.bf16.msra.mxu1 %v10692_v55 }
 0x47d   :  { %4482 = vmatprep.subr.bf16.mxu0 %v10701_v20  ;;  %4525 = vmatprep.subr.bf16.mxu1 %v10706_v30 }
 0x480   :  { %4483 = vmatpush1.bf16.msra.mxu0 %v10711_v52  ;;  %4526 = vmatpush1.bf16.msra.mxu1 %v10716_v7 }
 0x481   :  { %4484 = vmatprep.subr.bf16.mxu0 %v10725_v43  ;;  %4527 = vmatprep.subr.bf16.mxu1 %v10730_v44 }
 0x484   :  { %4485 = vmatpush1.bf16.msra.mxu0 %v10735_v33  ;;  %4528 = vmatpush1.bf16.msra.mxu1 %v10740_v16 }
 0x485   :  { %4486 = vmatprep.subr.bf16.mxu0 %v10749_v48  ;;  %4529 = vmatprep.subr.bf16.mxu1 %v10754_v58 }
 0x488   :  { %4487 = vmatpush1.bf16.msra.mxu0 %v10759_v21  ;;  %4530 = vmatpush1.bf16.msra.mxu1 %v10764_v1 }
 0x489   :  { %4488 = vmatprep.subr.bf16.mxu0 %v10773_v35  ;;  %4531 = vmatprep.subr.bf16.mxu1 %v10778_v41 }
 0x48c   :  { %4489 = vmatpush1.bf16.msra.mxu0 %v10783_v3  ;;  %4532 = vmatpush1.bf16.msra.mxu1 %v10788_v22 }
 0x48d   :  { %4490 = vmatprep.subr.bf16.mxu0 %v10797_v25  ;;  %4533 = vmatprep.subr.bf16.mxu1 %v10802_v54 }
 0x490   :  { %4491 = vmatpush1.bf16.msra.mxu0 %v10807_v51  ;;  %4534 = vmatpush1.bf16.msra.mxu1 %v10812_v42 }
 0x491   :  { %4492 = vmatprep.subr.bf16.mxu0 %v10821_v5  ;;  %4535 = vmatprep.subr.bf16.mxu1 %v10826_v17 }
 0x494   :  { %4493 = vmatpush1.bf16.msra.mxu0 %v10831_v61  ;;  %4536 = vmatpush1.bf16.msra.mxu1 %v10836_v27 }
 0x495   :  { %4774 = vmatprep.subr.bf16.mxu0 %v10845_v59  ;;  %4817 = vmatprep.subr.bf16.mxu1 %v10850_v8 }
 0x516   :  { %v3826_v62 = vpop.f32.mrf.mxu0  ;;  %v3869_v23 = vpop.f32.mrf.mxu1 }
 0x517   :  { %v3878_v24 = vadd.f32 %v3826_v62, %v11963_v13  ;;  %v3880_v26 = vadd.f32 %v3869_v23, %v11965_v47  ;;  %v11969_v13 = vld [vmem:[#allocation37_spill] sm:$0xff] }
 0x518   :  { %v3828_v9 = vpop.f32.mrf.mxu0  ;;  %v3871_v14 = vpop.f32.mrf.mxu1 }
 0x519   :  { %v4182_v15 = vmul.f32 0.5, %v3878_v24  ;;  %v3879_v19 = vadd.f32 %v3828_v9, %v11964_v18  ;;  %v381_v24 = vadd.f32 %v11969_v13, %v9233_v46  ;;  %v11970_v9 = vld [vmem:[#allocation33_spill] sm:$0xff] }
 0x51a   :  { %v3830_v4 = vpop.f32.mrf.mxu0  ;;  %v3873_v40 = vpop.f32.mrf.mxu1 }
 0x51b   :  { %8528 = vtanh.f32 %v4182_v15  ;;  %v4190_v49 = vmul.f32 0.5, %v3879_v19  ;;  %v3882_v36 = vadd.f32 %v3830_v4, %v11967_v50  ;;  %v3884_v53 = vadd.f32 %v3873_v40, %v11968_v38 }
 0x51c   :  { %v3832_v39 = vpop.f32.mrf.mxu0  ;;  %v3875_v23 = vpop.f32.mrf.mxu1  ;;  %v3881_v15 = vadd.f32 %v3871_v14, %v11970_v9 }
 0x51d   :  { %8530 = vtanh.f32 %v4190_v49  ;;  %v4183_v2 = vmul.f32 0.5, %v3882_v36  ;;  %v3883_v60 = vadd.f32 %v3832_v39, %v268_v34  ;;  %v3885_v18 = vadd.f32 %v3875_v23, %v381_v24 }
 0x51e   :  { %8532 = vtanh.f32 %v3880_v26  ;;  %v4200_v32 = vmul.f32 0.5, %v3881_v15 }
 0x51f   :  { %8534 = vtanh.f32 %v4183_v2  ;;  %v4191_v62 = vmul.f32 0.5, %v3883_v60  ;;  %v4201_v50 = vmul.f32 0.5, %v3885_v18 }
 0x521   :  { %8536 = vtanh.f32 %v4191_v62 }
 0x522   :  { %8538 = vtanh.f32 %v3884_v53 }
 0x523   :  { %8540 = vtanh.f32 %v4200_v32 }
 0x524   :  { %8542 = vtanh.f32 %v4201_v50  ;;  %v11973_v50 = vld [vmem:[#allocation97_spill] sm:$0xff] }
 0x528   :  { %v8529_v19 = vpop.eup %8528 }
 0x529   :  { %v4186_v47 = vmul.f32 0.5, %v8529_v19 }
 0x52a   :  { %v8531_v4 = vpop.eup %8530 }
 0x52b   :  { %v8533_v49 = vpop.eup %8532  ;;  %v4188_v34 = vadd.f32 0.5, %v4186_v47  ;;  %v4194_v26 = vmul.f32 0.5, %v8531_v4  ;;  %v11971_v47 = vld [vmem:[#allocation96_spill] sm:$0xff] }
 0x52c   :  { %v8535_v36 = vpop.eup %8534 }
 0x52d   :  { %v4196_v40 = vadd.f32 0.5, %v4194_v26  ;;  %v4210_v39 = vmul.f32 %v8533_v49, %v4188_v34  ;;  %v4187_v2 = vmul.f32 0.5, %v8535_v36  ;;  %v11972_v34 = vld [vmem:[#allocation98_spill] sm:$0xff] }
 0x52e   :  { %v8537_v60 = vpop.eup %8536 }
 0x52f   :  { %v4208_v38 = vmul.f32 %v4196_v40, %v10593_v6  ;;  %v4189_v53 = vadd.f32 0.5, %v4187_v2  ;;  %v4195_v62 = vmul.f32 0.5, %v8537_v60  ;;  %v8539_v14 = vpop.eup %8538  ;;  %v11974_v2 = vld [vmem:[#allocation100_spill] sm:$0xff] }
 0x531   :  { %v10865_v23 = vadd.f32 %v4210_v39, %v4208_v38  ;;  %v4197_v13 = vadd.f32 0.5, %v4195_v62  ;;  %v4211_v24 = vmul.f32 %v8539_v14, %v4189_v53  ;;  %v8541_v39 = vpop.eup %8540 }
 0x532   :  { %v8543_v38 = vpop.eup %8542 }
 0x533   :  { %v4209_v9 = vmul.f32 %v4197_v13, %v10597_v37  ;;  %8544 = vtanh.f32 %v10865_v23  ;;  %v11975_v13 = vld [vmem:[#allocation102_spill] sm:$0xff] }
 0x535   :  { %v10869_v15 = vadd.f32 %v4211_v24, %v4209_v9  ;;  %v4204_v9 = vmul.f32 0.5, %v8541_v39  ;;  %v10887_v39 = vld [vmem:[%s11673_s5 + $0xe8] ss:$16 sps:$4 sm:$0xff]  }
 0x536   :  { %v4122_v18 = vpop.f32.mrf.mxu0  ;;  %v4165_v19 = vpop.f32.mrf.mxu1 }
 0x537   :  { %8546 = vtanh.f32 %v10869_v15  ;;  %v4174_v6 = vadd.f32 %v4122_v18, %v11971_v47  ;;  %v4176_v36 = vadd.f32 %v4165_v19, %v11973_v50  ;;  %v4205_v18 = vmul.f32 0.5, %v8543_v38  ;;  %v11976_v47 = vld [vmem:[#allocation101_spill] sm:$0xff]  ;;  %v11978_v38 = vld [vmem:[#allocation103_spill] sm:$0xff] }
 0x538   :  { %v4124_v4 = vpop.f32.mrf.mxu0  ;;  %v4167_v32 = vpop.f32.mrf.mxu1 }
 0x539   :  { %v4218_v49 = vmul.f32 0.5, %v4174_v6  ;;  %v4175_v26 = vadd.f32 %v4124_v4, %v11972_v34  ;;  %v4207_v34 = vadd.f32 0.5, %v4205_v18 }
 0x53a   :  { %v4126_v40 = vpop.f32.mrf.mxu0  ;;  %v4169_v53 = vpop.f32.mrf.mxu1 }
 0x53b   :  { %8548 = vtanh.f32 %v4218_v49  ;;  %v4226_v37 = vmul.f32 0.5, %v4175_v26  ;;  %v4178_v60 = vadd.f32 %v4126_v40, %v11974_v2  ;;  %v4180_v6 = vadd.f32 %v4169_v53, %v11976_v47 }
 0x53c   :  { %v4128_v62 = vpop.f32.mrf.mxu0  ;;  %v4206_v49 = vadd.f32 0.5, %v4204_v9  ;;  %v4171_v50 = vpop.f32.mrf.mxu1  ;;  %v10903_v9 = vld [vmem:[%s11673_s5 + $0xc0] ss:$16 sps:$4 sm:$0xff]  }
 0x53d   :  { %8550 = vtanh.f32 %v4226_v37  ;;  %v4219_v14 = vmul.f32 0.5, %v4178_v60  ;;  %v4179_v24 = vadd.f32 %v4128_v62, %v11975_v13  ;;  %v11977_v37 = vld [vmem:[#allocation99_spill] sm:$0xff]  ;;  %v4181_v53 = vadd.f32 %v4171_v50, %v11978_v38 }
 0x53e   :  { %8552 = vtanh.f32 %v4176_v36  ;;  %v4177_v60 = vadd.f32 %v4167_v32, %v11977_v37  ;;  %v10882_v36 = vld [vmem:[%s11673_s5 + $0xe0] ss:$16 sps:$4 sm:$0xff]   ;;  %v10898_v32 = vld [vmem:[%s11673_s5 + $0xcc] ss:$16 sps:$4 sm:$0xff]  }
 0x53f   :  { %8554 = vtanh.f32 %v4219_v14  ;;  %v4227_v19 = vmul.f32 0.5, %v4179_v24  ;;  %v10893_v14 = vld [vmem:[%s11673_s5 + $0xc4] ss:$16 sps:$4 sm:$0xff]   ;;  %v10922_v50 = vld [vmem:[%s11673_s5 + $0xac] ss:$16 sps:$4 sm:$0xff]  }
 0x540   :  { %v8545_v4 = vpop.eup %8544  ;;  %v4236_v47 = vmul.f32 0.5, %v4177_v60 }
 0x541   :  { %8556 = vtanh.f32 %v4227_v19  ;;  %v4216_v40 = vmul.f32 %v8545_v4, %v4206_v49  ;;  %v10915_v19 = vld [vmem:[%s11673_s5 + $0xa4] ss:$16 sps:$4 sm:$0xff]  }
 0x542   :  { %8558 = vtanh.f32 %v4180_v6  ;;  %v10910_v6 = vld [vmem:[%s11673_s5 + $0xc8] ss:$16 sps:$4 sm:$0xff]  }
 0x543   :  { %8560 = vtanh.f32 %v4236_v47  ;;  %v10944_v47 = vld [vmem:[%s11673_s5 + $0x84] ss:$16 sps:$4 sm:$0xff]  }
 0x544   :  { %v8547_v26 = vpop.eup %8546  ;;  %11979 = vst [vmem:[#allocation13_spill] sm:$0xff] %v10944_v47 }
 0x545   :  { %v4217_v2 = vmul.f32 %v8547_v26, %v4207_v34  ;;  %v4237_v26 = vmul.f32 0.5, %v4181_v53  ;;  %v10931_v53 = vld [vmem:[%s11673_s5 + $0xa0] ss:$16 sps:$4 sm:$0xff]  }
 0x547   :  { %v4254_v62 = vpack.c.bf16 %v4217_v2, %v4216_v40  ;;  %8562 = vtanh.f32 %v4237_v26  ;;  %v10958_v26 = vld [vmem:[%s11673_s5 + $0x80] ss:$16 sps:$4 sm:$0xff]  }
 0x548   :  { %v8549_v13 = vpop.eup %8548  ;;  %11981 = vst [vmem:[#allocation120_spill] sm:$0xff] %v10958_v26 }
 0x549   :  { %v4222_v24 = vmul.f32 0.5, %v8549_v13  ;;  %7691 = vst [vmem:[#allocation4 + $0x20] sm:$0xff] %v4254_v62   ;;  %4511 = vmatmul.mubr.bf16.vlgmr.msra.gmra.mxu0 %v4254_v62  ;;  %4554 = vmatmul.mubr.bf16.vlgmr.msra.gmra.mxu1 %v4254_v62  ;;  %v10936_v62 = vld [vmem:[%s11673_s5 + $0xa8] ss:$16 sps:$4 sm:$0xff]  }
 0x54a   :  { %v8551_v18 = vpop.eup %8550  ;;  %4775 = vmatpush1.bf16.msra.mxu0 %v10882_v36  ;;  %4818 = vmatpush1.bf16.msra.mxu1 %v10887_v39 }
 0x54b   :  { %v8553_v4 = vpop.eup %8552  ;;  %v4224_v49 = vadd.f32 0.5, %v4222_v24  ;;  %v4230_v34 = vmul.f32 0.5, %v8551_v18  ;;  %4776 = vmatprep.subr.bf16.mxu0 %v10893_v14  ;;  %4819 = vmatprep.subr.bf16.mxu1 %v10898_v32 }
 0x54c   :  { %v8555_v40 = vpop.eup %8554  ;;  %4806 = vmatprep.mubr.bf16.mxu0 %v11860_v31  ;;  %4849 = vmatprep.mubr.bf16.mxu1 %v11860_v31 }
 0x54d   :  { %v4232_v2 = vadd.f32 0.5, %v4230_v34  ;;  %v4246_v37 = vmul.f32 %v8553_v4, %v4224_v49  ;;  %v4223_v60 = vmul.f32 0.5, %v8555_v40  ;;  %v10949_v4 = vld [vmem:[%s11673_s5 + $0x8c] ss:$16 sps:$4 sm:$0xff]  }
 0x54e   :  { %v8557_v38 = vpop.eup %8556  ;;  %4777 = vmatpush1.bf16.msra.mxu0 %v10903_v9  ;;  %4820 = vmatpush1.bf16.msra.mxu1 %v10910_v6  ;;  %11980 = vst [vmem:[#allocation9_spill] sm:$0xff] %v10949_v4 }
 0x54f   :  { %v4244_v13 = vmul.f32 %v4232_v2, %v10619_v10  ;;  %v4225_v24 = vadd.f32 0.5, %v4223_v60  ;;  %v4231_v18 = vmul.f32 0.5, %v8557_v38  ;;  %4778 = vmatprep.subr.bf16.mxu0 %v10915_v19  ;;  %4821 = vmatprep.subr.bf16.mxu1 %v10922_v50  ;;  %v8559_v49 = vpop.eup %8558  ;;  %v10963_v2 = vld [vmem:[%s11673_s5 + $0x88] ss:$16 sps:$4 sm:$0xff]   ;;  %v10976_v38 = vld [vmem:[%s11673_s5 + $0x6c] ss:$16 sps:$4 sm:$0xff]  }
 0x550   :  { %11982 = vst [vmem:[#allocation122_spill] sm:$0xff] %v10963_v2  ;;  %11984 = vst [vmem:[#allocation124_spill] sm:$0xff] %v10976_v38 }
 0x551   :  { %v10951_v34 = vadd.f32 %v4246_v37, %v4244_v13  ;;  %v4233_v10 = vadd.f32 0.5, %v4231_v18  ;;  %v4247_v40 = vmul.f32 %v8559_v49, %v4225_v24  ;;  %v10971_v37 = vld [vmem:[%s11673_s5 + $0x64] ss:$16 sps:$4 sm:$0xff]   ;;  %v10991_v24 = vld [vmem:[%s11673_s5 + $0x68] ss:$16 sps:$4 sm:$0xff]  }
 0x552   :  { %4779 = vmatpush1.bf16.msra.mxu0 %v10931_v53  ;;  %4822 = vmatpush1.bf16.msra.mxu1 %v10936_v62  ;;  %11983 = vst [vmem:[#allocation121_spill] sm:$0xff] %v10971_v37  ;;  %11986 = vst [vmem:[#allocation125_spill] sm:$0xff] %v10991_v24  ;;  %v10999_v18 = vld [vmem:[%s11673_s5 + $0x44] ss:$16 sps:$4 sm:$0xff]   ;;  %v11004_v49 = vld [vmem:[%s11673_s5 + $0x4c] ss:$16 sps:$4 sm:$0xff]  }
 0x553   :  { %v4245_v60 = vmul.f32 %v4233_v10, %v10627_v29  ;;  %4780 = vmatprep.subr.bf16.mxu0 %v10944_v47  ;;  %4823 = vmatprep.subr.bf16.mxu1 %v10949_v4  ;;  %8564 = vtanh.f32 %v10951_v34  ;;  %v10986_v29 = vld [vmem:[%s11673_s5 + $0x60] ss:$16 sps:$4 sm:$0xff]   ;;  %11987 = vst [vmem:[#allocation123_spill] sm:$0xff] %v10999_v18  ;;  %11988 = vst [vmem:[#allocation127_spill] sm:$0xff] %v11004_v49 }
 0x554   :  { %11985 = vst [vmem:[#allocation126_spill] sm:$0xff] %v10986_v29  ;;  %v11011_v10 = vld [vmem:[%s11673_s5 + $0x40] ss:$16 sps:$4 sm:$0xff]  }
 0x555   :  { %v10979_v13 = vadd.f32 %v4247_v40, %v4245_v60  ;;  %11989 = vst [vmem:[#allocation128_spill] sm:$0xff] %v11011_v10  ;;  %v11016_v40 = vld [vmem:[%s11673_s5 + $0x48] ss:$16 sps:$4 sm:$0xff]   ;;  %v8561_v60 = vpop.eup %8560 }
 0x556   :  { %4781 = vmatpush1.bf16.msra.mxu0 %v10958_v26  ;;  %4824 = vmatpush1.bf16.msra.mxu1 %v10963_v2  ;;  %11990 = vst [vmem:[#allocation129_spill] sm:$0xff] %v11016_v40 }
 0x557   :  { %8566 = vtanh.f32 %v10979_v13  ;;  %4782 = vmatprep.subr.bf16.mxu0 %v10971_v37  ;;  %4825 = vmatprep.subr.bf16.mxu1 %v10976_v38  ;;  %v8563_v38 = vpop.eup %8562  ;;  %v4240_v37 = vmul.f32 0.5, %v8561_v60  ;;  %v11064_v60 = vld [vmem:[%s11673_s5 + $0x8] ss:$16 sps:$4 sm:$0xff]  }
 0x558   :  { %v4241_v2 = vmul.f32 0.5, %v8563_v38  ;;  %v11059_v38 = vld [vmem:[%s11673_s5] ss:$16 sps:$4 sm:$0xff]  }
 0x55a   :  { %4783 = vmatpush1.bf16.msra.mxu0 %v10986_v29  ;;  %4826 = vmatpush1.bf16.msra.mxu1 %v10991_v24  ;;  %v11023_v29 = vld [vmem:[%s11673_s5 + $0x24] ss:$16 sps:$4 sm:$0xff]   ;;  %v11028_v24 = vld [vmem:[%s11673_s5 + $0x2c] ss:$16 sps:$4 sm:$0xff]  }
 0x55b   :  { %4784 = vmatprep.subr.bf16.mxu0 %v10999_v18  ;;  %4827 = vmatprep.subr.bf16.mxu1 %v11004_v49  ;;  %11991 = vst [vmem:[#allocation130_spill] sm:$0xff] %v11023_v29  ;;  %11992 = vst [vmem:[#allocation131_spill] sm:$0xff] %v11028_v24  ;;  %v11035_v18 = vld [vmem:[%s11673_s5 + $0x20] ss:$16 sps:$4 sm:$0xff]   ;;  %v11040_v49 = vld [vmem:[%s11673_s5 + $0x28] ss:$16 sps:$4 sm:$0xff]  }
 0x55c   :  { %11993 = vst [vmem:[#allocation132_spill] sm:$0xff] %v11035_v18  ;;  %11994 = vst [vmem:[#allocation133_spill] sm:$0xff] %v11040_v49 }
 0x55e   :  { %4785 = vmatpush1.bf16.msra.mxu0 %v11011_v10  ;;  %4828 = vmatpush1.bf16.msra.mxu1 %v11016_v40  ;;  %v11047_v40 = vld [vmem:[%s11673_s5 + $0x4] ss:$16 sps:$4 sm:$0xff]   ;;  %v11052_v10 = vld [vmem:[%s11673_s5 + $0xc] ss:$16 sps:$4 sm:$0xff]  }
 0x55f   :  { %4786 = vmatprep.subr.bf16.mxu0 %v11023_v29  ;;  %4829 = vmatprep.subr.bf16.mxu1 %v11028_v24  ;;  %v4242_v24 = vadd.f32 0.5, %v4240_v37  ;;  %v4243_v29 = vadd.f32 0.5, %v4241_v2 }
 0x560   :  { %v8565_v26 = vpop.eup %8564 }
 0x562   :  { %4787 = vmatpush1.bf16.msra.mxu0 %v11035_v18  ;;  %4830 = vmatpush1.bf16.msra.mxu1 %v11040_v49  ;;  %v4252_v18 = vmul.f32 %v8565_v26, %v4242_v24 }
 0x563   :  { %4788 = vmatprep.subr.bf16.mxu0 %v11047_v40  ;;  %4831 = vmatprep.subr.bf16.mxu1 %v11052_v10 }
 0x564   :  { %v8567_v4 = vpop.eup %8566 }
 0x565   :  { %v4253_v47 = vmul.f32 %v8567_v4, %v4243_v29 }
 0x566   :  { %4789 = vmatpush1.bf16.msra.mxu0 %v11059_v38  ;;  %4832 = vmatpush1.bf16.msra.mxu1 %v11064_v60 }
 0x567   :  { %v4255_v49 = vpack.c.bf16 %v4253_v47, %v4252_v18  ;;  %5164 = vmatprep.subr.bf16.mxu0 %v10653_v57  ;;  %5207 = vmatprep.subr.bf16.mxu1 %v10658_v63 }
 0x569   :  { %7696 = vst [vmem:[#allocation5 + $0x18] sm:$0xff] %v4255_v49   ;;  %4807 = vmatmul.mubr.bf16.vlgmr.msra.gmra.mxu0 %v4255_v49  ;;  %4850 = vmatmul.mubr.bf16.vlgmr.msra.gmra.mxu1 %v4255_v49 }
 0x56a   :  { %5165 = vmatpush1.bf16.msra.mxu0 %v10663_v56  ;;  %5208 = vmatpush1.bf16.msra.mxu1 %v10668_v11  ;;  %v11995_v56 = vld [vmem:[#allocation38_spill] sm:$0xff] }
 0x56b   :  { %5166 = vmatprep.subr.bf16.mxu0 %v10677_v0  ;;  %5209 = vmatprep.subr.bf16.mxu1 %v10682_v28 }
 0x56c   :  { %5196 = vmatprep.mubr.bf16.mxu0 %v11860_v31  ;;  %5239 = vmatprep.mubr.bf16.mxu1 %v11860_v31 }
 0x56e   :  { %5167 = vmatpush1.bf16.msra.mxu0 %v10687_v12  ;;  %5210 = vmatpush1.bf16.msra.mxu1 %v10692_v55  ;;  %v11996_v55 = vld [vmem:[#allocation40_spill] sm:$0xff] }
 0x56f   :  { %5168 = vmatprep.subr.bf16.mxu0 %v10701_v20  ;;  %5211 = vmatprep.subr.bf16.mxu1 %v10706_v30  ;;  %v11997_v30 = vld [vmem:[#allocation39_spill] sm:$0xff] }
 0x572   :  { %5169 = vmatpush1.bf16.msra.mxu0 %v10711_v52  ;;  %5212 = vmatpush1.bf16.msra.mxu1 %v10716_v7 }
 0x573   :  { %5170 = vmatprep.subr.bf16.mxu0 %v10725_v43  ;;  %5213 = vmatprep.subr.bf16.mxu1 %v10730_v44  ;;  %v11998_v43 = vld [vmem:[#allocation48_spill] sm:$0xff] }
 0x574   :  { %v278_v44 = vadd.f32 %v11998_v43, %v9229_v45 }
 0x576   :  { %5171 = vmatpush1.bf16.msra.mxu0 %v10735_v33  ;;  %5214 = vmatpush1.bf16.msra.mxu1 %v10740_v16  ;;  %v11999_v16 = vld [vmem:[#allocation44_spill] sm:$0xff] }
 0x577   :  { %5172 = vmatprep.subr.bf16.mxu0 %v10749_v48  ;;  %5215 = vmatprep.subr.bf16.mxu1 %v10754_v58 }
 0x57a   :  { %5173 = vmatpush1.bf16.msra.mxu0 %v10759_v21  ;;  %5216 = vmatpush1.bf16.msra.mxu1 %v10764_v1 }
 0x57b   :  { %5174 = vmatprep.subr.bf16.mxu0 %v10773_v35  ;;  %5217 = vmatprep.subr.bf16.mxu1 %v10778_v41  ;;  %v12000_v41 = vld [vmem:[#allocation45_spill] sm:$0xff] }
 0x57e   :  { %5175 = vmatpush1.bf16.msra.mxu0 %v10783_v3  ;;  %5218 = vmatpush1.bf16.msra.mxu1 %v10788_v22 }
 0x57f   :  { %5176 = vmatprep.subr.bf16.mxu0 %v10797_v25  ;;  %5219 = vmatprep.subr.bf16.mxu1 %v10802_v54  ;;  %v12001_v54 = vld [vmem:[#allocation49_spill] sm:$0xff] }
 0x582   :  { %5177 = vmatpush1.bf16.msra.mxu0 %v10807_v51  ;;  %5220 = vmatpush1.bf16.msra.mxu1 %v10812_v42  ;;  %v391_v51 = vadd.f32 %v12001_v54, %v9233_v46  ;;  %v12002_v42 = vld [vmem:[#allocation41_spill] sm:$0xff] }
 0x583   :  { %5178 = vmatprep.subr.bf16.mxu0 %v10821_v5  ;;  %5221 = vmatprep.subr.bf16.mxu1 %v10826_v17 }
 0x586   :  { %5179 = vmatpush1.bf16.msra.mxu0 %v10831_v61  ;;  %5222 = vmatpush1.bf16.msra.mxu1 %v10836_v27 }
 0x587   :  { %5460 = vmatprep.subr.bf16.mxu0 %v10845_v59  ;;  %5503 = vmatprep.subr.bf16.mxu1 %v10850_v8 }
 0x609   :  { %v4512_v57 = vpop.f32.mrf.mxu0  ;;  %v4555_v63 = vpop.f32.mrf.mxu1 }
 0x60a   :  { %v4564_v11 = vadd.f32 %v4512_v57, %v11995_v56  ;;  %v4566_v52 = vadd.f32 %v4555_v63, %v11997_v30 }
 0x60b   :  { %v4514_v0 = vpop.f32.mrf.mxu0  ;;  %v4557_v28 = vpop.f32.mrf.mxu1 }
 0x60c   :  { %v4868_v12 = vmul.f32 0.5, %v4564_v11  ;;  %v4565_v20 = vadd.f32 %v4514_v0, %v11996_v55  ;;  %v4567_v5 = vadd.f32 %v4557_v28, %v12002_v42  ;;  %v12007_v42 = vld [vmem:[#allocation94_spill] sm:$0xff] }
 0x60d   :  { %v4516_v7 = vpop.f32.mrf.mxu0  ;;  %v4559_v58 = vpop.f32.mrf.mxu1 }
 0x60e   :  { %8568 = vtanh.f32 %v4868_v12  ;;  %v4876_v33 = vmul.f32 0.5, %v4565_v20  ;;  %v4568_v48 = vadd.f32 %v4516_v7, %v11999_v16  ;;  %v4570_v3 = vadd.f32 %v4559_v58, %v12000_v41  ;;  %v12003_v7 = vld [vmem:[#allocation88_spill] sm:$0xff]  ;;  %v12004_v16 = vld [vmem:[#allocation90_spill] sm:$0xff]  ;;  %v12005_v58 = vld [vmem:[#allocation89_spill] sm:$0xff] }
 0x60f   :  { %v4518_v21 = vpop.f32.mrf.mxu0  ;;  %v4561_v25 = vpop.f32.mrf.mxu1  ;;  %v4886_v8 = vmul.f32 0.5, %v4567_v5  ;;  %v12006_v41 = vld [vmem:[#allocation92_spill] sm:$0xff] }
 0x610   :  { %8570 = vtanh.f32 %v4876_v33  ;;  %v4869_v1 = vmul.f32 0.5, %v4568_v48  ;;  %v4569_v35 = vadd.f32 %v4518_v21, %v278_v44  ;;  %v4571_v17 = vadd.f32 %v4561_v25, %v391_v51 }
 0x611   :  { %8572 = vtanh.f32 %v4566_v52 }
 0x612   :  { %8574 = vtanh.f32 %v4869_v1  ;;  %v4877_v22 = vmul.f32 0.5, %v4569_v35  ;;  %v4887_v2 = vmul.f32 0.5, %v4571_v17 }
 0x614   :  { %8576 = vtanh.f32 %v4877_v22 }
 0x615   :  { %8578 = vtanh.f32 %v4570_v3 }
 0x616   :  { %8580 = vtanh.f32 %v4886_v8 }
 0x617   :  { %8582 = vtanh.f32 %v4887_v2 }
 0x61b   :  { %v8569_v61 = vpop.eup %8568 }
 0x61c   :  { %v4872_v27 = vmul.f32 0.5, %v8569_v61 }
 0x61d   :  { %v8571_v59 = vpop.eup %8570 }
 0x61e   :  { %v8573_v47 = vpop.eup %8572  ;;  %v4874_v4 = vadd.f32 0.5, %v4872_v27  ;;  %v4880_v26 = vmul.f32 0.5, %v8571_v59  ;;  %v12008_v27 = vld [vmem:[#allocation93_spill] sm:$0xff] }
 0x61f   :  { %v8575_v37 = vpop.eup %8574 }
 0x620   :  { %v4882_v29 = vadd.f32 0.5, %v4880_v26  ;;  %v4896_v24 = vmul.f32 %v8573_v47, %v4874_v4  ;;  %v4873_v18 = vmul.f32 0.5, %v8575_v37 }
 0x621   :  { %v8577_v49 = vpop.eup %8576 }
 0x622   :  { %v4894_v57 = vmul.f32 %v4882_v29, %v10865_v23  ;;  %v4875_v63 = vadd.f32 0.5, %v4873_v18  ;;  %v4881_v56 = vmul.f32 0.5, %v8577_v49  ;;  %v8579_v11 = vpop.eup %8578  ;;  %v12009_v18 = vld [vmem:[#allocation91_spill] sm:$0xff] }
 0x623   :  { %v8581_v35 = vpop.eup %8580 }
 0x624   :  { %v11117_v0 = vadd.f32 %v4896_v24, %v4894_v57  ;;  %v4883_v28 = vadd.f32 0.5, %v4881_v56  ;;  %v4897_v12 = vmul.f32 %v8579_v11, %v4875_v63  ;;  %v8583_v22 = vpop.eup %8582  ;;  %v4890_v17 = vmul.f32 0.5, %v8581_v35  ;;  %v12010_v63 = vld [vmem:[#allocation95_spill] sm:$0xff]  ;;  %v12014_v35 = vld [vmem:[#allocation122_spill] sm:$0xff] }
 0x625   :  { %v4891_v61 = vmul.f32 0.5, %v8583_v22  ;;  %v12020_v22 = vld [vmem:[#allocation127_spill] sm:$0xff] }
 0x626   :  { %v4895_v55 = vmul.f32 %v4883_v28, %v10869_v15  ;;  %8584 = vtanh.f32 %v11117_v0  ;;  %v4892_v4 = vadd.f32 0.5, %v4890_v17  ;;  %v12023_v17 = vld [vmem:[#allocation130_spill] sm:$0xff] }
 0x627   :  { %v4893_v26 = vadd.f32 0.5, %v4891_v61  ;;  %v12024_v61 = vld [vmem:[#allocation131_spill] sm:$0xff] }
 0x628   :  { %v11121_v20 = vadd.f32 %v4897_v12, %v4895_v55 }
 0x629   :  { %v4808_v30 = vpop.f32.mrf.mxu0  ;;  %v4851_v52 = vpop.f32.mrf.mxu1 }
 0x62a   :  { %8586 = vtanh.f32 %v11121_v20  ;;  %v4860_v23 = vadd.f32 %v4808_v30, %v12003_v7  ;;  %v4862_v21 = vadd.f32 %v4851_v52, %v12005_v58 }
 0x62b   :  { %v4810_v43 = vpop.f32.mrf.mxu0  ;;  %v4853_v44 = vpop.f32.mrf.mxu1 }
 0x62c   :  { %v4904_v33 = vmul.f32 0.5, %v4860_v23  ;;  %v4861_v48 = vadd.f32 %v4810_v43, %v12004_v16  ;;  %v4863_v49 = vadd.f32 %v4853_v44, %v12009_v18  ;;  %v8251_v18 = vld [vmem:[%s11672_s2 + $0xcc] ss:$16 sps:$4 sm:$0xff]  }
 0x62d   :  { %v4812_v1 = vpop.f32.mrf.mxu0  ;;  %v4855_v25 = vpop.f32.mrf.mxu1 }
 0x62e   :  { %8588 = vtanh.f32 %v4904_v33  ;;  %v4912_v15 = vmul.f32 0.5, %v4861_v48  ;;  %v4864_v3 = vadd.f32 %v4812_v1, %v12006_v41  ;;  %v4866_v59 = vadd.f32 %v4855_v25, %v12008_v27 }
 0x62f   :  { %v4814_v54 = vpop.f32.mrf.mxu0  ;;  %v4857_v37 = vpop.f32.mrf.mxu1  ;;  %v4922_v55 = vmul.f32 0.5, %v4863_v49  ;;  %v8246_v49 = vld [vmem:[%s11672_s2 + $0xc0] ss:$16 sps:$4 sm:$0xff]  }
 0x630   :  { %8590 = vtanh.f32 %v4912_v15  ;;  %v4905_v51 = vmul.f32 0.5, %v4864_v3  ;;  %v4865_v5 = vadd.f32 %v4814_v54, %v12007_v42  ;;  %v4867_v56 = vadd.f32 %v4857_v37, %v12010_v63  ;;  %v12015_v15 = vld [vmem:[#allocation121_spill] sm:$0xff]  ;;  %v12019_v3 = vld [vmem:[#allocation123_spill] sm:$0xff]  ;;  %v12021_v54 = vld [vmem:[#allocation128_spill] sm:$0xff] }
 0x631   :  { %8592 = vtanh.f32 %v4862_v21  ;;  %v8254_v63 = vld [vmem:[%s11672_s2 + $0xa4] ss:$16 sps:$4 sm:$0xff]  }
 0x632   :  { %8594 = vtanh.f32 %v4905_v51  ;;  %v4913_v8 = vmul.f32 0.5, %v4865_v5  ;;  %v4923_v23 = vmul.f32 0.5, %v4867_v56  ;;  %v12022_v51 = vld [vmem:[#allocation129_spill] sm:$0xff] }
 0x633   :  { %v8585_v47 = vpop.eup %8584  ;;  %v8257_v56 = vld [vmem:[%s11672_s2 + $0xac] ss:$16 sps:$4 sm:$0xff]  }
 0x634   :  { %8596 = vtanh.f32 %v4913_v8  ;;  %v4902_v29 = vmul.f32 %v8585_v47, %v4892_v4  ;;  %v12026_v8 = vld [vmem:[#allocation133_spill] sm:$0xff] }
 0x635   :  { %8598 = vtanh.f32 %v4866_v59  ;;  %v12025_v59 = vld [vmem:[#allocation132_spill] sm:$0xff] }
 0x636   :  { %8600 = vtanh.f32 %v4922_v55  ;;  %v8263_v55 = vld [vmem:[%s11672_s2 + $0x8c] ss:$16 sps:$4 sm:$0xff]  }
 0x637   :  { %v8587_v2 = vpop.eup %8586  ;;  %8602 = vtanh.f32 %v4923_v23  ;;  %v8269_v23 = vld [vmem:[%s11672_s2 + $0x6c] ss:$16 sps:$4 sm:$0xff]  }
 0x638   :  { %v4903_v24 = vmul.f32 %v8587_v2, %v4893_v26 }
 0x63a   :  { %v4940_v57 = vpack.c.bf16 %v4903_v24, %v4902_v29  ;;  %v8248_v24 = vld [vmem:[%s11672_s2 + $0xc4] ss:$16 sps:$4 sm:$0xff]  }
 0x63b   :  { %v8589_v11 = vpop.eup %8588 }
 0x63c   :  { %7701 = vst [vmem:[#allocation4 + $0x28] sm:$0xff] %v4940_v57   ;;  %v4908_v28 = vmul.f32 0.5, %v8589_v11  ;;  %5197 = vmatmul.mubr.bf16.vlgmr.msra.gmra.mxu0 %v4940_v57  ;;  %5240 = vmatmul.mubr.bf16.vlgmr.msra.gmra.mxu1 %v4940_v57  ;;  %v8249_v57 = vld [vmem:[%s11672_s2 + $0xc8] ss:$16 sps:$4 sm:$0xff]   ;;  %v8252_v11 = vld [vmem:[%s11672_s2 + $0xa0] ss:$16 sps:$4 sm:$0xff]  }
 0x63d   :  { %v8591_v12 = vpop.eup %8590  ;;  %5461 = vmatpush1.bf16.msra.mxu0 %v10882_v36  ;;  %5504 = vmatpush1.bf16.msra.mxu1 %v10887_v39 }
 0x63e   :  { %v8593_v30 = vpop.eup %8592  ;;  %v4910_v52 = vadd.f32 0.5, %v4908_v28  ;;  %v4916_v7 = vmul.f32 0.5, %v8591_v12  ;;  %5462 = vmatprep.subr.bf16.mxu0 %v10893_v14  ;;  %5505 = vmatprep.subr.bf16.mxu1 %v10898_v32  ;;  %v8255_v28 = vld [vmem:[%s11672_s2 + $0xa8] ss:$16 sps:$4 sm:$0xff]   ;;  %v8260_v12 = vld [vmem:[%s11672_s2 + $0x84] ss:$16 sps:$4 sm:$0xff]  }
 0x63f   :  { %v8595_v43 = vpop.eup %8594  ;;  %5492 = vmatprep.mubr.bf16.mxu0 %v11860_v31  ;;  %5535 = vmatprep.mubr.bf16.mxu1 %v11860_v31 }
 0x640   :  { %v4918_v44 = vadd.f32 0.5, %v4916_v7  ;;  %v4932_v33 = vmul.f32 %v8593_v30, %v4910_v52  ;;  %v4909_v16 = vmul.f32 0.5, %v8595_v43  ;;  %v8258_v30 = vld [vmem:[%s11672_s2 + $0x80] ss:$16 sps:$4 sm:$0xff]   ;;  %v8261_v52 = vld [vmem:[%s11672_s2 + $0x88] ss:$16 sps:$4 sm:$0xff]  }
 0x641   :  { %v8597_v48 = vpop.eup %8596  ;;  %5463 = vmatpush1.bf16.msra.mxu0 %v10903_v9  ;;  %5506 = vmatpush1.bf16.msra.mxu1 %v10910_v6  ;;  %v12011_v6 = vld [vmem:[#allocation13_spill] sm:$0xff]  ;;  %v8266_v7 = vld [vmem:[%s11672_s2 + $0x64] ss:$16 sps:$4 sm:$0xff]   ;;  %v8264_v43 = vld [vmem:[%s11672_s2 + $0x60] ss:$16 sps:$4 sm:$0xff]  }
 0x642   :  { %v4930_v36 = vmul.f32 %v4918_v44, %v10951_v34  ;;  %v4911_v39 = vadd.f32 0.5, %v4909_v16  ;;  %v4917_v14 = vmul.f32 0.5, %v8597_v48  ;;  %5464 = vmatprep.subr.bf16.mxu0 %v10915_v19  ;;  %5507 = vmatprep.subr.bf16.mxu1 %v10922_v50  ;;  %v8599_v32 = vpop.eup %8598  ;;  %v12012_v34 = vld [vmem:[#allocation9_spill] sm:$0xff]  ;;  %v12013_v50 = vld [vmem:[#allocation120_spill] sm:$0xff] }
 0x643   :  { %v8601_v41 = vpop.eup %8600  ;;  %v8267_v44 = vld [vmem:[%s11672_s2 + $0x68] ss:$16 sps:$4 sm:$0xff]   ;;  %v8275_v16 = vld [vmem:[%s11672_s2 + $0x4c] ss:$16 sps:$4 sm:$0xff]   ;;  %v8270_v48 = vld [vmem:[%s11672_s2 + $0x40] ss:$16 sps:$4 sm:$0xff]  }
 0x644   :  { %v11143_v58 = vadd.f32 %v4932_v33, %v4930_v36  ;;  %v4919_v21 = vadd.f32 0.5, %v4917_v14  ;;  %v4933_v1 = vmul.f32 %v8599_v32, %v4911_v39  ;;  %v8603_v25 = vpop.eup %8602  ;;  %v4926_v42 = vmul.f32 0.5, %v8601_v41  ;;  %v8272_v33 = vld [vmem:[%s11672_s2 + $0x44] ss:$16 sps:$4 sm:$0xff]   ;;  %v8273_v36 = vld [vmem:[%s11672_s2 + $0x48] ss:$16 sps:$4 sm:$0xff]  }
 0x645   :  { %5465 = vmatpush1.bf16.msra.mxu0 %v10931_v53  ;;  %5508 = vmatpush1.bf16.msra.mxu1 %v10936_v62  ;;  %v12016_v53 = vld [vmem:[#allocation124_spill] sm:$0xff]  ;;  %v12017_v62 = vld [vmem:[#allocation126_spill] sm:$0xff]  ;;  %v4927_v5 = vmul.f32 0.5, %v8603_v25  ;;  %v8281_v14 = vld [vmem:[%s11672_s2 + $0x2c] ss:$16 sps:$4 sm:$0xff]  }
 0x646   :  { %v4931_v9 = vmul.f32 %v4919_v21, %v10979_v13  ;;  %5466 = vmatprep.subr.bf16.mxu0 %v12011_v6  ;;  %5509 = vmatprep.subr.bf16.mxu1 %v12012_v34  ;;  %8604 = vtanh.f32 %v11143_v58  ;;  %v12018_v13 = vld [vmem:[#allocation125_spill] sm:$0xff]  ;;  %v4928_v47 = vadd.f32 0.5, %v4926_v42  ;;  %v8278_v39 = vld [vmem:[%s11672_s2 + $0x24] ss:$16 sps:$4 sm:$0xff]   ;;  %v8276_v32 = vld [vmem:[%s11672_s2 + $0x20] ss:$16 sps:$4 sm:$0xff]  }
 0x647   :  { %v4929_v4 = vadd.f32 0.5, %v4927_v5  ;;  %v8279_v21 = vld [vmem:[%s11672_s2 + $0x28] ss:$16 sps:$4 sm:$0xff]   ;;  %v8282_v6 = vld [vmem:[%s11672_s2] ss:$16 sps:$4 sm:$0xff]  }
 0x648   :  { %v11151_v19 = vadd.f32 %v4933_v1, %v4931_v9  ;;  %v8284_v1 = vld [vmem:[%s11672_s2 + $0x4] ss:$16 sps:$4 sm:$0xff]   ;;  %v8287_v9 = vld [vmem:[%s11672_s2 + $0xc] ss:$16 sps:$4 sm:$0xff]   ;;  %v8285_v34 = vld [vmem:[%s11672_s2 + $0x8] ss:$16 sps:$4 sm:$0xff]  }
 0x649   :  { %5467 = vmatpush1.bf16.msra.mxu0 %v12013_v50  ;;  %5510 = vmatpush1.bf16.msra.mxu1 %v12014_v35  ;;  %v8290_v50 = vld [vmem:[%s11673_s5 + $0xe4] ss:$16 sps:$4 sm:$0xff]   ;;  %v8293_v35 = vld [vmem:[%s11673_s5 + $0xec] ss:$16 sps:$4 sm:$0xff]  }
 0x64a   :  { %8606 = vtanh.f32 %v11151_v19  ;;  %5468 = vmatprep.subr.bf16.mxu0 %v12015_v15  ;;  %5511 = vmatprep.subr.bf16.mxu1 %v12016_v53  ;;  %v12028_v25 = vld [vmem:[#allocation56_spill] sm:$0xff] }
 0x64d   :  { %5469 = vmatpush1.bf16.msra.mxu0 %v12017_v62  ;;  %5512 = vmatpush1.bf16.msra.mxu1 %v12018_v13  ;;  %v12027_v62 = vld [vmem:[#allocation52_spill] sm:$0xff] }
 0x64e   :  { %5470 = vmatprep.subr.bf16.mxu0 %v12019_v3  ;;  %5513 = vmatprep.subr.bf16.mxu1 %v12020_v22 }
 0x651   :  { %5471 = vmatpush1.bf16.msra.mxu0 %v12021_v54  ;;  %5514 = vmatpush1.bf16.msra.mxu1 %v12022_v51  ;;  %v12029_v51 = vld [vmem:[#allocation53_spill] sm:$0xff] }
 0x652   :  { %5472 = vmatprep.subr.bf16.mxu0 %v12023_v17  ;;  %5515 = vmatprep.subr.bf16.mxu1 %v12024_v61  ;;  %v12030_v17 = vld [vmem:[#allocation62_spill] sm:$0xff] }
 0x653   :  { %v8605_v27 = vpop.eup %8604  ;;  %v288_v61 = vadd.f32 %v12030_v17, %v9229_v45 }
 0x654   :  { %v4938_v2 = vmul.f32 %v8605_v27, %v4928_v47 }
 0x655   :  { %5473 = vmatpush1.bf16.msra.mxu0 %v12025_v59  ;;  %5516 = vmatpush1.bf16.msra.mxu1 %v12026_v8  ;;  %v12031_v59 = vld [vmem:[#allocation60_spill] sm:$0xff] }
 0x656   :  { %5474 = vmatprep.subr.bf16.mxu0 %v11047_v40  ;;  %5517 = vmatprep.subr.bf16.mxu1 %v11052_v10  ;;  %v8242_v40 = vld [vmem:[%s11672_s2 + $0xe4] ss:$16 sps:$4 sm:$0xff]   ;;  %v8245_v10 = vld [vmem:[%s11672_s2 + $0xec] ss:$16 sps:$4 sm:$0xff]  }
 0x657   :  { %v8607_v26 = vpop.eup %8606 }
 0x658   :  { %v4939_v37 = vmul.f32 %v8607_v26, %v4929_v4 }
 0x659   :  { %5475 = vmatpush1.bf16.msra.mxu0 %v11059_v38  ;;  %5518 = vmatpush1.bf16.msra.mxu1 %v11064_v60  ;;  %v8240_v38 = vld [vmem:[%s11672_s2 + $0xe0] ss:$16 sps:$4 sm:$0xff]   ;;  %v8243_v60 = vld [vmem:[%s11672_s2 + $0xe8] ss:$16 sps:$4 sm:$0xff]  }
 0x65a   :  { %v4941_v29 = vpack.c.bf16 %v4939_v37, %v4938_v2  ;;  %5850 = vmatprep.subr.bf16.mxu0 %v8242_v40  ;;  %5893 = vmatprep.subr.bf16.mxu1 %v8245_v10  ;;  %v12032_v37 = vld [vmem:[#allocation61_spill] sm:$0xff] }
 0x65c   :  { %7706 = vst [vmem:[#allocation5 + $0x10] sm:$0xff] %v4941_v29   ;;  %5493 = vmatmul.mubr.bf16.vlgmr.msra.gmra.mxu0 %v4941_v29  ;;  %5536 = vmatmul.mubr.bf16.vlgmr.msra.gmra.mxu1 %v4941_v29 }
 0x65d   :  { %5882 = vmatprep.mubr.bf16.mxu0 %v11860_v31  ;;  %5925 = vmatprep.mubr.bf16.mxu1 %v11860_v31 }
 0x65e   :  { %5851 = vmatpush1.bf16.msra.mxu0 %v8240_v38  ;;  %5894 = vmatpush1.bf16.msra.mxu1 %v8243_v60  ;;  %v12033_v38 = vld [vmem:[#allocation63_spill] sm:$0xff] }
 0x65f   :  { %5852 = vmatprep.subr.bf16.mxu0 %v8248_v24  ;;  %5895 = vmatprep.subr.bf16.mxu1 %v8251_v18  ;;  %v401_v60 = vadd.f32 %v12033_v38, %v9233_v46  ;;  %v12034_v24 = vld [vmem:[#allocation57_spill] sm:$0xff] }
 0x662   :  { %5853 = vmatpush1.bf16.msra.mxu0 %v8246_v49  ;;  %5896 = vmatpush1.bf16.msra.mxu1 %v8249_v57 }
 0x663   :  { %5854 = vmatprep.subr.bf16.mxu0 %v8254_v63  ;;  %5897 = vmatprep.subr.bf16.mxu1 %v8257_v56 }
 0x666   :  { %5855 = vmatpush1.bf16.msra.mxu0 %v8252_v11  ;;  %5898 = vmatpush1.bf16.msra.mxu1 %v8255_v28 }
 0x667   :  { %5856 = vmatprep.subr.bf16.mxu0 %v8260_v12  ;;  %5899 = vmatprep.subr.bf16.mxu1 %v8263_v55 }
 0x66a   :  { %5857 = vmatpush1.bf16.msra.mxu0 %v8258_v30  ;;  %5900 = vmatpush1.bf16.msra.mxu1 %v8261_v52 }
 0x66b   :  { %5858 = vmatprep.subr.bf16.mxu0 %v8266_v7  ;;  %5901 = vmatprep.subr.bf16.mxu1 %v8269_v23 }
 0x66e   :  { %5859 = vmatpush1.bf16.msra.mxu0 %v8264_v43  ;;  %5902 = vmatpush1.bf16.msra.mxu1 %v8267_v44 }
 0x66f   :  { %5860 = vmatprep.subr.bf16.mxu0 %v8272_v33  ;;  %5903 = vmatprep.subr.bf16.mxu1 %v8275_v16 }
 0x672   :  { %5861 = vmatpush1.bf16.msra.mxu0 %v8270_v48  ;;  %5904 = vmatpush1.bf16.msra.mxu1 %v8273_v36 }
 0x673   :  { %5862 = vmatprep.subr.bf16.mxu0 %v8278_v39  ;;  %5905 = vmatprep.subr.bf16.mxu1 %v8281_v14 }
 0x676   :  { %5863 = vmatpush1.bf16.msra.mxu0 %v8276_v32  ;;  %5906 = vmatpush1.bf16.msra.mxu1 %v8279_v21 }
 0x677   :  { %5864 = vmatprep.subr.bf16.mxu0 %v8284_v1  ;;  %5907 = vmatprep.subr.bf16.mxu1 %v8287_v9 }
 0x67a   :  { %5865 = vmatpush1.bf16.msra.mxu0 %v8282_v6  ;;  %5908 = vmatpush1.bf16.msra.mxu1 %v8285_v34  ;;  %v12035_v34 = vld [vmem:[#allocation80_spill] sm:$0xff] }
 0x67b   :  { %6144 = vmatprep.subr.bf16.mxu0 %v8290_v50  ;;  %6187 = vmatprep.subr.bf16.mxu1 %v8293_v35 }
 0x6fc   :  { %v5198_v15 = vpop.f32.mrf.mxu0  ;;  %v5241_v53 = vpop.f32.mrf.mxu1 }
 0x6fd   :  { %v5250_v13 = vadd.f32 %v5198_v15, %v12027_v62  ;;  %v5252_v42 = vadd.f32 %v5241_v53, %v12029_v51  ;;  %v12036_v53 = vld [vmem:[#allocation82_spill] sm:$0xff] }
 0x6fe   :  { %v5200_v41 = vpop.f32.mrf.mxu0  ;;  %v5243_v3 = vpop.f32.mrf.mxu1 }
 0x6ff   :  { %v5554_v22 = vmul.f32 0.5, %v5250_v13  ;;  %v5251_v54 = vadd.f32 %v5200_v41, %v12028_v25  ;;  %v5253_v18 = vadd.f32 %v5243_v3, %v12034_v24  ;;  %v12037_v13 = vld [vmem:[#allocation81_spill] sm:$0xff]  ;;  %v12038_v25 = vld [vmem:[#allocation84_spill] sm:$0xff]  ;;  %v12041_v24 = vld [vmem:[#allocation83_spill] sm:$0xff] }
 0x700   :  { %v5202_v5 = vpop.f32.mrf.mxu0  ;;  %v5245_v47 = vpop.f32.mrf.mxu1 }
 0x701   :  { %8608 = vtanh.f32 %v5554_v22  ;;  %v5562_v27 = vmul.f32 0.5, %v5251_v54  ;;  %v5254_v8 = vadd.f32 %v5202_v5, %v12031_v59  ;;  %v5256_v29 = vadd.f32 %v5245_v47, %v12032_v37  ;;  %v12040_v47 = vld [vmem:[#allocation85_spill] sm:$0xff] }
 0x702   :  { %v5204_v4 = vpop.f32.mrf.mxu0  ;;  %v5247_v10 = vpop.f32.mrf.mxu1  ;;  %v5572_v11 = vmul.f32 0.5, %v5253_v18 }
 0x703   :  { %8610 = vtanh.f32 %v5562_v27  ;;  %v5555_v26 = vmul.f32 0.5, %v5254_v8  ;;  %v5255_v2 = vadd.f32 %v5204_v4, %v288_v61  ;;  %v5257_v49 = vadd.f32 %v5247_v10, %v401_v60  ;;  %v12039_v61 = vld [vmem:[#allocation86_spill] sm:$0xff] }
 0x704   :  { %8612 = vtanh.f32 %v5252_v42 }
 0x705   :  { %8614 = vtanh.f32 %v5555_v26  ;;  %v5563_v40 = vmul.f32 0.5, %v5255_v2  ;;  %v5573_v30 = vmul.f32 0.5, %v5257_v49  ;;  %v8288_v49 = vld [vmem:[%s11673_s5 + $0xe0] ss:$16 sps:$4 sm:$0xff]  }
 0x707   :  { %8616 = vtanh.f32 %v5563_v40 }
 0x708   :  { %8618 = vtanh.f32 %v5256_v29 }
 0x709   :  { %8620 = vtanh.f32 %v5572_v11 }
 0x70a   :  { %8622 = vtanh.f32 %v5573_v30 }
 0x70e   :  { %v8609_v57 = vpop.eup %8608 }
 0x70f   :  { %v5558_v63 = vmul.f32 0.5, %v8609_v57  ;;  %v8291_v57 = vld [vmem:[%s11673_s5 + $0xe8] ss:$16 sps:$4 sm:$0xff]  }
 0x710   :  { %v8611_v56 = vpop.eup %8610 }
 0x711   :  { %v8613_v28 = vpop.eup %8612  ;;  %v5560_v12 = vadd.f32 0.5, %v5558_v63  ;;  %v5566_v55 = vmul.f32 0.5, %v8611_v56  ;;  %v12042_v56 = vld [vmem:[#allocation87_spill] sm:$0xff] }
 0x712   :  { %v8615_v52 = vpop.eup %8614 }
 0x713   :  { %v5568_v7 = vadd.f32 0.5, %v5566_v55  ;;  %v5582_v23 = vmul.f32 %v8613_v28, %v5560_v12  ;;  %v5559_v43 = vmul.f32 0.5, %v8615_v52  ;;  %v8296_v28 = vld [vmem:[%s11673_s5 + $0xc4] ss:$16 sps:$4 sm:$0xff]   ;;  %v8299_v12 = vld [vmem:[%s11673_s5 + $0xcc] ss:$16 sps:$4 sm:$0xff]  }
 0x714   :  { %v8617_v44 = vpop.eup %8616  ;;  %v8294_v52 = vld [vmem:[%s11673_s5 + $0xc0] ss:$16 sps:$4 sm:$0xff]  }
 0x715   :  { %v5580_v33 = vmul.f32 %v5568_v7, %v11117_v0  ;;  %v5561_v16 = vadd.f32 0.5, %v5559_v43  ;;  %v5567_v48 = vmul.f32 0.5, %v8617_v44  ;;  %v8619_v36 = vpop.eup %8618  ;;  %v8297_v43 = vld [vmem:[%s11673_s5 + $0xc8] ss:$16 sps:$4 sm:$0xff]   ;;  %v8302_v44 = vld [vmem:[%s11673_s5 + $0xa4] ss:$16 sps:$4 sm:$0xff]  }
 0x716   :  { %v8621_v22 = vpop.eup %8620 }
 0x717   :  { %v11287_v39 = vadd.f32 %v5582_v23, %v5580_v33  ;;  %v5569_v14 = vadd.f32 0.5, %v5567_v48  ;;  %v5583_v32 = vmul.f32 %v8619_v36, %v5561_v16  ;;  %v8623_v51 = vpop.eup %8622  ;;  %v5576_v59 = vmul.f32 0.5, %v8621_v22 }
 0x718   :  { %v5577_v8 = vmul.f32 0.5, %v8623_v51  ;;  %v8317_v51 = vld [vmem:[%s11673_s5 + $0x6c] ss:$16 sps:$4 sm:$0xff]  }
 0x719   :  { %v5581_v21 = vmul.f32 %v5569_v14, %v11121_v20  ;;  %8624 = vtanh.f32 %v11287_v39  ;;  %v5578_v37 = vadd.f32 0.5, %v5576_v59  ;;  %v8305_v14 = vld [vmem:[%s11673_s5 + $0xac] ss:$16 sps:$4 sm:$0xff]   ;;  %v8321_v59 = vld [vmem:[%s11673_s5 + $0x48] ss:$16 sps:$4 sm:$0xff]  }
 0x71a   :  { %v5579_v29 = vadd.f32 0.5, %v5577_v8 }
 0x71b   :  { %v11291_v1 = vadd.f32 %v5583_v32, %v5581_v21 }
 0x71c   :  { %v5494_v9 = vpop.f32.mrf.mxu0  ;;  %v5537_v6 = vpop.f32.mrf.mxu1 }
 0x71d   :  { %8626 = vtanh.f32 %v11291_v1  ;;  %v5546_v0 = vadd.f32 %v5494_v9, %v12035_v34  ;;  %v5548_v41 = vadd.f32 %v5537_v6, %v12037_v13 }
 0x71e   :  { %v5496_v50 = vpop.f32.mrf.mxu0  ;;  %v5539_v35 = vpop.f32.mrf.mxu1 }
 0x71f   :  { %v5590_v15 = vmul.f32 0.5, %v5546_v0  ;;  %v5547_v62 = vadd.f32 %v5496_v50, %v12036_v53  ;;  %v5549_v18 = vadd.f32 %v5539_v35, %v12041_v24  ;;  %v8300_v0 = vld [vmem:[%s11673_s5 + $0xa0] ss:$16 sps:$4 sm:$0xff]   ;;  %v8303_v50 = vld [vmem:[%s11673_s5 + $0xa8] ss:$16 sps:$4 sm:$0xff]  }
 0x720   :  { %v5498_v3 = vpop.f32.mrf.mxu0  ;;  %v5541_v42 = vpop.f32.mrf.mxu1  ;;  %v8330_v24 = vld [vmem:[%s11673_s5] ss:$16 sps:$4 sm:$0xff]  }
 0x721   :  { %8628 = vtanh.f32 %v5590_v15  ;;  %v5598_v20 = vmul.f32 0.5, %v5547_v62  ;;  %v5550_v54 = vadd.f32 %v5498_v3, %v12038_v25  ;;  %v5552_v4 = vadd.f32 %v5541_v42, %v12040_v47  ;;  %v8311_v62 = vld [vmem:[%s11673_s5 + $0x8c] ss:$16 sps:$4 sm:$0xff]   ;;  %v8326_v47 = vld [vmem:[%s11673_s5 + $0x24] ss:$16 sps:$4 sm:$0xff]  }
 0x722   :  { %v5500_v5 = vpop.f32.mrf.mxu0  ;;  %v5543_v10 = vpop.f32.mrf.mxu1  ;;  %v5608_v23 = vmul.f32 0.5, %v5549_v18  ;;  %v8333_v18 = vld [vmem:[%s11673_s5 + $0x8] ss:$16 sps:$4 sm:$0xff]  }
 0x723   :  { %8630 = vtanh.f32 %v5598_v20  ;;  %v5591_v17 = vmul.f32 0.5, %v5550_v54  ;;  %v5551_v27 = vadd.f32 %v5500_v5, %v12039_v61  ;;  %v5553_v11 = vadd.f32 %v5543_v10, %v12042_v56  ;;  %v8309_v20 = vld [vmem:[%s11673_s5 + $0x88] ss:$16 sps:$4 sm:$0xff]   ;;  %v8314_v54 = vld [vmem:[%s11673_s5 + $0x64] ss:$16 sps:$4 sm:$0xff]  }
 0x724   :  { %8632 = vtanh.f32 %v5548_v41  ;;  %v8315_v5 = vld [vmem:[%s11673_s5 + $0x68] ss:$16 sps:$4 sm:$0xff]   ;;  %v8323_v61 = vld [vmem:[%s11673_s5 + $0x4c] ss:$16 sps:$4 sm:$0xff]   ;;  %v8332_v10 = vld [vmem:[%s11673_s5 + $0x4] ss:$16 sps:$4 sm:$0xff]  }
 0x725   :  { %8634 = vtanh.f32 %v5591_v17  ;;  %v5599_v26 = vmul.f32 0.5, %v5551_v27  ;;  %v5609_v36 = vmul.f32 0.5, %v5553_v11  ;;  %v8320_v17 = vld [vmem:[%s11673_s5 + $0x44] ss:$16 sps:$4 sm:$0xff]   ;;  %v8318_v27 = vld [vmem:[%s11673_s5 + $0x40] ss:$16 sps:$4 sm:$0xff]  }
 0x726   :  { %v8625_v2 = vpop.eup %8624 }
 0x727   :  { %8636 = vtanh.f32 %v5599_v26  ;;  %v5588_v38 = vmul.f32 %v8625_v2, %v5578_v37  ;;  %v8324_v2 = vld [vmem:[%s11673_s5 + $0x20] ss:$16 sps:$4 sm:$0xff]   ;;  %v8327_v37 = vld [vmem:[%s11673_s5 + $0x28] ss:$16 sps:$4 sm:$0xff]  }
 0x728   :  { %8638 = vtanh.f32 %v5552_v4  ;;  %v8329_v4 = vld [vmem:[%s11673_s5 + $0x2c] ss:$16 sps:$4 sm:$0xff]  }
 0x729   :  { %8640 = vtanh.f32 %v5608_v23  ;;  %v8341_v23 = vld [vmem:[%s11676_s7 + $0x18] sm:$0xff]  }
 0x72a   :  { %v8627_v40 = vpop.eup %8626  ;;  %8642 = vtanh.f32 %v5609_v36  ;;  %v8347_v36 = vld [vmem:[#allocation4 + $0x18] sm:$0xff]  }
 0x72b   :  { %v5589_v60 = vmul.f32 %v8627_v40, %v5579_v29 }
 0x72d   :  { %v5626_v63 = vpack.c.bf16 %v5589_v60, %v5588_v38  ;;  %v8335_v38 = vld [vmem:[%s11673_s5 + $0xc] ss:$16 sps:$4 sm:$0xff]  }
 0x72e   :  { %v8629_v55 = vpop.eup %8628 }
 0x72f   :  { %7711 = vst [vmem:[#allocation4 + $0x30] sm:$0xff] %v5626_v63   ;;  %v5594_v30 = vmul.f32 0.5, %v8629_v55  ;;  %5883 = vmatmul.mubr.bf16.vlgmr.msra.gmra.mxu0 %v5626_v63  ;;  %5926 = vmatmul.mubr.bf16.vlgmr.msra.gmra.mxu1 %v5626_v63  ;;  %v8336_v63 = vld [vmem:[%s11676_s7 + $0x38] sm:$0xff]   ;;  %v8338_v55 = vld [vmem:[%s11676_s7 + $0x30] sm:$0xff]  }
 0x730   :  { %v8631_v7 = vpop.eup %8630  ;;  %6145 = vmatpush1.bf16.msra.mxu0 %v8288_v49  ;;  %6188 = vmatpush1.bf16.msra.mxu1 %v8291_v57 }
 0x731   :  { %v8633_v33 = vpop.eup %8632  ;;  %v5596_v16 = vadd.f32 0.5, %v5594_v30  ;;  %v5602_v48 = vmul.f32 0.5, %v8631_v7  ;;  %6146 = vmatprep.subr.bf16.mxu0 %v8296_v28  ;;  %6189 = vmatprep.subr.bf16.mxu1 %v8299_v12  ;;  %v8337_v30 = vld [vmem:[#allocation4] sm:$0xff]  }
 0x732   :  { %v8635_v32 = vpop.eup %8634  ;;  %6176 = vmatprep.mubr.bf16.mxu0 %v11860_v31  ;;  %6219 = vmatprep.mubr.bf16.mxu1 %v11860_v31  ;;  %v8308_v31 = vld [vmem:[%s11673_s5 + $0x84] ss:$16 sps:$4 sm:$0xff]  }
 0x733   :  { %v5604_v21 = vadd.f32 0.5, %v5602_v48  ;;  %v5618_v9 = vmul.f32 %v8633_v33, %v5596_v16  ;;  %v5595_v6 = vmul.f32 0.5, %v8635_v32  ;;  %v8340_v7 = vld [vmem:[%s11676_s7 + $0x20] sm:$0xff]   ;;  %v8345_v16 = vld [vmem:[#allocation4 + $0x8] sm:$0xff]   ;;  %v8346_v48 = vld [vmem:[#allocation4 + $0x10] sm:$0xff]  }
 0x734   :  { %v8637_v34 = vpop.eup %8636  ;;  %6147 = vmatpush1.bf16.msra.mxu0 %v8294_v52  ;;  %6190 = vmatpush1.bf16.msra.mxu1 %v8297_v43  ;;  %v8339_v52 = vld [vmem:[%s11676_s7 + $0x28] sm:$0xff]   ;;  %v8342_v43 = vld [vmem:[%s11676_s7 + $0x10] sm:$0xff]   ;;  %v8344_v33 = vld [vmem:[%s11676_s7] sm:$0xff]  }
 0x735   :  { %v5616_v35 = vmul.f32 %v5604_v21, %v11143_v58  ;;  %v5597_v15 = vadd.f32 0.5, %v5595_v6  ;;  %v5603_v53 = vmul.f32 0.5, %v8637_v34  ;;  %6148 = vmatprep.subr.bf16.mxu0 %v8302_v44  ;;  %6191 = vmatprep.subr.bf16.mxu1 %v8305_v14  ;;  %v8639_v13 = vpop.eup %8638  ;;  %v8306_v58 = vld [vmem:[%s11673_s5 + $0x80] ss:$16 sps:$4 sm:$0xff]   ;;  %v8343_v44 = vld [vmem:[%s11676_s7 + $0x8] sm:$0xff]  }
 0x736   :  { %v8641_v8 = vpop.eup %8640  ;;  %v8348_v14 = vld [vmem:[#allocation4 + $0x20] sm:$0xff]   ;;  %v8349_v32 = vld [vmem:[#allocation4 + $0x28] sm:$0xff]   ;;  %v8350_v21 = vld [vmem:[#allocation4 + $0x30] sm:$0xff]  }
 0x737   :  { %v11341_v41 = vadd.f32 %v5618_v9, %v5616_v35  ;;  %v5605_v3 = vadd.f32 0.5, %v5603_v53  ;;  %v5619_v22 = vmul.f32 %v8639_v13, %v5597_v15  ;;  %v8643_v26 = vpop.eup %8642  ;;  %v5612_v29 = vmul.f32 0.5, %v8641_v8  ;;  %v8351_v9 = vld [vmem:[%s11677_s8 + $0x38] sm:$0xff]   ;;  %v8353_v6 = vld [vmem:[%s11677_s8 + $0x30] sm:$0xff]   ;;  %v8354_v34 = vld [vmem:[%s11677_s8 + $0x28] sm:$0xff]  }
 0x738   :  { %6149 = vmatpush1.bf16.msra.mxu0 %v8300_v0  ;;  %6192 = vmatpush1.bf16.msra.mxu1 %v8303_v50  ;;  %v5613_v40 = vmul.f32 0.5, %v8643_v26  ;;  %v8355_v0 = vld [vmem:[%s11677_s8 + $0x20] sm:$0xff]   ;;  %v8356_v50 = vld [vmem:[%s11677_s8 + $0x18] sm:$0xff]   ;;  %v8357_v35 = vld [vmem:[%s11677_s8 + $0x10] sm:$0xff]  }
 0x739   :  { %v5617_v25 = vmul.f32 %v5605_v3, %v11151_v19  ;;  %6150 = vmatprep.subr.bf16.mxu0 %v8308_v31  ;;  %6193 = vmatprep.subr.bf16.mxu1 %v8311_v62  ;;  %8644 = vtanh.f32 %v11341_v41  ;;  %v8312_v19 = vld [vmem:[%s11673_s5 + $0x60] ss:$16 sps:$4 sm:$0xff]   ;;  %v5614_v49 = vadd.f32 0.5, %v5612_v29  ;;  %v8358_v15 = vld [vmem:[%s11677_s8 + $0x8] sm:$0xff]  }
 0x73a   :  { %v5615_v57 = vadd.f32 0.5, %v5613_v40  ;;  %v8359_v53 = vld [vmem:[%s11677_s8] sm:$0xff]   ;;  %v12043_v13 = vld [vmem:[#allocation64_spill] sm:$0xff] }
 0x73b   :  { %v11357_v42 = vadd.f32 %v5619_v22, %v5617_v25  ;;  %v12044_v25 = vld [vmem:[#allocation66_spill] sm:$0xff] }
 0x73c   :  { %6151 = vmatpush1.bf16.msra.mxu0 %v8306_v58  ;;  %6194 = vmatpush1.bf16.msra.mxu1 %v8309_v20 }
 0x73d   :  { %8646 = vtanh.f32 %v11357_v42  ;;  %6152 = vmatprep.subr.bf16.mxu0 %v8314_v54  ;;  %6195 = vmatprep.subr.bf16.mxu1 %v8317_v51  ;;  %v12045_v51 = vld [vmem:[#allocation65_spill] sm:$0xff] }
 0x740   :  { %6153 = vmatpush1.bf16.msra.mxu0 %v8312_v19  ;;  %6196 = vmatpush1.bf16.msra.mxu1 %v8315_v5 }
 0x741   :  { %6154 = vmatprep.subr.bf16.mxu0 %v8320_v17  ;;  %6197 = vmatprep.subr.bf16.mxu1 %v8323_v61  ;;  %v12046_v17 = vld [vmem:[#allocation70_spill] sm:$0xff] }
 0x742   :  { %v298_v61 = vadd.f32 %v12046_v17, %v9229_v45  ;;  %v12050_v45 = vld [vmem:[#allocation71_spill] sm:$0xff] }
 0x744   :  { %6155 = vmatpush1.bf16.msra.mxu0 %v8318_v27  ;;  %6198 = vmatpush1.bf16.msra.mxu1 %v8321_v59  ;;  %v12047_v59 = vld [vmem:[#allocation68_spill] sm:$0xff] }
 0x745   :  { %6156 = vmatprep.subr.bf16.mxu0 %v8326_v47  ;;  %6199 = vmatprep.subr.bf16.mxu1 %v8329_v4 }
 0x746   :  { %v8645_v60 = vpop.eup %8644 }
 0x747   :  { %v5624_v11 = vmul.f32 %v8645_v60, %v5614_v49 }
 0x748   :  { %6157 = vmatpush1.bf16.msra.mxu0 %v8324_v2  ;;  %6200 = vmatpush1.bf16.msra.mxu1 %v8327_v37  ;;  %v12048_v37 = vld [vmem:[#allocation69_spill] sm:$0xff] }
 0x749   :  { %6158 = vmatprep.subr.bf16.mxu0 %v8332_v10  ;;  %6201 = vmatprep.subr.bf16.mxu1 %v8335_v38  ;;  %v12049_v10 = vld [vmem:[#allocation67_spill] sm:$0xff] }
 0x74a   :  { %v8647_v56 = vpop.eup %8646 }
 0x74b   :  { %v5625_v28 = vmul.f32 %v8647_v56, %v5615_v57 }
 0x74c   :  { %6159 = vmatpush1.bf16.msra.mxu0 %v8330_v24  ;;  %6202 = vmatpush1.bf16.msra.mxu1 %v8333_v18  ;;  %v411_v24 = vadd.f32 %v12050_v45, %v9233_v46 }
 0x74d   :  { %v5627_v12 = vpack.c.bf16 %v5625_v28, %v5624_v11  ;;  %7791 = vmatprep.subr.bf16.mxu1 %v8336_v63  ;;  %7759 = vmatprep.subr.bf16.mxu0 %v8351_v9 }
 0x74f   :  { %7716 = vst [vmem:[#allocation5 + $0x8] sm:$0xff] %v5627_v12   ;;  %6177 = vmatmul.mubr.bf16.vlgmr.msra.gmra.mxu0 %v5627_v12  ;;  %6220 = vmatmul.mubr.bf16.vlgmr.msra.gmra.mxu1 %v5627_v12 }
 0x750   :  { %7792 = vmatpush3.bf16.msra.mxu1 %v8336_v63  ;;  %7807 = vmatprep.mubr.bf16.mxu1 %v8337_v30 }
 0x751   :  { %7793 = vmatprep.subr.bf16.mxu1 %v8338_v55  ;;  %7760 = vmatpush3.bf16.msra.mxu0 %v8351_v9 }
 0x752   :  { %7761 = vmatprep.subr.bf16.mxu0 %v8353_v6 }
 0x754   :  { %7794 = vmatpush3.bf16.msra.mxu1 %v8338_v55 }
 0x755   :  { %7795 = vmatprep.subr.bf16.mxu1 %v8339_v52  ;;  %7762 = vmatpush3.bf16.msra.mxu0 %v8353_v6 }
 0x756   :  { %7763 = vmatprep.subr.bf16.mxu0 %v8354_v34 }
 0x758   :  { %7796 = vmatpush3.bf16.msra.mxu1 %v8339_v52 }
 0x759   :  { %7797 = vmatprep.subr.bf16.mxu1 %v8340_v7  ;;  %7764 = vmatpush3.bf16.msra.mxu0 %v8354_v34 }
 0x75a   :  { %7765 = vmatprep.subr.bf16.mxu0 %v8355_v0 }
 0x75c   :  { %7798 = vmatpush3.bf16.msra.mxu1 %v8340_v7 }
 0x75d   :  { %7799 = vmatprep.subr.bf16.mxu1 %v8341_v23  ;;  %7766 = vmatpush3.bf16.msra.mxu0 %v8355_v0  ;;  %v12051_v0 = vld [vmem:[#allocation72_spill] sm:$0xff] }
 0x75e   :  { %7767 = vmatprep.subr.bf16.mxu0 %v8356_v50 }
 0x760   :  { %7800 = vmatpush3.bf16.msra.mxu1 %v8341_v23 }
 0x761   :  { %7801 = vmatprep.subr.bf16.mxu1 %v8342_v43  ;;  %7768 = vmatpush3.bf16.msra.mxu0 %v8356_v50 }
 0x762   :  { %7769 = vmatprep.subr.bf16.mxu0 %v8357_v35 }
 0x764   :  { %7802 = vmatpush3.bf16.msra.mxu1 %v8342_v43 }
 0x765   :  { %7803 = vmatprep.subr.bf16.mxu1 %v8343_v44  ;;  %7770 = vmatpush3.bf16.msra.mxu0 %v8357_v35 }
 0x766   :  { %7771 = vmatprep.subr.bf16.mxu0 %v8358_v15 }
 0x768   :  { %7804 = vmatpush3.bf16.msra.mxu1 %v8343_v44 }
 0x769   :  { %7805 = vmatprep.subr.bf16.mxu1 %v8344_v33  ;;  %7772 = vmatpush3.bf16.msra.mxu0 %v8358_v15 }
 0x76a   :  { %7773 = vmatprep.subr.bf16.mxu0 %v8359_v53 }
 0x76c   :  { %7806 = vmatpush3.bf16.msra.mxu1 %v8344_v33 }
 0x76d   :  { %7774 = vmatpush3.bf16.msra.mxu0 %v8359_v53  ;;  %v12052_v53 = vld [vmem:[#allocation74_spill] sm:$0xff] }
 0x76f   :  { %7808 = vmatmul.mubr.bf16.vlgmr.msra.gmra.mxu1 %v8345_v16 }
 0x770   :  { %7811 = vmatprep.mubr.bf16.mxu1 %v8346_v48 }
 0x777   :  { %7812 = vmatmul.mubr.bf16.gmra.mxu1 %v8347_v36 }
 0x778   :  { %7815 = vmatprep.mubr.bf16.mxu1 %v8348_v14 }
 0x77f   :  { %7816 = vmatmul.mubr.bf16.gmra.mxu1 %v8349_v32 }
 0x780   :  { %7819 = vmatprep.mubr.bf16.mxu1 %v8350_v21 }
 0x7ef   :  { %v5884_v31 = vpop.f32.mrf.mxu0  ;;  %v5927_v62 = vpop.f32.mrf.mxu1 }
 0x7f0   :  { %v5936_v3 = vadd.f32 %v5884_v31, %v12043_v13  ;;  %v5938_v19 = vadd.f32 %v5927_v62, %v12045_v51  ;;  %v12053_v13 = vld [vmem:[#allocation73_spill] sm:$0xff] }
 0x7f1   :  { %v5886_v22 = vpop.f32.mrf.mxu0  ;;  %v5929_v58 = vpop.f32.mrf.mxu1 }
 0x7f2   :  { %v6238_v20 = vmul.f32 0.5, %v5936_v3  ;;  %v5937_v54 = vadd.f32 %v5886_v22, %v12044_v25  ;;  %v5939_v38 = vadd.f32 %v5929_v58, %v12049_v10 }
 0x7f3   :  { %v5888_v5 = vpop.f32.mrf.mxu0  ;;  %v5931_v47 = vpop.f32.mrf.mxu1 }
 0x7f4   :  { %8648 = vtanh.f32 %v6238_v20  ;;  %v6246_v27 = vmul.f32 0.5, %v5937_v54  ;;  %v5940_v8 = vadd.f32 %v5888_v5, %v12047_v59  ;;  %v5942_v29 = vadd.f32 %v5931_v47, %v12048_v37  ;;  %v12054_v20 = vld [vmem:[#allocation76_spill] sm:$0xff]  ;;  %v12055_v5 = vld [vmem:[#allocation78_spill] sm:$0xff]  ;;  %v12056_v59 = vld [vmem:[#allocation77_spill] sm:$0xff] }
 0x7f5   :  { %v5890_v4 = vpop.f32.mrf.mxu0  ;;  %v5933_v60 = vpop.f32.mrf.mxu1  ;;  %v6256_v18 = vmul.f32 0.5, %v5939_v38  ;;  %v12057_v37 = vld [vmem:[#allocation75_spill] sm:$0xff] }
 0x7f6   :  { %8650 = vtanh.f32 %v6246_v27  ;;  %v6239_v26 = vmul.f32 0.5, %v5940_v8  ;;  %v5941_v2 = vadd.f32 %v5890_v4, %v298_v61  ;;  %v5943_v49 = vadd.f32 %v5933_v60, %v411_v24  ;;  %v12058_v24 = vld [vmem:[#allocation79_spill] sm:$0xff] }
 0x7f7   :  { %8652 = vtanh.f32 %v5938_v19 }
 0x7f8   :  { %8654 = vtanh.f32 %v6239_v26  ;;  %v6247_v40 = vmul.f32 0.5, %v5941_v2  ;;  %v6257_v55 = vmul.f32 0.5, %v5943_v49 }
 0x7fa   :  { %8656 = vtanh.f32 %v6247_v40 }
 0x7fb   :  { %8658 = vtanh.f32 %v5942_v29 }
 0x7fc   :  { %8660 = vtanh.f32 %v6256_v18 }
 0x7fd   :  { %8662 = vtanh.f32 %v6257_v55 }
 0x801   :  { %v8649_v57 = vpop.eup %8648 }
 0x802   :  { %v6242_v63 = vmul.f32 0.5, %v8649_v57 }
 0x803   :  { %v8651_v56 = vpop.eup %8650 }
 0x804   :  { %v8653_v11 = vpop.eup %8652  ;;  %v6244_v28 = vadd.f32 0.5, %v6242_v63  ;;  %v6250_v12 = vmul.f32 0.5, %v8651_v56 }
 0x805   :  { %v8655_v30 = vpop.eup %8654 }
 0x806   :  { %v6252_v52 = vadd.f32 0.5, %v6250_v12  ;;  %v6266_v7 = vmul.f32 %v8653_v11, %v6244_v28  ;;  %v6243_v23 = vmul.f32 0.5, %v8655_v30 }
 0x807   :  { %v8657_v43 = vpop.eup %8656 }
 0x808   :  { %v6264_v44 = vmul.f32 %v6252_v52, %v11287_v39  ;;  %v6245_v33 = vadd.f32 0.5, %v6243_v23  ;;  %v6251_v16 = vmul.f32 0.5, %v8657_v43  ;;  %v8659_v46 = vpop.eup %8658 }
 0x809   :  { %v8661_v34 = vpop.eup %8660 }
 0x80a   :  { %v6268_v48 = vadd.f32 %v6266_v7, %v6264_v44  ;;  %v6253_v36 = vadd.f32 0.5, %v6251_v16  ;;  %v6267_v14 = vmul.f32 %v8659_v46, %v6245_v33  ;;  %v6260_v62 = vmul.f32 0.5, %v8661_v34  ;;  %v8663_v25 = vpop.eup %8662 }
 0x80b   :  { %v6261_v27 = vmul.f32 0.5, %v8663_v25 }
 0x80c   :  { %8664 = vtanh.f32 %v6268_v48  ;;  %v6265_v32 = vmul.f32 %v6253_v36, %v11291_v1  ;;  %v6262_v61 = vadd.f32 0.5, %v6260_v62 }
 0x80d   :  { %v6263_v2 = vadd.f32 0.5, %v6261_v27 }
 0x80e   :  { %v6269_v21 = vadd.f32 %v6267_v14, %v6265_v32 }
 0x80f   :  { %v6178_v9 = vpop.f32.mrf.mxu0  ;;  %v6221_v6 = vpop.f32.mrf.mxu1 }
 0x810   :  { %8666 = vtanh.f32 %v6269_v21  ;;  %v6230_v50 = vadd.f32 %v6178_v9, %v12051_v0  ;;  %v6232_v3 = vadd.f32 %v6221_v6, %v12053_v13  ;;  %v8361_v13 = vld [vmem:[#allocation5 + $0x8] sm:$0xff]  }
 0x811   :  { %v6180_v35 = vpop.f32.mrf.mxu0  ;;  %v6223_v15 = vpop.f32.mrf.mxu1 }
 0x812   :  { %v6274_v39 = vmul.f32 0.5, %v6230_v50  ;;  %v6231_v31 = vadd.f32 %v6180_v35, %v12052_v53  ;;  %v6233_v29 = vadd.f32 %v6223_v15, %v12057_v37 }
 0x813   :  { %v6182_v22 = vpop.f32.mrf.mxu0  ;;  %v6225_v54 = vpop.f32.mrf.mxu1 }
 0x814   :  { %8668 = vtanh.f32 %v6274_v39  ;;  %v6282_v58 = vmul.f32 0.5, %v6231_v31  ;;  %v6234_v1 = vadd.f32 %v6182_v22, %v12054_v20  ;;  %v6236_v8 = vadd.f32 %v6225_v54, %v12056_v59  ;;  %v8364_v22 = vld [vmem:[#allocation5 + $0x20] sm:$0xff]   ;;  %v8366_v20 = vld [vmem:[#allocation5 + $0x30] sm:$0xff]  }
 0x815   :  { %v6184_v51 = vpop.f32.mrf.mxu0  ;;  %v6227_v10 = vpop.f32.mrf.mxu1  ;;  %v6292_v45 = vmul.f32 0.5, %v6233_v29 }
 0x816   :  { %8670 = vtanh.f32 %v6282_v58  ;;  %v6275_v19 = vmul.f32 0.5, %v6234_v1  ;;  %v6235_v17 = vadd.f32 %v6184_v51, %v12055_v5  ;;  %v6237_v18 = vadd.f32 %v6227_v10, %v12058_v24  ;;  %v8365_v58 = vld [vmem:[#allocation5 + $0x28] sm:$0xff]   ;;  %v8367_v1 = vld [vmem:[#allocation5 + $0x38] sm:$0xff]  }
 0x817   :  { %8672 = vtanh.f32 %v6232_v3  ;;  %v8362_v3 = vld [vmem:[#allocation5 + $0x10] sm:$0xff]  }
 0x818   :  { %8674 = vtanh.f32 %v6275_v19  ;;  %v6283_v47 = vmul.f32 0.5, %v6235_v17  ;;  %v6293_v12 = vmul.f32 0.5, %v6237_v18 }
 0x819   :  { %v8665_v4 = vpop.eup %8664 }
 0x81a   :  { %v6272_v26 = vmul.f32 %v8665_v4, %v6262_v61  ;;  %8676 = vtanh.f32 %v6283_v47 }
 0x81b   :  { %8678 = vtanh.f32 %v6236_v8  ;;  %v11475_v8 = vld [vmem:[%s11678_s9] ss:$0 sm:$0xff] }
 0x81c   :  { %8680 = vtanh.f32 %v6292_v45 }
 0x81d   :  { %v8667_v40 = vpop.eup %8666  ;;  %8682 = vtanh.f32 %v6293_v12 }
 0x81e   :  { %v6273_v38 = vmul.f32 %v8667_v40, %v6263_v2 }
 0x820   :  { %v7720_v60 = vpack.c.bf16 %v6273_v38, %v6272_v26 }
 0x821   :  { %v8669_v49 = vpop.eup %8668 }
 0x822   :  { %7721 = vst [vmem:[#allocation4 + $0x38] sm:$0xff] %v7720_v60   ;;  %v6278_v57 = vmul.f32 0.5, %v8669_v49 }
 0x823   :  { %v8671_v63 = vpop.eup %8670 }
 0x824   :  { %v8673_v56 = vpop.eup %8672  ;;  %v6280_v11 = vadd.f32 0.5, %v6278_v57  ;;  %v6286_v28 = vmul.f32 0.5, %v8671_v63 }
 0x825   :  { %v8675_v55 = vpop.eup %8674 }
 0x826   :  { %v6288_v30 = vadd.f32 0.5, %v6286_v28  ;;  %v6302_v52 = vmul.f32 %v8673_v56, %v6280_v11  ;;  %v6279_v7 = vmul.f32 0.5, %v8675_v55 }
 0x827   :  { %v8677_v23 = vpop.eup %8676 }
 0x828   :  { %v6300_v43 = vmul.f32 %v6288_v30, %v11341_v41  ;;  %v6281_v44 = vadd.f32 0.5, %v6279_v7  ;;  %v6287_v33 = vmul.f32 0.5, %v8677_v23  ;;  %v8679_v16 = vpop.eup %8678 }
 0x829   :  { %v8352_v46 = vld [vmem:[#allocation4 + $0x38] sm:$0xff]   ;;  %v8681_v9 = vpop.eup %8680 }
 0x82a   :  { %v6304_v48 = vadd.f32 %v6302_v52, %v6300_v43  ;;  %v6289_v36 = vadd.f32 0.5, %v6287_v33  ;;  %v6303_v14 = vmul.f32 %v8679_v16, %v6281_v44  ;;  %7820 = vmatmul.mubr.bf16.gmra.mxu1 %v8352_v46  ;;  %v6296_v6 = vmul.f32 0.5, %v8681_v9  ;;  %v8683_v34 = vpop.eup %8682 }
 0x82b   :  { %v6297_v50 = vmul.f32 0.5, %v8683_v34 }
 0x82c   :  { %8684 = vtanh.f32 %v6304_v48  ;;  %v6301_v32 = vmul.f32 %v6289_v36, %v11357_v42  ;;  %v6298_v0 = vadd.f32 0.5, %v6296_v6  ;;  %v8363_v42 = vld [vmem:[#allocation5 + $0x18] sm:$0xff]  }
 0x82d   :  { %v6299_v15 = vadd.f32 0.5, %v6297_v50 }
 0x82e   :  { %v6305_v21 = vadd.f32 %v6303_v14, %v6301_v32 }
 0x82f   :  { %v7809_v25 = vpop.f32.mrf.mxu1 }
 0x830   :  { %8686 = vtanh.f32 %v6305_v21 }
 0x831   :  { %v6718_v54 = vpop.f32.mrf.mxu1 }
 0x833   :  { %v7810_v51 = vpop.f32.mrf.mxu1 }
 0x835   :  { %v6721_v19 = vpop.f32.mrf.mxu1 }
 0x837   :  { %v7813_v5 = vpop.f32.mrf.mxu1 }
 0x839   :  { %v8685_v41 = vpop.eup %8684  ;;  %v6734_v17 = vpop.f32.mrf.mxu1 }
 0x83a   :  { %v6308_v35 = vmul.f32 %v8685_v41, %v6298_v0 }
 0x83b   :  { %v7814_v61 = vpop.f32.mrf.mxu1 }
 0x83d   :  { %v8687_v39 = vpop.eup %8686  ;;  %v6737_v27 = vpop.f32.mrf.mxu1 }
 0x83e   :  { %v6309_v53 = vmul.f32 %v8687_v39, %v6299_v15 }
 0x83f   :  { %v7817_v37 = vpop.f32.mrf.mxu1 }
 0x840   :  { %v7725_v31 = vpack.c.bf16 %v6309_v53, %v6308_v35 }
 0x841   :  { %v6750_v24 = vpop.f32.mrf.mxu1 }
 0x842   :  { %7726 = vst [vmem:[#allocation5] sm:$0xff] %v7725_v31  }
 0x843   :  { %v7818_v56 = vpop.f32.mrf.mxu1 }
 0x845   :  { %v6753_v23 = vpop.f32.mrf.mxu1 }
 0x849   :  { %v8360_v62 = vld [vmem:[#allocation5] sm:$0xff]  }
 0x84a   :  { %7775 = vmatprep.mubr.bf16.mxu0 %v8360_v62 }
 0x84b   :  { %7776 = vmatmul.mubr.bf16.vlgmr.msra.gmra.mxu0 %v8361_v13 }
 0x84c   :  { %7779 = vmatprep.mubr.bf16.mxu0 %v8362_v3 }
 0x853   :  { %7780 = vmatmul.mubr.bf16.gmra.mxu0 %v8363_v42 }
 0x854   :  { %7783 = vmatprep.mubr.bf16.mxu0 %v8364_v22 }
 0x85b   :  { %7784 = vmatmul.mubr.bf16.gmra.mxu0 %v8365_v58 }
 0x85c   :  { %7787 = vmatprep.mubr.bf16.mxu0 %v8366_v20 }
 0x863   :  { %7788 = vmatmul.mubr.bf16.gmra.mxu0 %v8367_v1 }
 0x8ea   :  { %v7821_v16 = vpop.f32.mrf.mxu1 }
 0x8ec   :  { %v6766_v9 = vpop.f32.mrf.mxu1 }
 0x8ee   :  { %v7822_v35 = vpop.f32.mrf.mxu1 }
 0x8f0   :  { %v6769_v3 = vpop.f32.mrf.mxu1 }
 0x90b   :  { %v7777_v59 = vpop.f32.mrf.mxu0 }
 0x90c   :  { %v6727_v47 = vadd.f32 %v7809_v25, %v7777_v59 }
 0x90d   :  { %v6525_v4 = vpop.f32.mrf.mxu0 }
 0x90e   :  { %v6719_v26 = vadd.f32 %v6718_v54, %v6525_v4  ;;  %v11478_v2 = vadd.f32 %v11475_v8, %v6727_v47 }
 0x90f   :  { %v7778_v29 = vpop.f32.mrf.mxu0 }
 0x910   :  { %v6730_v40 = vadd.f32 %v7810_v51, %v7778_v29  ;;  %6808 = vmax.xlane.f32.xlu1 %v11478_v2  ;;  %v11482_v10 = vadd.f32 %v11475_v8, %v6719_v26 }
 0x911   :  { %v6528_v38 = vpop.f32.mrf.mxu0 }
 0x912   :  { %v6722_v60 = vadd.f32 %v6721_v19, %v6528_v38  ;;  %6804 = vmax.xlane.f32.xlu0 %v11482_v10  ;;  %v11486_v45 = vadd.f32 %v11475_v8, %v6730_v40 }
 0x913   :  { %v7781_v18 = vpop.f32.mrf.mxu0 }
 0x914   :  { %v6743_v49 = vadd.f32 %v7813_v5, %v7781_v18  ;;  %6810 = vmax.xlane.f32.xlu1 %v11486_v45  ;;  %v11490_v57 = vadd.f32 %v11475_v8, %v6722_v60 }
 0x915   :  { %v6541_v63 = vpop.f32.mrf.mxu0 }
 0x916   :  { %6806 = vmax.xlane.f32.xlu0 %v11490_v57  ;;  %v6735_v28 = vadd.f32 %v6734_v17, %v6541_v63  ;;  %v11494_v55 = vadd.f32 %v11475_v8, %v6743_v49 }
 0x917   :  { %v7782_v11 = vpop.f32.mrf.mxu0 }
 0x918   :  { %v6746_v12 = vadd.f32 %v7814_v61, %v7782_v11  ;;  %v11502_v33 = vadd.f32 %v11475_v8, %v6735_v28 }
 0x919   :  { %v6544_v30 = vpop.f32.mrf.mxu0 }
 0x91a   :  { %v6738_v52 = vadd.f32 %v6737_v27, %v6544_v30  ;;  %6816 = vmax.xlane.f32.xlu0 %v11494_v55  ;;  %v11498_v7 = vadd.f32 %v11475_v8, %v6746_v12 }
 0x91b   :  { %v7785_v43 = vpop.f32.mrf.mxu0 }
 0x91c   :  { %v6759_v44 = vadd.f32 %v7817_v37, %v7785_v43  ;;  %6818 = vmax.xlane.f32.xlu1 %v11498_v7  ;;  %v11506_v48 = vadd.f32 %v11475_v8, %v6738_v52 }
 0x91d   :  { %v6557_v46 = vpop.f32.mrf.mxu0 }
 0x91e   :  { %6812 = vmax.xlane.f32.xlu0 %v11502_v33  ;;  %v6751_v14 = vadd.f32 %v6750_v24, %v6557_v46  ;;  %v11510_v21 = vadd.f32 %v11475_v8, %v6759_v44 }
 0x91f   :  { %v7786_v36 = vpop.f32.mrf.mxu0 }
 0x920   :  { %v6762_v32 = vadd.f32 %v7818_v56, %v7786_v36  ;;  %6814 = vmax.xlane.f32.xlu1 %v11506_v48  ;;  %v11518_v41 = vadd.f32 %v11475_v8, %v6751_v14 }
 0x921   :  { %v6560_v6 = vpop.f32.mrf.mxu0 }
 0x922   :  { %v6754_v34 = vadd.f32 %v6753_v23, %v6560_v6  ;;  %6824 = vmax.xlane.f32.xlu0 %v11510_v21  ;;  %v11514_v0 = vadd.f32 %v11475_v8, %v6762_v32 }
 0x923   :  { %v7789_v50 = vpop.f32.mrf.mxu0 }
 0x924   :  { %6826 = vmax.xlane.f32.xlu1 %v11514_v0  ;;  %v11522_v53 = vadd.f32 %v11475_v8, %v6754_v34  ;;  %v6775_v62 = vadd.f32 %v7821_v16, %v7789_v50 }
 0x925   :  { %v6573_v15 = vpop.f32.mrf.mxu0 }
 0x926   :  { %v6767_v39 = vadd.f32 %v6766_v9, %v6573_v15  ;;  %6820 = vmax.xlane.f32.xlu0 %v11518_v41  ;;  %v11533_v1 = vadd.f32 %v11475_v8, %v6775_v62 }
 0x927   :  { %v7790_v31 = vpop.f32.mrf.mxu0 }
 0x928   :  { %6822 = vmax.xlane.f32.xlu1 %v11522_v53  ;;  %v11526_v13 = vadd.f32 %v11475_v8, %v6767_v39  ;;  %v6778_v58 = vadd.f32 %v7822_v35, %v7790_v31 }
 0x929   :  { %v6576_v42 = vpop.f32.mrf.mxu0 }
 0x92a   :  { %v6770_v22 = vadd.f32 %v6769_v3, %v6576_v42  ;;  %6828 = vmax.xlane.f32.xlu0 %v11526_v13  ;;  %v11538_v25 = vadd.f32 %v11475_v8, %v6778_v58 }
 0x92c   :  { %v11530_v20 = vadd.f32 %v11475_v8, %v6770_v22 }
 0x92e   :  { %6830 = vmax.xlane.f32.xlu1 %v11530_v20  ;;  %6832 = vmax.xlane.f32.xlu0 %v11533_v1 }
 0x932   :  { %6834 = vmax.xlane.f32.xlu1 %v11538_v25 }
 0x999   :  { %v6809_v54 = vpop.xlane.xlu1 %6808 }
 0x99a   :  { %v6838_v51 = vsub.f32 %v11478_v2, %v6809_v54 }
 0x99b   :  { %v6805_v19 = vpop.xlane.xlu0 %6804 }
 0x99c   :  { %v6856_v5 = vmul.f32 1.442695, %v6838_v51  ;;  %v6836_v17 = vsub.f32 %v11482_v10, %v6805_v19 }
 0x99d   :  { %v6811_v61 = vpop.xlane.xlu1 %6810 }
 0x99e   :  { %8688 = vpow2.f32 %v6856_v5  ;;  %v6852_v27 = vmul.f32 1.442695, %v6836_v17  ;;  %v6839_v59 = vsub.f32 %v11486_v45, %v6811_v61 }
 0x99f   :  { %v6807_v47 = vpop.xlane.xlu0 %6806 }
 0x9a0   :  { %v6858_v4 = vmul.f32 1.442695, %v6839_v59  ;;  %v6837_v26 = vsub.f32 %v11490_v57, %v6807_v47  ;;  %8690 = vpow2.f32 %v6852_v27 }
 0x9a2   :  { %8692 = vpow2.f32 %v6858_v4  ;;  %v6854_v8 = vmul.f32 1.442695, %v6837_v26 }
 0x9a3   :  { %v6817_v37 = vpop.xlane.xlu0 %6816 }
 0x9a4   :  { %v6842_v29 = vsub.f32 %v11494_v55, %v6817_v37  ;;  %8694 = vpow2.f32 %v6854_v8 }
 0x9a5   :  { %v6819_v2 = vpop.xlane.xlu1 %6818 }
 0x9a6   :  { %v6864_v40 = vmul.f32 1.442695, %v6842_v29  ;;  %v6843_v10 = vsub.f32 %v11498_v7, %v6819_v2 }
 0x9a7   :  { %v6813_v38 = vpop.xlane.xlu0 %6812 }
 0x9a8   :  { %8696 = vpow2.f32 %v6864_v40  ;;  %v6866_v60 = vmul.f32 1.442695, %v6843_v10  ;;  %v6840_v45 = vsub.f32 %v11502_v33, %v6813_v38 }
 0x9a9   :  { %v6815_v24 = vpop.xlane.xlu1 %6814 }
 0x9aa   :  { %8698 = vpow2.f32 %v6866_v60  ;;  %v6860_v18 = vmul.f32 1.442695, %v6840_v45  ;;  %v6841_v49 = vsub.f32 %v11506_v48, %v6815_v24 }
 0x9ab   :  { %v11549_v57 = vpop.eup %8688  ;;  %v6825_v63 = vpop.xlane.xlu0 %6824 }
 0x9ac   :  { %8700 = vpow2.f32 %v6860_v18  ;;  %v6862_v56 = vmul.f32 1.442695, %v6841_v49  ;;  %v6846_v11 = vsub.f32 %v11510_v21, %v6825_v63  ;;  %6888 = vadd.xlane.f32.xlu0 %v11549_v57 }
 0x9ad   :  { %v6827_v28 = vpop.xlane.xlu1 %6826  ;;  %v11553_v12 = vpop.eup %8690 }
 0x9ae   :  { %8702 = vpow2.f32 %v6862_v56  ;;  %v6872_v55 = vmul.f32 1.442695, %v6846_v11  ;;  %v6847_v30 = vsub.f32 %v11514_v0, %v6827_v28 }
 0x9af   :  { %v11556_v52 = vpop.eup %8692  ;;  %v6821_v7 = vpop.xlane.xlu0 %6820 }
 0x9b0   :  { %8704 = vpow2.f32 %v6872_v55  ;;  %v6874_v23 = vmul.f32 1.442695, %v6847_v30  ;;  %v6844_v43 = vsub.f32 %v11518_v41, %v6821_v7  ;;  %6890 = vadd.xlane.f32.xlu1 %v11556_v52  ;;  %6884 = vadd.xlane.f32.xlu0 %v11553_v12 }
 0x9b1   :  { %v6823_v44 = vpop.xlane.xlu1 %6822  ;;  %v11562_v46 = vpop.eup %8694 }
 0x9b2   :  { %8706 = vpow2.f32 %v6874_v23  ;;  %v6868_v33 = vmul.f32 1.442695, %v6844_v43  ;;  %v6845_v16 = vsub.f32 %v11522_v53, %v6823_v44 }
 0x9b3   :  { %v6829_v48 = vpop.xlane.xlu0 %6828 }
 0x9b4   :  { %8708 = vpow2.f32 %v6868_v33  ;;  %v6870_v36 = vmul.f32 1.442695, %v6845_v16  ;;  %v6848_v14 = vsub.f32 %v11526_v13, %v6829_v48  ;;  %6886 = vadd.xlane.f32.xlu1 %v11562_v46 }
 0x9b5   :  { %v11566_v32 = vpop.eup %8696 }
 0x9b6   :  { %8710 = vpow2.f32 %v6870_v36  ;;  %v6876_v21 = vmul.f32 1.442695, %v6848_v14  ;;  %6896 = vadd.xlane.f32.xlu0 %v11566_v32 }
 0x9b7   :  { %v11569_v9 = vpop.eup %8698  ;;  %v6831_v6 = vpop.xlane.xlu1 %6830 }
 0x9b8   :  { %v6833_v34 = vpop.xlane.xlu0 %6832  ;;  %8712 = vpow2.f32 %v6876_v21  ;;  %v6849_v0 = vsub.f32 %v11530_v20, %v6831_v6  ;;  %6898 = vadd.xlane.f32.xlu1 %v11569_v9 }
 0x9b9   :  { %v6850_v50 = vsub.f32 %v11533_v1, %v6833_v34  ;;  %v11574_v41 = vpop.eup %8700 }
 0x9ba   :  { %v6878_v35 = vmul.f32 1.442695, %v6849_v0  ;;  %6892 = vadd.xlane.f32.xlu0 %v11574_v41 }
 0x9bb   :  { %v6880_v15 = vmul.f32 1.442695, %v6850_v50  ;;  %v11577_v39 = vpop.eup %8702  ;;  %v6835_v53 = vpop.xlane.xlu1 %6834 }
 0x9bc   :  { %8714 = vpow2.f32 %v6878_v35  ;;  %v6851_v31 = vsub.f32 %v11538_v25, %v6835_v53  ;;  %6894 = vadd.xlane.f32.xlu1 %v11577_v39 }
 0x9bd   :  { %v11581_v62 = vpop.eup %8704  ;;  %8716 = vpow2.f32 %v6880_v15 }
 0x9be   :  { %v6882_v13 = vmul.f32 1.442695, %v6851_v31  ;;  %6904 = vadd.xlane.f32.xlu0 %v11581_v62 }
 0x9bf   :  { %v11584_v3 = vpop.eup %8706 }
 0x9c0   :  { %8718 = vpow2.f32 %v6882_v13  ;;  %6906 = vadd.xlane.f32.xlu1 %v11584_v3 }
 0x9c1   :  { %v11587_v42 = vpop.eup %8708 }
 0x9c2   :  { %6900 = vadd.xlane.f32.xlu0 %v11587_v42 }
 0x9c3   :  { %v11590_v22 = vpop.eup %8710 }
 0x9c4   :  { %6902 = vadd.xlane.f32.xlu1 %v11590_v22 }
 0x9c5   :  { %v11593_v58 = vpop.eup %8712 }
 0x9c6   :  { %6908 = vadd.xlane.f32.xlu0 %v11593_v58 }
 0x9c9   :  { %v11596_v20 = vpop.eup %8714 }
 0x9ca   :  { %v11598_v1 = vpop.eup %8716  ;;  %6910 = vadd.xlane.f32.xlu1 %v11596_v20 }
 0x9cb   :  { %6912 = vadd.xlane.f32.xlu0 %v11598_v1 }
 0x9cd   :  { %v11602_v25 = vpop.eup %8718 }
 0x9ce   :  { %6914 = vadd.xlane.f32.xlu1 %v11602_v25 }
 0xa35   :  { %v6889_v54 = vpop.xlane.xlu0 %6888 }
 0xa36   :  { %8720 = vrcp.f32 %v6889_v54 }
 0xa39   :  { %v6891_v51 = vpop.xlane.xlu1 %6890  ;;  %v6885_v19 = vpop.xlane.xlu0 %6884 }
 0xa3a   :  { %8722 = vrcp.f32 %v6891_v51 }
 0xa3b   :  { %8724 = vrcp.f32 %v6885_v19 }
 0xa3d   :  { %v6887_v5 = vpop.xlane.xlu1 %6886 }
 0xa3e   :  { %8726 = vrcp.f32 %v6887_v5 }
 0xa3f   :  { %v6897_v17 = vpop.xlane.xlu0 %6896 }
 0xa40   :  { %8728 = vrcp.f32 %v6897_v17 }
 0xa41   :  { %v6899_v61 = vpop.xlane.xlu1 %6898 }
 0xa42   :  { %8730 = vrcp.f32 %v6899_v61 }
 0xa43   :  { %v8721_v27 = vpop.eup %8720  ;;  %v6893_v59 = vpop.xlane.xlu0 %6892 }
 0xa44   :  { %v6921_v47 = vmul.f32 %v8721_v27, %v11549_v57  ;;  %8732 = vrcp.f32 %v6893_v59 }
 0xa45   :  { %v6895_v4 = vpop.xlane.xlu1 %6894 }
 0xa46   :  { %6950 = vst [vmem:[%s11679_s10 + $0x10] sm:$0xff] %v6921_v47  ;;  %8734 = vrcp.f32 %v6895_v4 }
 0xa47   :  { %v8723_v26 = vpop.eup %8722  ;;  %v6905_v8 = vpop.xlane.xlu0 %6904 }
 0xa48   :  { %v8725_v37 = vpop.eup %8724  ;;  %v6923_v29 = vmul.f32 %v8723_v26, %v11556_v52  ;;  %8736 = vrcp.f32 %v6905_v8 }
 0xa49   :  { %v6917_v2 = vmul.f32 %v8725_v37, %v11553_v12  ;;  %v6907_v40 = vpop.xlane.xlu1 %6906 }
 0xa4a   :  { %6951 = vst [vmem:[%s11679_s10 + $0x18] sm:$0xff] %v6923_v29  ;;  %8738 = vrcp.f32 %v6907_v40 }
 0xa4b   :  { %v8727_v10 = vpop.eup %8726  ;;  %6948 = vst [vmem:[%s11679_s10] sm:$0xff] %v6917_v2  ;;  %v6901_v38 = vpop.xlane.xlu0 %6900 }
 0xa4c   :  { %v6919_v60 = vmul.f32 %v8727_v10, %v11562_v46  ;;  %8740 = vrcp.f32 %v6901_v38 }
 0xa4d   :  { %v8729_v45 = vpop.eup %8728  ;;  %v6903_v24 = vpop.xlane.xlu1 %6902 }
 0xa4e   :  { %6949 = vst [vmem:[%s11679_s10 + $0x8] sm:$0xff] %v6919_v60  ;;  %v6929_v18 = vmul.f32 %v8729_v45, %v11566_v32  ;;  %8742 = vrcp.f32 %v6903_v24 }
 0xa4f   :  { %v8731_v49 = vpop.eup %8730  ;;  %v6909_v57 = vpop.xlane.xlu0 %6908 }
 0xa50   :  { %6954 = vst [vmem:[%s11679_s10 + $0x30] sm:$0xff] %v6929_v18  ;;  %v6931_v63 = vmul.f32 %v8731_v49, %v11569_v9  ;;  %8744 = vrcp.f32 %v6909_v57 }
 0xa51   :  { %v8733_v56 = vpop.eup %8732 }
 0xa52   :  { %6955 = vst [vmem:[%s11679_s10 + $0x38] sm:$0xff] %v6931_v63  ;;  %v6925_v11 = vmul.f32 %v8733_v56, %v11574_v41 }
 0xa53   :  { %v8735_v28 = vpop.eup %8734  ;;  %v6911_v12 = vpop.xlane.xlu1 %6910 }
 0xa54   :  { %6952 = vst [vmem:[%s11679_s10 + $0x20] sm:$0xff] %v6925_v11  ;;  %v6927_v55 = vmul.f32 %v8735_v28, %v11577_v39  ;;  %8746 = vrcp.f32 %v6911_v12  ;;  %v6913_v30 = vpop.xlane.xlu0 %6912 }
 0xa55   :  { %v8737_v52 = vpop.eup %8736  ;;  %8748 = vrcp.f32 %v6913_v30 }
 0xa56   :  { %6953 = vst [vmem:[%s11679_s10 + $0x28] sm:$0xff] %v6927_v55  ;;  %v6937_v7 = vmul.f32 %v8737_v52, %v11581_v62 }
 0xa57   :  { %v8739_v23 = vpop.eup %8738  ;;  %v6915_v43 = vpop.xlane.xlu1 %6914 }
 0xa58   :  { %6958 = vst [vmem:[%s11679_s10 + $0x50] sm:$0xff] %v6937_v7  ;;  %v6939_v44 = vmul.f32 %v8739_v23, %v11584_v3  ;;  %8750 = vrcp.f32 %v6915_v43 }
 0xa59   :  { %v8741_v33 = vpop.eup %8740 }
 0xa5a   :  { %6959 = vst [vmem:[%s11679_s10 + $0x58] sm:$0xff] %v6939_v44  ;;  %v6933_v16 = vmul.f32 %v8741_v33, %v11587_v42 }
 0xa5b   :  { %v8743_v46 = vpop.eup %8742 }
 0xa5c   :  { %6956 = vst [vmem:[%s11679_s10 + $0x40] sm:$0xff] %v6933_v16  ;;  %v6935_v48 = vmul.f32 %v8743_v46, %v11590_v22 }
 0xa5d   :  { %v8745_v36 = vpop.eup %8744 }
 0xa5e   :  { %6957 = vst [vmem:[%s11679_s10 + $0x48] sm:$0xff] %v6935_v48  ;;  %v6941_v14 = vmul.f32 %v8745_v36, %v11593_v58 }
 0xa60   :  { %6960 = vst [vmem:[%s11679_s10 + $0x60] sm:$0xff] %v6941_v14 }
 0xa61   :  { %v8747_v32 = vpop.eup %8746 }
 0xa62   :  { %v8749_v21 = vpop.eup %8748  ;;  %v6943_v9 = vmul.f32 %v8747_v32, %v11596_v20 }
 0xa63   :  { %v6945_v6 = vmul.f32 %v8749_v21, %v11598_v1 }
 0xa64   :  { %6961 = vst [vmem:[%s11679_s10 + $0x68] sm:$0xff] %v6943_v9 }
 0xa65   :  { %v8751_v34 = vpop.eup %8750  ;;  %6962 = vst [vmem:[%s11679_s10 + $0x70] sm:$0xff] %v6945_v6 }
 0xa66   :  { %v6947_v0 = vmul.f32 %v8751_v34, %v11602_v25 }
 0xa68   :  { %6963 = vst [vmem:[%s11679_s10 + $0x78] sm:$0xff] %v6947_v0 }

</bundles_post_ra>
